<compile_context>
chip_gen: v5e
topology: v5e:2x2
jax: 0.10.0
libtpu: 0.0.40
codegen_flags: <defaults>
</compile_context>

<pallas_src>
import jax
import jax.numpy as jnp
from jax.experimental import pallas as pl
from jax.experimental.pallas import tpu as pltpu


# ---------------------------------------------------------------------------
# Static module configuration (C4 group helper: num_rotations=4, scaler=1)
# ---------------------------------------------------------------------------
EMBED_SIZE = 128
NUM_ROTATIONS = 4
SCALER = 1
GROUP_SIZE = NUM_ROTATIONS * SCALER               # regular repr size |C4| = 4

IMAGE_SHAPE = (2, 84, 84)                         # (C, H, W): smallest valid spatial size
BATCH = 2

C_IN = 2                                          # 2 * trivial_repr
C_H1 = 8 * GROUP_SIZE                             # 32
C_H2 = 16 * GROUP_SIZE                            # 64
C_OUT = (EMBED_SIZE // NUM_ROTATIONS // SCALER) * GROUP_SIZE   # 128

# (cin, cout, kernel, stride) of the six R2Conv layers in the module.
LAYER_CFG = [
    (C_IN, C_H1, 8, 4),
    (C_H1, C_H2, 4, 2),
    (C_H2, C_H2, 3, 1),
    (C_H2, C_H2, 3, 1),
    (C_H2, C_H2, 3, 1),
    (C_H2, C_OUT, 3, 1),
]

# Storage dtype for weights and intermediate activations (accumulation is f32).
COMPUTE_DTYPE = jnp.bfloat16

# ---- spatial chain for the 84x84 input ------------------------------------
H0 = IMAGE_SHAPE[1]
H1 = (H0 - 8) // 4 + 1        # 20 : dense layer-1 output
H2 = (H1 - 4) // 2 + 1        # 9
H3 = H2 - 2                   # 7
H4 = H3 - 2                   # 5
H5 = H4 - 2                   # 3
H6 = H5 - 2                   # 1

PITCH = H1 // 2               # 10 : row pitch of every flattened activation
PAR_ROWS = PITCH * PITCH      # 100: rows per parity image of layer-1 output
PATCH1 = 8 * 8 * C_IN         # 128: layer-1 im2col patch length

# Row counts ("wide" M, stored at pitch PITCH, garbage rows never consumed).
M2 = (H2 - 1) * PITCH + H2    # 89
M3 = (H3 - 1) * PITCH + H3    # 67
M4 = (H4 - 1) * PITCH + H4    # 45
M5 = (H5 - 1) * PITCH + H5    # 23
M6 = (H6 - 1) * PITCH + H6    # 1

# Structural guards (the final store hard-codes a single 1x1 embedding row,
# and every tap slice must stay inside its producer's stored rows).
assert IMAGE_SHAPE[1] == IMAGE_SHAPE[2] and H1 % 2 == 0
assert H6 == 1 and M6 == 1, "final conv must land on a 1x1 spatial map"
assert (PITCH + 1) + M2 <= PAR_ROWS          # layer-2 taps within a parity image
assert (2 * PITCH + 2) + M3 <= M2            # layer-3 taps within layer-2 rows
assert (2 * PITCH + 2) + M4 <= M3
assert (2 * PITCH + 2) + M5 <= M4
assert (2 * PITCH + 2) + M6 <= M5


# ---------------------------------------------------------------------------
# The fused kernel: whole 6-layer conv stack for one batch element
# ---------------------------------------------------------------------------
def _encoder_kernel(xp_ref,
                    w1_ref, b1_ref, w2_ref, b2_ref, w3_ref, b3_ref,
                    w4_ref, b4_ref, w5_ref, b5_ref, w6_ref, b6_ref,
                    o_ref,
                    a1_ref, a2_ref, a3_ref, a4_ref, a5_ref):
    f32 = jnp.float32

    # ---- layer 1: k=8, s=4 conv == 4 parity matmuls over the host im2col.
    # a1[ph, pw, hh*10+ww, :] = relu(conv1)[2*hh+ph, 2*ww+pw, :]
    w1 = w1_ref[...]                                   # (128, 32) bf16, read once
    b1 = b1_ref[...]                                   # (1, 32)   f32
    for ph in range(2):
        for pw in range(2):
            y = jnp.dot(xp_ref[0, ph, pw, :, :], w1,   # (100,128)@(128,32)
                        preferred_element_type=f32)
            a1_ref[ph, pw, :, :] = jnp.maximum(y + b1, 0.0).astype(a1_ref.dtype)

    # ---- layer 2: k=4, s=2 : 16 accumulated taps, M=89 (pitch-10 rows).
    # Tap (kh,kw) hits parity image (kh%2, kw%2) at a contiguous row offset.
    acc = None
    for kh in range(4):
        for kw in range(4):
            off = (kh // 2) * PITCH + (kw // 2)
            lhs = a1_ref[kh % 2, kw % 2, pl.ds(off, M2), :]          # (89, 32)
            t = jnp.dot(lhs, w2_ref[kh * 4 + kw], preferred_element_type=f32)
            acc = t if acc is None else acc + t
    a2_ref[...] = jnp.maximum(acc + b2_ref[...], 0.0).astype(a2_ref.dtype)

    # ---- layers 3..6: k=3, s=1 on row-flattened (pitch-10) activations:
    # 9 accumulated taps per layer, each a contiguous row slice of the producer.
    def conv3x3(src_ref, w_ref, b_ref, m_out):
        acc = None
        for kh in range(3):
            for kw in range(3):
                lhs = src_ref[pl.ds(kh * PITCH + kw, m_out), :]       # (m_out, 64)
                t = jnp.dot(lhs, w_ref[kh * 3 + kw], preferred_element_type=f32)
                acc = t if acc is None else acc + t
        return jnp.maximum(acc + b_ref[...], 0.0)

    a3_ref[...] = conv3x3(a2_ref, w3_ref, b3_ref, M3).astype(a3_ref.dtype)
    a4_ref[...] = conv3x3(a3_ref, w4_ref, b4_ref, M4).astype(a4_ref.dtype)
    a5_ref[...] = conv3x3(a4_ref, w5_ref, b5_ref, M5).astype(a5_ref.dtype)

    # ---- layer 6: 3x3 -> 1x1 embedding (M6 == 1 asserted at module level).
    o_ref[0, :, :] = conv3x3(a5_ref, w6_ref, b6_ref, M6).astype(o_ref.dtype)


# ---------------------------------------------------------------------------
# Host-side (jitted) preprocessing: layer-1 im2col + weight layout transforms
# ---------------------------------------------------------------------------
def _prep_input(image):
    """NCHW image -> full stride-4 im2col of the k=8 conv, parity-reordered.

    xp[b, ph, pw, hh*10+ww, (kh*8+kw)*2+ci] = x[b, ci, 4*(2hh+ph)+kh, 4*(2ww+pw)+kw]
    """
    x = jnp.reshape(image, (-1,) + IMAGE_SHAPE).astype(jnp.float32)   # (n, 2, 84, 84)
    n = x.shape[0]
    x = x.transpose(0, 2, 3, 1)                                       # NHWC
    # im2col of the dense 20x20 output grid, patch order (kh, kw, ci).
    cols = [x[:, kh:kh + 4 * H1:4, kw:kw + 4 * H1:4, :]               # (n, 20, 20, 2)
            for kh in range(8) for kw in range(8)]
    p = jnp.stack(cols, axis=3)                                       # (n, 20, 20, 64, 2)
    p = p.reshape(n, H1, H1, PATCH1)                                  # (n, 20, 20, 128)
    # reorder the 20x20 output grid into 2x2 parity blocks of 10x10 rows.
    p = p.reshape(n, PITCH, 2, PITCH, 2, PATCH1)                      # (n, hh, ph, ww, pw, 128)
    p = p.transpose(0, 2, 4, 1, 3, 5)                                 # (n, ph, pw, hh, ww, 128)
    return p.reshape(n, 2, 2, PAR_ROWS, PATCH1).astype(COMPUTE_DTYPE)


def _prep_weights(params):
    """(Cout, Cin, kh, kw) conv weights -> per-tap matmul weights + 2-D biases."""
    def flat_l1(w):          # layer 1: (32,2,8,8) -> (128,32), rows (kh,kw,ci)
        return w.transpose(2, 3, 1, 0).reshape(PATCH1, -1)

    def taps(w):             # layers 2-6: (co,ci,k,k) -> (k*k, ci, co)
        co, ci, kh, kw = w.shape
        return w.transpose(2, 3, 1, 0).reshape(kh * kw, ci, co)

    ws = [flat_l1(params[0][0])] + [taps(w) for (w, _) in params[1:]]
    ws = [w.astype(COMPUTE_DTYPE) for w in ws]
    bs = [b.reshape(1, -1).astype(jnp.float32) for (_, b) in params]
    return ws, bs


def equi_image_encoder_forward(image, params):
    """Pallas forward of EquiImageEncoder: returns (batch, 1, embed_size) f32."""
    batch_size = image.shape[0]
    xp = _prep_input(image)                      # (n, 2, 2, 100, 128) bf16
    n = xp.shape[0]
    ws, bs = _prep_weights(params)

    def const_spec(shape):                       # grid-invariant block (no re-DMA)
        return pl.BlockSpec(shape, lambda b: (0,) * len(shape))

    in_specs = [pl.BlockSpec((1, 2, 2, PAR_ROWS, PATCH1),
                             lambda b: (b, 0, 0, 0, 0))]
    args = [xp]
    for w, bias in zip(ws, bs):
        in_specs.append(const_spec(w.shape))
        in_specs.append(const_spec(bias.shape))
        args.append(w)
        args.append(bias)

    out = pl.pallas_call(
        _encoder_kernel,
        out_shape=jax.ShapeDtypeStruct((n, 1, C_OUT), jnp.float32),
        grid=(n,),
        in_specs=in_specs,
        out_specs=pl.BlockSpec((1, 1, C_OUT), lambda b: (b, 0, 0)),
        scratch_shapes=[
            pltpu.VMEM((2, 2, PAR_ROWS, C_H1), COMPUTE_DTYPE),  # layer-1 parity images
            pltpu.VMEM((M2, C_H2), COMPUTE_DTYPE),              # pitch-10 activations
            pltpu.VMEM((M3, C_H2), COMPUTE_DTYPE),
            pltpu.VMEM((M4, C_H2), COMPUTE_DTYPE),
            pltpu.VMEM((M5, C_H2), COMPUTE_DTYPE),
        ],
        compiler_params=pltpu.CompilerParams(
            dimension_semantics=("parallel",),  # v7x: one batch element per TensorCore
        ),
    )(*args)

    return jnp.reshape(out, (batch_size, -1, EMBED_SIZE))


# ---------------------------------------------------------------------------
# References (numerical checks) + synthetic parameters
# ---------------------------------------------------------------------------
def reference_forward(image, params):
    """True f32 module semantics (VALID conv + stride + ReLU + reshape)."""
    x = jnp.reshape(image, (-1,) + IMAGE_SHAPE)
    for (w, b), (_, _, _, stride) in zip(params, LAYER_CFG):
        x = jax.lax.conv_general_dilated(
            x, w, window_strides=(stride, stride), padding="VALID",
            dimension_numbers=("NCHW", "OIHW", "NCHW"),
            precision=jax.lax.Precision.HIGHEST)
        x = jnp.maximum(x + b[None, :, None, None], 0.0)
    return jnp.reshape(x, (image.shape[0], -1, EMBED_SIZE))


def matched_reference_forward(image, params):
    """Reference with the kernel's exact dtype policy (bf16 storage, f32 math)."""
    def q(v):  # storage quantization points used by the kernel
        return v.astype(COMPUTE_DTYPE).astype(jnp.float32)

    x = q(jnp.reshape(image, (-1,) + IMAGE_SHAPE))
    for i, ((w, b), (_, _, _, stride)) in enumerate(zip(params, LAYER_CFG)):
        x = jax.lax.conv_general_dilated(
            x, q(w), window_strides=(stride, stride), padding="VALID",
            dimension_numbers=("NCHW", "OIHW", "NCHW"),
            precision=jax.lax.Precision.HIGHEST)
        x = jnp.maximum(x + b[None, :, None, None], 0.0)
        if i < len(params) - 1:          # final layer is stored in f32 by the kernel
            x = q(x)
    return jnp.reshape(x, (image.shape[0], -1, EMBED_SIZE))


def init_params(key):
    """Deterministic synthetic weights with the R2Conv-expanded dense shapes."""
    params = []
    for (cin, cout, k, _stride) in LAYER_CFG:
        key, k_w, k_b = jax.random.split(key, 3)
        fan_in = cin * k * k
        w = jax.random.normal(k_w, (cout, cin, k, k), jnp.float32) / jnp.sqrt(
            jnp.float32(fan_in))
        b = 0.01 * jax.random.normal(k_b, (cout,), jnp.float32)
        params.append((w, b))
    return params


if __name__ == "__main__":
    key = jax.random.PRNGKey(0)
    key, k_img = jax.random.split(key)
    image = jax.random.normal(k_img, (BATCH,) + IMAGE_SHAPE, jnp.float32)
    params = init_params(key)

    fwd = jax.jit(equi_image_encoder_forward)
    embed = fwd(image, params)
    jax.block_until_ready(embed)

    assert embed.shape == (BATCH, 1, EMBED_SIZE), embed.shape
    assert embed.dtype == jnp.float32

    # (1) Strict check against a matched-numerics reference: same bf16 storage
    #     points, f32 accumulation -> only summation-order differences remain.
    ref_matched = matched_reference_forward(image, params)
    err_matched = float(jnp.linalg.norm(embed - ref_matched) /
                        (jnp.linalg.norm(ref_matched) + 1e-6))
    assert err_matched < 1e-3, f"layout/ordering mismatch: rel_err={err_matched}"

    # (2) Accuracy check against the true f32 module reference; tolerance is the
    #     bf16 storage budget (~6 layers x ~0.3% RMS rounding).
    ref = reference_forward(image, params)
    rel_err = float(jnp.linalg.norm(embed - ref) / (jnp.linalg.norm(ref) + 1e-6))
    assert rel_err < 2e-2, f"kernel/reference mismatch: rel_err={rel_err}"

    print("KERNEL_OK")
</pallas_src>

<mosaic_0001>
module attributes {stable_mosaic.version = 11 : i64} {
  func.func @_encoder_kernel(%arg0: i32, %arg1: memref<1x2x2x100x128xbf16, #tpu.memory_space<vmem>>, %arg2: memref<128x32xbf16, #tpu.memory_space<vmem>>, %arg3: memref<1x32xf32, #tpu.memory_space<vmem>>, %arg4: memref<16x32x64xbf16, #tpu.memory_space<vmem>>, %arg5: memref<1x64xf32, #tpu.memory_space<vmem>>, %arg6: memref<9x64x64xbf16, #tpu.memory_space<vmem>>, %arg7: memref<1x64xf32, #tpu.memory_space<vmem>>, %arg8: memref<9x64x64xbf16, #tpu.memory_space<vmem>>, %arg9: memref<1x64xf32, #tpu.memory_space<vmem>>, %arg10: memref<9x64x64xbf16, #tpu.memory_space<vmem>>, %arg11: memref<1x64xf32, #tpu.memory_space<vmem>>, %arg12: memref<9x64x128xbf16, #tpu.memory_space<vmem>>, %arg13: memref<1x128xf32, #tpu.memory_space<vmem>>, %arg14: memref<1x1x128xf32, #tpu.memory_space<vmem>>, %arg15: memref<2x2x100x32xbf16, #tpu.memory_space<vmem>>, %arg16: memref<89x64xbf16, #tpu.memory_space<vmem>>, %arg17: memref<67x64xbf16, #tpu.memory_space<vmem>>, %arg18: memref<45x64xbf16, #tpu.memory_space<vmem>>, %arg19: memref<23x64xbf16, #tpu.memory_space<vmem>>) attributes {dimension_semantics = [#tpu.dimension_semantics<parallel>], iteration_bounds = array<i64: 2>, scalar_prefetch = 0 : i64, scratch_operands = 5 : i64, tpu.core_type = #tpu.core_type<tc>, window_params = [{transform_indices = @transform_0, window_bounds = array<i64: 1, 2, 2, 100, 128>}, {pipeline_mode = #tpu.pipeline_mode<synchronous>, transform_indices = @transform_1, window_bounds = array<i64: 128, 32>}, {pipeline_mode = #tpu.pipeline_mode<synchronous>, transform_indices = @transform_2, window_bounds = array<i64: 1, 32>}, {pipeline_mode = #tpu.pipeline_mode<synchronous>, transform_indices = @transform_3, window_bounds = array<i64: 16, 32, 64>}, {pipeline_mode = #tpu.pipeline_mode<synchronous>, transform_indices = @transform_4, window_bounds = array<i64: 1, 64>}, {pipeline_mode = #tpu.pipeline_mode<synchronous>, transform_indices = @transform_5, window_bounds = array<i64: 9, 64, 64>}, {pipeline_mode = #tpu.pipeline_mode<synchronous>, transform_indices = @transform_6, window_bounds = array<i64: 1, 64>}, {pipeline_mode = #tpu.pipeline_mode<synchronous>, transform_indices = @transform_7, window_bounds = array<i64: 9, 64, 64>}, {pipeline_mode = #tpu.pipeline_mode<synchronous>, transform_indices = @transform_8, window_bounds = array<i64: 1, 64>}, {pipeline_mode = #tpu.pipeline_mode<synchronous>, transform_indices = @transform_9, window_bounds = array<i64: 9, 64, 64>}, {pipeline_mode = #tpu.pipeline_mode<synchronous>, transform_indices = @transform_10, window_bounds = array<i64: 1, 64>}, {pipeline_mode = #tpu.pipeline_mode<synchronous>, transform_indices = @transform_11, window_bounds = array<i64: 9, 64, 128>}, {pipeline_mode = #tpu.pipeline_mode<synchronous>, transform_indices = @transform_12, window_bounds = array<i64: 1, 128>}, {transform_indices = @transform_13, window_bounds = array<i64: 1, 1, 128>}]} {
    %c0 = arith.constant 0 : index
    %c0_0 = arith.constant 0 : index
    %0 = vector.load %arg2[%c0, %c0_0] : memref<128x32xbf16, #tpu.memory_space<vmem>>, vector<128x32xbf16>
    %c0_1 = arith.constant 0 : index
    %c0_2 = arith.constant 0 : index
    %1 = vector.load %arg3[%c0_1, %c0_2] : memref<1x32xf32, #tpu.memory_space<vmem>>, vector<1x32xf32>
    %c0_3 = arith.constant 0 : index
    %c0_4 = arith.constant 0 : index
    %c0_5 = arith.constant 0 : index
    %c0_6 = arith.constant 0 : index
    %c0_7 = arith.constant 0 : index
    %2 = vector.load %arg1[%c0_3, %c0_4, %c0_5, %c0_6, %c0_7] : memref<1x2x2x100x128xbf16, #tpu.memory_space<vmem>>, vector<1x1x1x100x128xbf16>
    %3 = vector.shape_cast %2 : vector<1x1x1x100x128xbf16> to vector<100x128xbf16>
    %cst = arith.constant dense<0.000000e+00> : vector<100x32xf32>
    %4 = tpu.matmul %3, %0, %cst {dimension_numbers = #tpu.dot_dimension_numbers<[1], [0], [0], [1], [0, 0, 1, 1], [], []>} : vector<100x128xbf16>, vector<128x32xbf16>, vector<100x32xf32> -> vector<100x32xf32>
    %5 = vector.broadcast %1 : vector<1x32xf32> to vector<100x32xf32>
    %6 = arith.addf %4, %5 : vector<100x32xf32>
    %cst_8 = arith.constant 0.000000e+00 : f32
    %7 = vector.broadcast %cst_8 : f32 to vector<100x32xf32>
    %8 = arith.maximumf %6, %7 : vector<100x32xf32>
    %9 = arith.truncf %8 : vector<100x32xf32> to vector<100x32xbf16>
    %c0_9 = arith.constant 0 : index
    %c0_10 = arith.constant 0 : index
    %c0_11 = arith.constant 0 : index
    %c0_12 = arith.constant 0 : index
    %10 = vector.load %arg15[%c0_9, %c0_10, %c0_11, %c0_12] : memref<2x2x100x32xbf16, #tpu.memory_space<vmem>>, vector<1x1x100x32xbf16>
    %11 = vector.shape_cast %10 : vector<1x1x100x32xbf16> to vector<100x32xbf16>
    %12 = vector.shape_cast %9 : vector<100x32xbf16> to vector<1x1x100x32xbf16>
    tpu.vector_store %arg15[%c0_9, %c0_10, %c0_11, %c0_12], %12 {strides = array<i32>} : memref<2x2x100x32xbf16, #tpu.memory_space<vmem>>, vector<1x1x100x32xbf16>,
    %c0_13 = arith.constant 0 : index
    %c0_14 = arith.constant 0 : index
    %c1 = arith.constant 1 : index
    %c0_15 = arith.constant 0 : index
    %c0_16 = arith.constant 0 : index
    %13 = vector.load %arg1[%c0_13, %c0_14, %c1, %c0_15, %c0_16] : memref<1x2x2x100x128xbf16, #tpu.memory_space<vmem>>, vector<1x1x1x100x128xbf16>
    %14 = vector.shape_cast %13 : vector<1x1x1x100x128xbf16> to vector<100x128xbf16>
    %cst_17 = arith.constant dense<0.000000e+00> : vector<100x32xf32>
    %15 = tpu.matmul %14, %0, %cst_17 {dimension_numbers = #tpu.dot_dimension_numbers<[1], [0], [0], [1], [0, 0, 1, 1], [], []>} : vector<100x128xbf16>, vector<128x32xbf16>, vector<100x32xf32> -> vector<100x32xf32>
    %16 = vector.broadcast %1 : vector<1x32xf32> to vector<100x32xf32>
    %17 = arith.addf %15, %16 : vector<100x32xf32>
    %cst_18 = arith.constant 0.000000e+00 : f32
    %18 = vector.broadcast %cst_18 : f32 to vector<100x32xf32>
    %19 = arith.maximumf %17, %18 : vector<100x32xf32>
    %20 = arith.truncf %19 : vector<100x32xf32> to vector<100x32xbf16>
    %c0_19 = arith.constant 0 : index
    %c1_20 = arith.constant 1 : index
    %c0_21 = arith.constant 0 : index
    %c0_22 = arith.constant 0 : index
    %21 = vector.load %arg15[%c0_19, %c1_20, %c0_21, %c0_22] : memref<2x2x100x32xbf16, #tpu.memory_space<vmem>>, vector<1x1x100x32xbf16>
    %22 = vector.shape_cast %21 : vector<1x1x100x32xbf16> to vector<100x32xbf16>
    %23 = vector.shape_cast %20 : vector<100x32xbf16> to vector<1x1x100x32xbf16>
    tpu.vector_store %arg15[%c0_19, %c1_20, %c0_21, %c0_22], %23 {strides = array<i32>} : memref<2x2x100x32xbf16, #tpu.memory_space<vmem>>, vector<1x1x100x32xbf16>,
    %c0_23 = arith.constant 0 : index
    %c1_24 = arith.constant 1 : index
    %c0_25 = arith.constant 0 : index
    %c0_26 = arith.constant 0 : index
    %c0_27 = arith.constant 0 : index
    %24 = vector.load %arg1[%c0_23, %c1_24, %c0_25, %c0_26, %c0_27] : memref<1x2x2x100x128xbf16, #tpu.memory_space<vmem>>, vector<1x1x1x100x128xbf16>
    %25 = vector.shape_cast %24 : vector<1x1x1x100x128xbf16> to vector<100x128xbf16>
    %cst_28 = arith.constant dense<0.000000e+00> : vector<100x32xf32>
    %26 = tpu.matmul %25, %0, %cst_28 {dimension_numbers = #tpu.dot_dimension_numbers<[1], [0], [0], [1], [0, 0, 1, 1], [], []>} : vector<100x128xbf16>, vector<128x32xbf16>, vector<100x32xf32> -> vector<100x32xf32>
    %27 = vector.broadcast %1 : vector<1x32xf32> to vector<100x32xf32>
    %28 = arith.addf %26, %27 : vector<100x32xf32>
    %cst_29 = arith.constant 0.000000e+00 : f32
    %29 = vector.broadcast %cst_29 : f32 to vector<100x32xf32>
    %30 = arith.maximumf %28, %29 : vector<100x32xf32>
    %31 = arith.truncf %30 : vector<100x32xf32> to vector<100x32xbf16>
    %c1_30 = arith.constant 1 : index
    %c0_31 = arith.constant 0 : index
    %c0_32 = arith.constant 0 : index
    %c0_33 = arith.constant 0 : index
    %32 = vector.load %arg15[%c1_30, %c0_31, %c0_32, %c0_33] : memref<2x2x100x32xbf16, #tpu.memory_space<vmem>>, vector<1x1x100x32xbf16>
    %33 = vector.shape_cast %32 : vector<1x1x100x32xbf16> to vector<100x32xbf16>
    %34 = vector.shape_cast %31 : vector<100x32xbf16> to vector<1x1x100x32xbf16>
    tpu.vector_store %arg15[%c1_30, %c0_31, %c0_32, %c0_33], %34 {strides = array<i32>} : memref<2x2x100x32xbf16, #tpu.memory_space<vmem>>, vector<1x1x100x32xbf16>,
    %c0_34 = arith.constant 0 : index
    %c1_35 = arith.constant 1 : index
    %c1_36 = arith.constant 1 : index
    %c0_37 = arith.constant 0 : index
    %c0_38 = arith.constant 0 : index
    %35 = vector.load %arg1[%c0_34, %c1_35, %c1_36, %c0_37, %c0_38] : memref<1x2x2x100x128xbf16, #tpu.memory_space<vmem>>, vector<1x1x1x100x128xbf16>
    %36 = vector.shape_cast %35 : vector<1x1x1x100x128xbf16> to vector<100x128xbf16>
    %cst_39 = arith.constant dense<0.000000e+00> : vector<100x32xf32>
    %37 = tpu.matmul %36, %0, %cst_39 {dimension_numbers = #tpu.dot_dimension_numbers<[1], [0], [0], [1], [0, 0, 1, 1], [], []>} : vector<100x128xbf16>, vector<128x32xbf16>, vector<100x32xf32> -> vector<100x32xf32>
    %38 = vector.broadcast %1 : vector<1x32xf32> to vector<100x32xf32>
    %39 = arith.addf %37, %38 : vector<100x32xf32>
    %cst_40 = arith.constant 0.000000e+00 : f32
    %40 = vector.broadcast %cst_40 : f32 to vector<100x32xf32>
    %41 = arith.maximumf %39, %40 : vector<100x32xf32>
    %42 = arith.truncf %41 : vector<100x32xf32> to vector<100x32xbf16>
    %c1_41 = arith.constant 1 : index
    %c1_42 = arith.constant 1 : index
    %c0_43 = arith.constant 0 : index
    %c0_44 = arith.constant 0 : index
    %43 = vector.load %arg15[%c1_41, %c1_42, %c0_43, %c0_44] : memref<2x2x100x32xbf16, #tpu.memory_space<vmem>>, vector<1x1x100x32xbf16>
    %44 = vector.shape_cast %43 : vector<1x1x100x32xbf16> to vector<100x32xbf16>
    %45 = vector.shape_cast %42 : vector<100x32xbf16> to vector<1x1x100x32xbf16>
    tpu.vector_store %arg15[%c1_41, %c1_42, %c0_43, %c0_44], %45 {strides = array<i32>} : memref<2x2x100x32xbf16, #tpu.memory_space<vmem>>, vector<1x1x100x32xbf16>,
    %c0_45 = arith.constant 0 : index
    %c0_46 = arith.constant 0 : index
    %c0_47 = arith.constant 0 : index
    %c0_48 = arith.constant 0 : index
    %46 = vector.load %arg15[%c0_45, %c0_46, %c0_47, %c0_48] : memref<2x2x100x32xbf16, #tpu.memory_space<vmem>>, vector<1x1x89x32xbf16>
    %47 = vector.shape_cast %46 : vector<1x1x89x32xbf16> to vector<89x32xbf16>
    %c0_49 = arith.constant 0 : index
    %c0_50 = arith.constant 0 : index
    %c0_51 = arith.constant 0 : index
    %48 = vector.load %arg4[%c0_49, %c0_50, %c0_51] : memref<16x32x64xbf16, #tpu.memory_space<vmem>>, vector<1x32x64xbf16>
    %49 = vector.shape_cast %48 : vector<1x32x64xbf16> to vector<32x64xbf16>
    %cst_52 = arith.constant dense<0.000000e+00> : vector<89x64xf32>
    %50 = tpu.matmul %47, %49, %cst_52 {dimension_numbers = #tpu.dot_dimension_numbers<[1], [0], [0], [1], [0, 0, 1, 1], [], []>} : vector<89x32xbf16>, vector<32x64xbf16>, vector<89x64xf32> -> vector<89x64xf32>
    %c0_53 = arith.constant 0 : index
    %c1_54 = arith.constant 1 : index
    %c0_55 = arith.constant 0 : index
    %c0_56 = arith.constant 0 : index
    %51 = vector.load %arg15[%c0_53, %c1_54, %c0_55, %c0_56] : memref<2x2x100x32xbf16, #tpu.memory_space<vmem>>, vector<1x1x89x32xbf16>
    %52 = vector.shape_cast %51 : vector<1x1x89x32xbf16> to vector<89x32xbf16>
    %c1_57 = arith.constant 1 : index
    %c0_58 = arith.constant 0 : index
    %c0_59 = arith.constant 0 : index
    %53 = vector.load %arg4[%c1_57, %c0_58, %c0_59] : memref<16x32x64xbf16, #tpu.memory_space<vmem>>, vector<1x32x64xbf16>
    %54 = vector.shape_cast %53 : vector<1x32x64xbf16> to vector<32x64xbf16>
    %cst_60 = arith.constant dense<0.000000e+00> : vector<89x64xf32>
    %55 = tpu.matmul %52, %54, %cst_60 {dimension_numbers = #tpu.dot_dimension_numbers<[1], [0], [0], [1], [0, 0, 1, 1], [], []>} : vector<89x32xbf16>, vector<32x64xbf16>, vector<89x64xf32> -> vector<89x64xf32>
    %56 = arith.addf %50, %55 : vector<89x64xf32>
    %c0_61 = arith.constant 0 : index
    %c0_62 = arith.constant 0 : index
    %c1_63 = arith.constant 1 : index
    %c0_64 = arith.constant 0 : index
    %57 = vector.load %arg15[%c0_61, %c0_62, %c1_63, %c0_64] : memref<2x2x100x32xbf16, #tpu.memory_space<vmem>>, vector<1x1x89x32xbf16>
    %58 = vector.shape_cast %57 : vector<1x1x89x32xbf16> to vector<89x32xbf16>
    %c2 = arith.constant 2 : index
    %c0_65 = arith.constant 0 : index
    %c0_66 = arith.constant 0 : index
    %59 = vector.load %arg4[%c2, %c0_65, %c0_66] : memref<16x32x64xbf16, #tpu.memory_space<vmem>>, vector<1x32x64xbf16>
    %60 = vector.shape_cast %59 : vector<1x32x64xbf16> to vector<32x64xbf16>
    %cst_67 = arith.constant dense<0.000000e+00> : vector<89x64xf32>
    %61 = tpu.matmul %58, %60, %cst_67 {dimension_numbers = #tpu.dot_dimension_numbers<[1], [0], [0], [1], [0, 0, 1, 1], [], []>} : vector<89x32xbf16>, vector<32x64xbf16>, vector<89x64xf32> -> vector<89x64xf32>
    %62 = arith.addf %56, %61 : vector<89x64xf32>
    %c0_68 = arith.constant 0 : index
    %c1_69 = arith.constant 1 : index
    %c1_70 = arith.constant 1 : index
    %c0_71 = arith.constant 0 : index
    %63 = vector.load %arg15[%c0_68, %c1_69, %c1_70, %c0_71] : memref<2x2x100x32xbf16, #tpu.memory_space<vmem>>, vector<1x1x89x32xbf16>
    %64 = vector.shape_cast %63 : vector<1x1x89x32xbf16> to vector<89x32xbf16>
    %c3 = arith.constant 3 : index
    %c0_72 = arith.constant 0 : index
    %c0_73 = arith.constant 0 : index
    %65 = vector.load %arg4[%c3, %c0_72, %c0_73] : memref<16x32x64xbf16, #tpu.memory_space<vmem>>, vector<1x32x64xbf16>
    %66 = vector.shape_cast %65 : vector<1x32x64xbf16> to vector<32x64xbf16>
    %cst_74 = arith.constant dense<0.000000e+00> : vector<89x64xf32>
    %67 = tpu.matmul %64, %66, %cst_74 {dimension_numbers = #tpu.dot_dimension_numbers<[1], [0], [0], [1], [0, 0, 1, 1], [], []>} : vector<89x32xbf16>, vector<32x64xbf16>, vector<89x64xf32> -> vector<89x64xf32>
    %68 = arith.addf %62, %67 : vector<89x64xf32>
    %c1_75 = arith.constant 1 : index
    %c0_76 = arith.constant 0 : index
    %c0_77 = arith.constant 0 : index
    %c0_78 = arith.constant 0 : index
    %69 = vector.load %arg15[%c1_75, %c0_76, %c0_77, %c0_78] : memref<2x2x100x32xbf16, #tpu.memory_space<vmem>>, vector<1x1x89x32xbf16>
    %70 = vector.shape_cast %69 : vector<1x1x89x32xbf16> to vector<89x32xbf16>
    %c4 = arith.constant 4 : index
    %c0_79 = arith.constant 0 : index
    %c0_80 = arith.constant 0 : index
    %71 = vector.load %arg4[%c4, %c0_79, %c0_80] : memref<16x32x64xbf16, #tpu.memory_space<vmem>>, vector<1x32x64xbf16>
    %72 = vector.shape_cast %71 : vector<1x32x64xbf16> to vector<32x64xbf16>
    %cst_81 = arith.constant dense<0.000000e+00> : vector<89x64xf32>
    %73 = tpu.matmul %70, %72, %cst_81 {dimension_numbers = #tpu.dot_dimension_numbers<[1], [0], [0], [1], [0, 0, 1, 1], [], []>} : vector<89x32xbf16>, vector<32x64xbf16>, vector<89x64xf32> -> vector<89x64xf32>
    %74 = arith.addf %68, %73 : vector<89x64xf32>
    %c1_82 = arith.constant 1 : index
    %c1_83 = arith.constant 1 : index
    %c0_84 = arith.constant 0 : index
    %c0_85 = arith.constant 0 : index
    %75 = vector.load %arg15[%c1_82, %c1_83, %c0_84, %c0_85] : memref<2x2x100x32xbf16, #tpu.memory_space<vmem>>, vector<1x1x89x32xbf16>
    %76 = vector.shape_cast %75 : vector<1x1x89x32xbf16> to vector<89x32xbf16>
    %c5 = arith.constant 5 : index
    %c0_86 = arith.constant 0 : index
    %c0_87 = arith.constant 0 : index
    %77 = vector.load %arg4[%c5, %c0_86, %c0_87] : memref<16x32x64xbf16, #tpu.memory_space<vmem>>, vector<1x32x64xbf16>
    %78 = vector.shape_cast %77 : vector<1x32x64xbf16> to vector<32x64xbf16>
    %cst_88 = arith.constant dense<0.000000e+00> : vector<89x64xf32>
    %79 = tpu.matmul %76, %78, %cst_88 {dimension_numbers = #tpu.dot_dimension_numbers<[1], [0], [0], [1], [0, 0, 1, 1], [], []>} : vector<89x32xbf16>, vector<32x64xbf16>, vector<89x64xf32> -> vector<89x64xf32>
    %80 = arith.addf %74, %79 : vector<89x64xf32>
    %c1_89 = arith.constant 1 : index
    %c0_90 = arith.constant 0 : index
    %c1_91 = arith.constant 1 : index
    %c0_92 = arith.constant 0 : index
    %81 = vector.load %arg15[%c1_89, %c0_90, %c1_91, %c0_92] : memref<2x2x100x32xbf16, #tpu.memory_space<vmem>>, vector<1x1x89x32xbf16>
    %82 = vector.shape_cast %81 : vector<1x1x89x32xbf16> to vector<89x32xbf16>
    %c6 = arith.constant 6 : index
    %c0_93 = arith.constant 0 : index
    %c0_94 = arith.constant 0 : index
    %83 = vector.load %arg4[%c6, %c0_93, %c0_94] : memref<16x32x64xbf16, #tpu.memory_space<vmem>>, vector<1x32x64xbf16>
    %84 = vector.shape_cast %83 : vector<1x32x64xbf16> to vector<32x64xbf16>
    %cst_95 = arith.constant dense<0.000000e+00> : vector<89x64xf32>
    %85 = tpu.matmul %82, %84, %cst_95 {dimension_numbers = #tpu.dot_dimension_numbers<[1], [0], [0], [1], [0, 0, 1, 1], [], []>} : vector<89x32xbf16>, vector<32x64xbf16>, vector<89x64xf32> -> vector<89x64xf32>
    %86 = arith.addf %80, %85 : vector<89x64xf32>
    %c1_96 = arith.constant 1 : index
    %c1_97 = arith.constant 1 : index
    %c1_98 = arith.constant 1 : index
    %c0_99 = arith.constant 0 : index
    %87 = vector.load %arg15[%c1_96, %c1_97, %c1_98, %c0_99] : memref<2x2x100x32xbf16, #tpu.memory_space<vmem>>, vector<1x1x89x32xbf16>
    %88 = vector.shape_cast %87 : vector<1x1x89x32xbf16> to vector<89x32xbf16>
    %c7 = arith.constant 7 : index
    %c0_100 = arith.constant 0 : index
    %c0_101 = arith.constant 0 : index
    %89 = vector.load %arg4[%c7, %c0_100, %c0_101] : memref<16x32x64xbf16, #tpu.memory_space<vmem>>, vector<1x32x64xbf16>
    %90 = vector.shape_cast %89 : vector<1x32x64xbf16> to vector<32x64xbf16>
    %cst_102 = arith.constant dense<0.000000e+00> : vector<89x64xf32>
    %91 = tpu.matmul %88, %90, %cst_102 {dimension_numbers = #tpu.dot_dimension_numbers<[1], [0], [0], [1], [0, 0, 1, 1], [], []>} : vector<89x32xbf16>, vector<32x64xbf16>, vector<89x64xf32> -> vector<89x64xf32>
    %92 = arith.addf %86, %91 : vector<89x64xf32>
    %c0_103 = arith.constant 0 : index
    %c0_104 = arith.constant 0 : index
    %c10 = arith.constant 10 : index
    %c0_105 = arith.constant 0 : index
    %93 = vector.load %arg15[%c0_103, %c0_104, %c10, %c0_105] : memref<2x2x100x32xbf16, #tpu.memory_space<vmem>>, vector<1x1x89x32xbf16>
    %94 = vector.shape_cast %93 : vector<1x1x89x32xbf16> to vector<89x32xbf16>
    %c8 = arith.constant 8 : index
    %c0_106 = arith.constant 0 : index
    %c0_107 = arith.constant 0 : index
    %95 = vector.load %arg4[%c8, %c0_106, %c0_107] : memref<16x32x64xbf16, #tpu.memory_space<vmem>>, vector<1x32x64xbf16>
    %96 = vector.shape_cast %95 : vector<1x32x64xbf16> to vector<32x64xbf16>
    %cst_108 = arith.constant dense<0.000000e+00> : vector<89x64xf32>
    %97 = tpu.matmul %94, %96, %cst_108 {dimension_numbers = #tpu.dot_dimension_numbers<[1], [0], [0], [1], [0, 0, 1, 1], [], []>} : vector<89x32xbf16>, vector<32x64xbf16>, vector<89x64xf32> -> vector<89x64xf32>
    %98 = arith.addf %92, %97 : vector<89x64xf32>
    %c0_109 = arith.constant 0 : index
    %c1_110 = arith.constant 1 : index
    %c10_111 = arith.constant 10 : index
    %c0_112 = arith.constant 0 : index
    %99 = vector.load %arg15[%c0_109, %c1_110, %c10_111, %c0_112] : memref<2x2x100x32xbf16, #tpu.memory_space<vmem>>, vector<1x1x89x32xbf16>
    %100 = vector.shape_cast %99 : vector<1x1x89x32xbf16> to vector<89x32xbf16>
    %c9 = arith.constant 9 : index
    %c0_113 = arith.constant 0 : index
    %c0_114 = arith.constant 0 : index
    %101 = vector.load %arg4[%c9, %c0_113, %c0_114] : memref<16x32x64xbf16, #tpu.memory_space<vmem>>, vector<1x32x64xbf16>
    %102 = vector.shape_cast %101 : vector<1x32x64xbf16> to vector<32x64xbf16>
    %cst_115 = arith.constant dense<0.000000e+00> : vector<89x64xf32>
    %103 = tpu.matmul %100, %102, %cst_115 {dimension_numbers = #tpu.dot_dimension_numbers<[1], [0], [0], [1], [0, 0, 1, 1], [], []>} : vector<89x32xbf16>, vector<32x64xbf16>, vector<89x64xf32> -> vector<89x64xf32>
    %104 = arith.addf %98, %103 : vector<89x64xf32>
    %c0_116 = arith.constant 0 : index
    %c0_117 = arith.constant 0 : index
    %c11 = arith.constant 11 : index
    %c0_118 = arith.constant 0 : index
    %105 = vector.load %arg15[%c0_116, %c0_117, %c11, %c0_118] : memref<2x2x100x32xbf16, #tpu.memory_space<vmem>>, vector<1x1x89x32xbf16>
    %106 = vector.shape_cast %105 : vector<1x1x89x32xbf16> to vector<89x32xbf16>
    %c10_119 = arith.constant 10 : index
    %c0_120 = arith.constant 0 : index
    %c0_121 = arith.constant 0 : index
    %107 = vector.load %arg4[%c10_119, %c0_120, %c0_121] : memref<16x32x64xbf16, #tpu.memory_space<vmem>>, vector<1x32x64xbf16>
    %108 = vector.shape_cast %107 : vector<1x32x64xbf16> to vector<32x64xbf16>
    %cst_122 = arith.constant dense<0.000000e+00> : vector<89x64xf32>
    %109 = tpu.matmul %106, %108, %cst_122 {dimension_numbers = #tpu.dot_dimension_numbers<[1], [0], [0], [1], [0, 0, 1, 1], [], []>} : vector<89x32xbf16>, vector<32x64xbf16>, vector<89x64xf32> -> vector<89x64xf32>
    %110 = arith.addf %104, %109 : vector<89x64xf32>
    %c0_123 = arith.constant 0 : index
    %c1_124 = arith.constant 1 : index
    %c11_125 = arith.constant 11 : index
    %c0_126 = arith.constant 0 : index
    %111 = vector.load %arg15[%c0_123, %c1_124, %c11_125, %c0_126] : memref<2x2x100x32xbf16, #tpu.memory_space<vmem>>, vector<1x1x89x32xbf16>
    %112 = vector.shape_cast %111 : vector<1x1x89x32xbf16> to vector<89x32xbf16>
    %c11_127 = arith.constant 11 : index
    %c0_128 = arith.constant 0 : index
    %c0_129 = arith.constant 0 : index
    %113 = vector.load %arg4[%c11_127, %c0_128, %c0_129] : memref<16x32x64xbf16, #tpu.memory_space<vmem>>, vector<1x32x64xbf16>
    %114 = vector.shape_cast %113 : vector<1x32x64xbf16> to vector<32x64xbf16>
    %cst_130 = arith.constant dense<0.000000e+00> : vector<89x64xf32>
    %115 = tpu.matmul %112, %114, %cst_130 {dimension_numbers = #tpu.dot_dimension_numbers<[1], [0], [0], [1], [0, 0, 1, 1], [], []>} : vector<89x32xbf16>, vector<32x64xbf16>, vector<89x64xf32> -> vector<89x64xf32>
    %116 = arith.addf %110, %115 : vector<89x64xf32>
    %c1_131 = arith.constant 1 : index
    %c0_132 = arith.constant 0 : index
    %c10_133 = arith.constant 10 : index
    %c0_134 = arith.constant 0 : index
    %117 = vector.load %arg15[%c1_131, %c0_132, %c10_133, %c0_134] : memref<2x2x100x32xbf16, #tpu.memory_space<vmem>>, vector<1x1x89x32xbf16>
    %118 = vector.shape_cast %117 : vector<1x1x89x32xbf16> to vector<89x32xbf16>
    %c12 = arith.constant 12 : index
    %c0_135 = arith.constant 0 : index
    %c0_136 = arith.constant 0 : index
    %119 = vector.load %arg4[%c12, %c0_135, %c0_136] : memref<16x32x64xbf16, #tpu.memory_space<vmem>>, vector<1x32x64xbf16>
    %120 = vector.shape_cast %119 : vector<1x32x64xbf16> to vector<32x64xbf16>
    %cst_137 = arith.constant dense<0.000000e+00> : vector<89x64xf32>
    %121 = tpu.matmul %118, %120, %cst_137 {dimension_numbers = #tpu.dot_dimension_numbers<[1], [0], [0], [1], [0, 0, 1, 1], [], []>} : vector<89x32xbf16>, vector<32x64xbf16>, vector<89x64xf32> -> vector<89x64xf32>
    %122 = arith.addf %116, %121 : vector<89x64xf32>
    %c1_138 = arith.constant 1 : index
    %c1_139 = arith.constant 1 : index
    %c10_140 = arith.constant 10 : index
    %c0_141 = arith.constant 0 : index
    %123 = vector.load %arg15[%c1_138, %c1_139, %c10_140, %c0_141] : memref<2x2x100x32xbf16, #tpu.memory_space<vmem>>, vector<1x1x89x32xbf16>
    %124 = vector.shape_cast %123 : vector<1x1x89x32xbf16> to vector<89x32xbf16>
    %c13 = arith.constant 13 : index
    %c0_142 = arith.constant 0 : index
    %c0_143 = arith.constant 0 : index
    %125 = vector.load %arg4[%c13, %c0_142, %c0_143] : memref<16x32x64xbf16, #tpu.memory_space<vmem>>, vector<1x32x64xbf16>
    %126 = vector.shape_cast %125 : vector<1x32x64xbf16> to vector<32x64xbf16>
    %cst_144 = arith.constant dense<0.000000e+00> : vector<89x64xf32>
    %127 = tpu.matmul %124, %126, %cst_144 {dimension_numbers = #tpu.dot_dimension_numbers<[1], [0], [0], [1], [0, 0, 1, 1], [], []>} : vector<89x32xbf16>, vector<32x64xbf16>, vector<89x64xf32> -> vector<89x64xf32>
    %128 = arith.addf %122, %127 : vector<89x64xf32>
    %c1_145 = arith.constant 1 : index
    %c0_146 = arith.constant 0 : index
    %c11_147 = arith.constant 11 : index
    %c0_148 = arith.constant 0 : index
    %129 = vector.load %arg15[%c1_145, %c0_146, %c11_147, %c0_148] : memref<2x2x100x32xbf16, #tpu.memory_space<vmem>>, vector<1x1x89x32xbf16>
    %130 = vector.shape_cast %129 : vector<1x1x89x32xbf16> to vector<89x32xbf16>
    %c14 = arith.constant 14 : index
    %c0_149 = arith.constant 0 : index
    %c0_150 = arith.constant 0 : index
    %131 = vector.load %arg4[%c14, %c0_149, %c0_150] : memref<16x32x64xbf16, #tpu.memory_space<vmem>>, vector<1x32x64xbf16>
    %132 = vector.shape_cast %131 : vector<1x32x64xbf16> to vector<32x64xbf16>
    %cst_151 = arith.constant dense<0.000000e+00> : vector<89x64xf32>
    %133 = tpu.matmul %130, %132, %cst_151 {dimension_numbers = #tpu.dot_dimension_numbers<[1], [0], [0], [1], [0, 0, 1, 1], [], []>} : vector<89x32xbf16>, vector<32x64xbf16>, vector<89x64xf32> -> vector<89x64xf32>
    %134 = arith.addf %128, %133 : vector<89x64xf32>
    %c1_152 = arith.constant 1 : index
    %c1_153 = arith.constant 1 : index
    %c11_154 = arith.constant 11 : index
    %c0_155 = arith.constant 0 : index
    %135 = vector.load %arg15[%c1_152, %c1_153, %c11_154, %c0_155] : memref<2x2x100x32xbf16, #tpu.memory_space<vmem>>, vector<1x1x89x32xbf16>
    %136 = vector.shape_cast %135 : vector<1x1x89x32xbf16> to vector<89x32xbf16>
    %c15 = arith.constant 15 : index
    %c0_156 = arith.constant 0 : index
    %c0_157 = arith.constant 0 : index
    %137 = vector.load %arg4[%c15, %c0_156, %c0_157] : memref<16x32x64xbf16, #tpu.memory_space<vmem>>, vector<1x32x64xbf16>
    %138 = vector.shape_cast %137 : vector<1x32x64xbf16> to vector<32x64xbf16>
    %cst_158 = arith.constant dense<0.000000e+00> : vector<89x64xf32>
    %139 = tpu.matmul %136, %138, %cst_158 {dimension_numbers = #tpu.dot_dimension_numbers<[1], [0], [0], [1], [0, 0, 1, 1], [], []>} : vector<89x32xbf16>, vector<32x64xbf16>, vector<89x64xf32> -> vector<89x64xf32>
    %140 = arith.addf %134, %139 : vector<89x64xf32>
    %c0_159 = arith.constant 0 : index
    %c0_160 = arith.constant 0 : index
    %141 = vector.load %arg5[%c0_159, %c0_160] : memref<1x64xf32, #tpu.memory_space<vmem>>, vector<1x64xf32>
    %142 = vector.broadcast %141 : vector<1x64xf32> to vector<89x64xf32>
    %143 = arith.addf %140, %142 : vector<89x64xf32>
    %cst_161 = arith.constant 0.000000e+00 : f32
    %144 = vector.broadcast %cst_161 : f32 to vector<89x64xf32>
    %145 = arith.maximumf %143, %144 : vector<89x64xf32>
    %146 = arith.truncf %145 : vector<89x64xf32> to vector<89x64xbf16>
    %c0_162 = arith.constant 0 : index
    %c0_163 = arith.constant 0 : index
    %147 = vector.load %arg16[%c0_162, %c0_163] : memref<89x64xbf16, #tpu.memory_space<vmem>>, vector<89x64xbf16>
    tpu.vector_store %arg16[%c0_162, %c0_163], %146 {strides = array<i32>} : memref<89x64xbf16, #tpu.memory_space<vmem>>, vector<89x64xbf16>,
    %c0_164 = arith.constant 0 : index
    %c0_165 = arith.constant 0 : index
    %148 = vector.load %arg16[%c0_164, %c0_165] : memref<89x64xbf16, #tpu.memory_space<vmem>>, vector<67x64xbf16>
    %c0_166 = arith.constant 0 : index
    %c0_167 = arith.constant 0 : index
    %c0_168 = arith.constant 0 : index
    %149 = vector.load %arg6[%c0_166, %c0_167, %c0_168] : memref<9x64x64xbf16, #tpu.memory_space<vmem>>, vector<1x64x64xbf16>
    %150 = vector.shape_cast %149 : vector<1x64x64xbf16> to vector<64x64xbf16>
    %cst_169 = arith.constant dense<0.000000e+00> : vector<67x64xf32>
    %151 = tpu.matmul %148, %150, %cst_169 {dimension_numbers = #tpu.dot_dimension_numbers<[1], [0], [0], [1], [0, 0, 1, 1], [], []>} : vector<67x64xbf16>, vector<64x64xbf16>, vector<67x64xf32> -> vector<67x64xf32>
    %c1_170 = arith.constant 1 : index
    %c0_171 = arith.constant 0 : index
    %152 = vector.load %arg16[%c1_170, %c0_171] : memref<89x64xbf16, #tpu.memory_space<vmem>>, vector<67x64xbf16>
    %c1_172 = arith.constant 1 : index
    %c0_173 = arith.constant 0 : index
    %c0_174 = arith.constant 0 : index
    %153 = vector.load %arg6[%c1_172, %c0_173, %c0_174] : memref<9x64x64xbf16, #tpu.memory_space<vmem>>, vector<1x64x64xbf16>
    %154 = vector.shape_cast %153 : vector<1x64x64xbf16> to vector<64x64xbf16>
    %cst_175 = arith.constant dense<0.000000e+00> : vector<67x64xf32>
    %155 = tpu.matmul %152, %154, %cst_175 {dimension_numbers = #tpu.dot_dimension_numbers<[1], [0], [0], [1], [0, 0, 1, 1], [], []>} : vector<67x64xbf16>, vector<64x64xbf16>, vector<67x64xf32> -> vector<67x64xf32>
    %156 = arith.addf %151, %155 : vector<67x64xf32>
    %c2_176 = arith.constant 2 : index
    %c0_177 = arith.constant 0 : index
    %157 = vector.load %arg16[%c2_176, %c0_177] : memref<89x64xbf16, #tpu.memory_space<vmem>>, vector<67x64xbf16>
    %c2_178 = arith.constant 2 : index
    %c0_179 = arith.constant 0 : index
    %c0_180 = arith.constant 0 : index
    %158 = vector.load %arg6[%c2_178, %c0_179, %c0_180] : memref<9x64x64xbf16, #tpu.memory_space<vmem>>, vector<1x64x64xbf16>
    %159 = vector.shape_cast %158 : vector<1x64x64xbf16> to vector<64x64xbf16>
    %cst_181 = arith.constant dense<0.000000e+00> : vector<67x64xf32>
    %160 = tpu.matmul %157, %159, %cst_181 {dimension_numbers = #tpu.dot_dimension_numbers<[1], [0], [0], [1], [0, 0, 1, 1], [], []>} : vector<67x64xbf16>, vector<64x64xbf16>, vector<67x64xf32> -> vector<67x64xf32>
    %161 = arith.addf %156, %160 : vector<67x64xf32>
    %c10_182 = arith.constant 10 : index
    %c0_183 = arith.constant 0 : index
    %162 = vector.load %arg16[%c10_182, %c0_183] : memref<89x64xbf16, #tpu.memory_space<vmem>>, vector<67x64xbf16>
    %c3_184 = arith.constant 3 : index
    %c0_185 = arith.constant 0 : index
    %c0_186 = arith.constant 0 : index
    %163 = vector.load %arg6[%c3_184, %c0_185, %c0_186] : memref<9x64x64xbf16, #tpu.memory_space<vmem>>, vector<1x64x64xbf16>
    %164 = vector.shape_cast %163 : vector<1x64x64xbf16> to vector<64x64xbf16>
    %cst_187 = arith.constant dense<0.000000e+00> : vector<67x64xf32>
    %165 = tpu.matmul %162, %164, %cst_187 {dimension_numbers = #tpu.dot_dimension_numbers<[1], [0], [0], [1], [0, 0, 1, 1], [], []>} : vector<67x64xbf16>, vector<64x64xbf16>, vector<67x64xf32> -> vector<67x64xf32>
    %166 = arith.addf %161, %165 : vector<67x64xf32>
    %c11_188 = arith.constant 11 : index
    %c0_189 = arith.constant 0 : index
    %167 = vector.load %arg16[%c11_188, %c0_189] : memref<89x64xbf16, #tpu.memory_space<vmem>>, vector<67x64xbf16>
    %c4_190 = arith.constant 4 : index
    %c0_191 = arith.constant 0 : index
    %c0_192 = arith.constant 0 : index
    %168 = vector.load %arg6[%c4_190, %c0_191, %c0_192] : memref<9x64x64xbf16, #tpu.memory_space<vmem>>, vector<1x64x64xbf16>
    %169 = vector.shape_cast %168 : vector<1x64x64xbf16> to vector<64x64xbf16>
    %cst_193 = arith.constant dense<0.000000e+00> : vector<67x64xf32>
    %170 = tpu.matmul %167, %169, %cst_193 {dimension_numbers = #tpu.dot_dimension_numbers<[1], [0], [0], [1], [0, 0, 1, 1], [], []>} : vector<67x64xbf16>, vector<64x64xbf16>, vector<67x64xf32> -> vector<67x64xf32>
    %171 = arith.addf %166, %170 : vector<67x64xf32>
    %c12_194 = arith.constant 12 : index
    %c0_195 = arith.constant 0 : index
    %172 = vector.load %arg16[%c12_194, %c0_195] : memref<89x64xbf16, #tpu.memory_space<vmem>>, vector<67x64xbf16>
    %c5_196 = arith.constant 5 : index
    %c0_197 = arith.constant 0 : index
    %c0_198 = arith.constant 0 : index
    %173 = vector.load %arg6[%c5_196, %c0_197, %c0_198] : memref<9x64x64xbf16, #tpu.memory_space<vmem>>, vector<1x64x64xbf16>
    %174 = vector.shape_cast %173 : vector<1x64x64xbf16> to vector<64x64xbf16>
    %cst_199 = arith.constant dense<0.000000e+00> : vector<67x64xf32>
    %175 = tpu.matmul %172, %174, %cst_199 {dimension_numbers = #tpu.dot_dimension_numbers<[1], [0], [0], [1], [0, 0, 1, 1], [], []>} : vector<67x64xbf16>, vector<64x64xbf16>, vector<67x64xf32> -> vector<67x64xf32>
    %176 = arith.addf %171, %175 : vector<67x64xf32>
    %c20 = arith.constant 20 : index
    %c0_200 = arith.constant 0 : index
    %177 = vector.load %arg16[%c20, %c0_200] : memref<89x64xbf16, #tpu.memory_space<vmem>>, vector<67x64xbf16>
    %c6_201 = arith.constant 6 : index
    %c0_202 = arith.constant 0 : index
    %c0_203 = arith.constant 0 : index
    %178 = vector.load %arg6[%c6_201, %c0_202, %c0_203] : memref<9x64x64xbf16, #tpu.memory_space<vmem>>, vector<1x64x64xbf16>
    %179 = vector.shape_cast %178 : vector<1x64x64xbf16> to vector<64x64xbf16>
    %cst_204 = arith.constant dense<0.000000e+00> : vector<67x64xf32>
    %180 = tpu.matmul %177, %179, %cst_204 {dimension_numbers = #tpu.dot_dimension_numbers<[1], [0], [0], [1], [0, 0, 1, 1], [], []>} : vector<67x64xbf16>, vector<64x64xbf16>, vector<67x64xf32> -> vector<67x64xf32>
    %181 = arith.addf %176, %180 : vector<67x64xf32>
    %c21 = arith.constant 21 : index
    %c0_205 = arith.constant 0 : index
    %182 = vector.load %arg16[%c21, %c0_205] : memref<89x64xbf16, #tpu.memory_space<vmem>>, vector<67x64xbf16>
    %c7_206 = arith.constant 7 : index
    %c0_207 = arith.constant 0 : index
    %c0_208 = arith.constant 0 : index
    %183 = vector.load %arg6[%c7_206, %c0_207, %c0_208] : memref<9x64x64xbf16, #tpu.memory_space<vmem>>, vector<1x64x64xbf16>
    %184 = vector.shape_cast %183 : vector<1x64x64xbf16> to vector<64x64xbf16>
    %cst_209 = arith.constant dense<0.000000e+00> : vector<67x64xf32>
    %185 = tpu.matmul %182, %184, %cst_209 {dimension_numbers = #tpu.dot_dimension_numbers<[1], [0], [0], [1], [0, 0, 1, 1], [], []>} : vector<67x64xbf16>, vector<64x64xbf16>, vector<67x64xf32> -> vector<67x64xf32>
    %186 = arith.addf %181, %185 : vector<67x64xf32>
    %c22 = arith.constant 22 : index
    %c0_210 = arith.constant 0 : index
    %187 = vector.load %arg16[%c22, %c0_210] : memref<89x64xbf16, #tpu.memory_space<vmem>>, vector<67x64xbf16>
    %c8_211 = arith.constant 8 : index
    %c0_212 = arith.constant 0 : index
    %c0_213 = arith.constant 0 : index
    %188 = vector.load %arg6[%c8_211, %c0_212, %c0_213] : memref<9x64x64xbf16, #tpu.memory_space<vmem>>, vector<1x64x64xbf16>
    %189 = vector.shape_cast %188 : vector<1x64x64xbf16> to vector<64x64xbf16>
    %cst_214 = arith.constant dense<0.000000e+00> : vector<67x64xf32>
    %190 = tpu.matmul %187, %189, %cst_214 {dimension_numbers = #tpu.dot_dimension_numbers<[1], [0], [0], [1], [0, 0, 1, 1], [], []>} : vector<67x64xbf16>, vector<64x64xbf16>, vector<67x64xf32> -> vector<67x64xf32>
    %191 = arith.addf %186, %190 : vector<67x64xf32>
    %c0_215 = arith.constant 0 : index
    %c0_216 = arith.constant 0 : index
    %192 = vector.load %arg7[%c0_215, %c0_216] : memref<1x64xf32, #tpu.memory_space<vmem>>, vector<1x64xf32>
    %193 = vector.broadcast %192 : vector<1x64xf32> to vector<67x64xf32>
    %194 = arith.addf %191, %193 : vector<67x64xf32>
    %cst_217 = arith.constant 0.000000e+00 : f32
    %195 = vector.broadcast %cst_217 : f32 to vector<67x64xf32>
    %196 = arith.maximumf %194, %195 : vector<67x64xf32>
    %197 = arith.truncf %196 : vector<67x64xf32> to vector<67x64xbf16>
    %c0_218 = arith.constant 0 : index
    %c0_219 = arith.constant 0 : index
    %198 = vector.load %arg17[%c0_218, %c0_219] : memref<67x64xbf16, #tpu.memory_space<vmem>>, vector<67x64xbf16>
    tpu.vector_store %arg17[%c0_218, %c0_219], %197 {strides = array<i32>} : memref<67x64xbf16, #tpu.memory_space<vmem>>, vector<67x64xbf16>,
    %c0_220 = arith.constant 0 : index
    %c0_221 = arith.constant 0 : index
    %199 = vector.load %arg17[%c0_220, %c0_221] : memref<67x64xbf16, #tpu.memory_space<vmem>>, vector<45x64xbf16>
    %c0_222 = arith.constant 0 : index
    %c0_223 = arith.constant 0 : index
    %c0_224 = arith.constant 0 : index
    %200 = vector.load %arg8[%c0_222, %c0_223, %c0_224] : memref<9x64x64xbf16, #tpu.memory_space<vmem>>, vector<1x64x64xbf16>
    %201 = vector.shape_cast %200 : vector<1x64x64xbf16> to vector<64x64xbf16>
    %cst_225 = arith.constant dense<0.000000e+00> : vector<45x64xf32>
    %202 = tpu.matmul %199, %201, %cst_225 {dimension_numbers = #tpu.dot_dimension_numbers<[1], [0], [0], [1], [0, 0, 1, 1], [], []>} : vector<45x64xbf16>, vector<64x64xbf16>, vector<45x64xf32> -> vector<45x64xf32>
    %c1_226 = arith.constant 1 : index
    %c0_227 = arith.constant 0 : index
    %203 = vector.load %arg17[%c1_226, %c0_227] : memref<67x64xbf16, #tpu.memory_space<vmem>>, vector<45x64xbf16>
    %c1_228 = arith.constant 1 : index
    %c0_229 = arith.constant 0 : index
    %c0_230 = arith.constant 0 : index
    %204 = vector.load %arg8[%c1_228, %c0_229, %c0_230] : memref<9x64x64xbf16, #tpu.memory_space<vmem>>, vector<1x64x64xbf16>
    %205 = vector.shape_cast %204 : vector<1x64x64xbf16> to vector<64x64xbf16>
    %cst_231 = arith.constant dense<0.000000e+00> : vector<45x64xf32>
    %206 = tpu.matmul %203, %205, %cst_231 {dimension_numbers = #tpu.dot_dimension_numbers<[1], [0], [0], [1], [0, 0, 1, 1], [], []>} : vector<45x64xbf16>, vector<64x64xbf16>, vector<45x64xf32> -> vector<45x64xf32>
    %207 = arith.addf %202, %206 : vector<45x64xf32>
    %c2_232 = arith.constant 2 : index
    %c0_233 = arith.constant 0 : index
    %208 = vector.load %arg17[%c2_232, %c0_233] : memref<67x64xbf16, #tpu.memory_space<vmem>>, vector<45x64xbf16>
    %c2_234 = arith.constant 2 : index
    %c0_235 = arith.constant 0 : index
    %c0_236 = arith.constant 0 : index
    %209 = vector.load %arg8[%c2_234, %c0_235, %c0_236] : memref<9x64x64xbf16, #tpu.memory_space<vmem>>, vector<1x64x64xbf16>
    %210 = vector.shape_cast %209 : vector<1x64x64xbf16> to vector<64x64xbf16>
    %cst_237 = arith.constant dense<0.000000e+00> : vector<45x64xf32>
    %211 = tpu.matmul %208, %210, %cst_237 {dimension_numbers = #tpu.dot_dimension_numbers<[1], [0], [0], [1], [0, 0, 1, 1], [], []>} : vector<45x64xbf16>, vector<64x64xbf16>, vector<45x64xf32> -> vector<45x64xf32>
    %212 = arith.addf %207, %211 : vector<45x64xf32>
    %c10_238 = arith.constant 10 : index
    %c0_239 = arith.constant 0 : index
    %213 = vector.load %arg17[%c10_238, %c0_239] : memref<67x64xbf16, #tpu.memory_space<vmem>>, vector<45x64xbf16>
    %c3_240 = arith.constant 3 : index
    %c0_241 = arith.constant 0 : index
    %c0_242 = arith.constant 0 : index
    %214 = vector.load %arg8[%c3_240, %c0_241, %c0_242] : memref<9x64x64xbf16, #tpu.memory_space<vmem>>, vector<1x64x64xbf16>
    %215 = vector.shape_cast %214 : vector<1x64x64xbf16> to vector<64x64xbf16>
    %cst_243 = arith.constant dense<0.000000e+00> : vector<45x64xf32>
    %216 = tpu.matmul %213, %215, %cst_243 {dimension_numbers = #tpu.dot_dimension_numbers<[1], [0], [0], [1], [0, 0, 1, 1], [], []>} : vector<45x64xbf16>, vector<64x64xbf16>, vector<45x64xf32> -> vector<45x64xf32>
    %217 = arith.addf %212, %216 : vector<45x64xf32>
    %c11_244 = arith.constant 11 : index
    %c0_245 = arith.constant 0 : index
    %218 = vector.load %arg17[%c11_244, %c0_245] : memref<67x64xbf16, #tpu.memory_space<vmem>>, vector<45x64xbf16>
    %c4_246 = arith.constant 4 : index
    %c0_247 = arith.constant 0 : index
    %c0_248 = arith.constant 0 : index
    %219 = vector.load %arg8[%c4_246, %c0_247, %c0_248] : memref<9x64x64xbf16, #tpu.memory_space<vmem>>, vector<1x64x64xbf16>
    %220 = vector.shape_cast %219 : vector<1x64x64xbf16> to vector<64x64xbf16>
    %cst_249 = arith.constant dense<0.000000e+00> : vector<45x64xf32>
    %221 = tpu.matmul %218, %220, %cst_249 {dimension_numbers = #tpu.dot_dimension_numbers<[1], [0], [0], [1], [0, 0, 1, 1], [], []>} : vector<45x64xbf16>, vector<64x64xbf16>, vector<45x64xf32> -> vector<45x64xf32>
    %222 = arith.addf %217, %221 : vector<45x64xf32>
    %c12_250 = arith.constant 12 : index
    %c0_251 = arith.constant 0 : index
    %223 = vector.load %arg17[%c12_250, %c0_251] : memref<67x64xbf16, #tpu.memory_space<vmem>>, vector<45x64xbf16>
    %c5_252 = arith.constant 5 : index
    %c0_253 = arith.constant 0 : index
    %c0_254 = arith.constant 0 : index
    %224 = vector.load %arg8[%c5_252, %c0_253, %c0_254] : memref<9x64x64xbf16, #tpu.memory_space<vmem>>, vector<1x64x64xbf16>
    %225 = vector.shape_cast %224 : vector<1x64x64xbf16> to vector<64x64xbf16>
    %cst_255 = arith.constant dense<0.000000e+00> : vector<45x64xf32>
    %226 = tpu.matmul %223, %225, %cst_255 {dimension_numbers = #tpu.dot_dimension_numbers<[1], [0], [0], [1], [0, 0, 1, 1], [], []>} : vector<45x64xbf16>, vector<64x64xbf16>, vector<45x64xf32> -> vector<45x64xf32>
    %227 = arith.addf %222, %226 : vector<45x64xf32>
    %c20_256 = arith.constant 20 : index
    %c0_257 = arith.constant 0 : index
    %228 = vector.load %arg17[%c20_256, %c0_257] : memref<67x64xbf16, #tpu.memory_space<vmem>>, vector<45x64xbf16>
    %c6_258 = arith.constant 6 : index
    %c0_259 = arith.constant 0 : index
    %c0_260 = arith.constant 0 : index
    %229 = vector.load %arg8[%c6_258, %c0_259, %c0_260] : memref<9x64x64xbf16, #tpu.memory_space<vmem>>, vector<1x64x64xbf16>
    %230 = vector.shape_cast %229 : vector<1x64x64xbf16> to vector<64x64xbf16>
    %cst_261 = arith.constant dense<0.000000e+00> : vector<45x64xf32>
    %231 = tpu.matmul %228, %230, %cst_261 {dimension_numbers = #tpu.dot_dimension_numbers<[1], [0], [0], [1], [0, 0, 1, 1], [], []>} : vector<45x64xbf16>, vector<64x64xbf16>, vector<45x64xf32> -> vector<45x64xf32>
    %232 = arith.addf %227, %231 : vector<45x64xf32>
    %c21_262 = arith.constant 21 : index
    %c0_263 = arith.constant 0 : index
    %233 = vector.load %arg17[%c21_262, %c0_263] : memref<67x64xbf16, #tpu.memory_space<vmem>>, vector<45x64xbf16>
    %c7_264 = arith.constant 7 : index
    %c0_265 = arith.constant 0 : index
    %c0_266 = arith.constant 0 : index
    %234 = vector.load %arg8[%c7_264, %c0_265, %c0_266] : memref<9x64x64xbf16, #tpu.memory_space<vmem>>, vector<1x64x64xbf16>
    %235 = vector.shape_cast %234 : vector<1x64x64xbf16> to vector<64x64xbf16>
    %cst_267 = arith.constant dense<0.000000e+00> : vector<45x64xf32>
    %236 = tpu.matmul %233, %235, %cst_267 {dimension_numbers = #tpu.dot_dimension_numbers<[1], [0], [0], [1], [0, 0, 1, 1], [], []>} : vector<45x64xbf16>, vector<64x64xbf16>, vector<45x64xf32> -> vector<45x64xf32>
    %237 = arith.addf %232, %236 : vector<45x64xf32>
    %c22_268 = arith.constant 22 : index
    %c0_269 = arith.constant 0 : index
    %238 = vector.load %arg17[%c22_268, %c0_269] : memref<67x64xbf16, #tpu.memory_space<vmem>>, vector<45x64xbf16>
    %c8_270 = arith.constant 8 : index
    %c0_271 = arith.constant 0 : index
    %c0_272 = arith.constant 0 : index
    %239 = vector.load %arg8[%c8_270, %c0_271, %c0_272] : memref<9x64x64xbf16, #tpu.memory_space<vmem>>, vector<1x64x64xbf16>
    %240 = vector.shape_cast %239 : vector<1x64x64xbf16> to vector<64x64xbf16>
    %cst_273 = arith.constant dense<0.000000e+00> : vector<45x64xf32>
    %241 = tpu.matmul %238, %240, %cst_273 {dimension_numbers = #tpu.dot_dimension_numbers<[1], [0], [0], [1], [0, 0, 1, 1], [], []>} : vector<45x64xbf16>, vector<64x64xbf16>, vector<45x64xf32> -> vector<45x64xf32>
    %242 = arith.addf %237, %241 : vector<45x64xf32>
    %c0_274 = arith.constant 0 : index
    %c0_275 = arith.constant 0 : index
    %243 = vector.load %arg9[%c0_274, %c0_275] : memref<1x64xf32, #tpu.memory_space<vmem>>, vector<1x64xf32>
    %244 = vector.broadcast %243 : vector<1x64xf32> to vector<45x64xf32>
    %245 = arith.addf %242, %244 : vector<45x64xf32>
    %cst_276 = arith.constant 0.000000e+00 : f32
    %246 = vector.broadcast %cst_276 : f32 to vector<45x64xf32>
    %247 = arith.maximumf %245, %246 : vector<45x64xf32>
    %248 = arith.truncf %247 : vector<45x64xf32> to vector<45x64xbf16>
    %c0_277 = arith.constant 0 : index
    %c0_278 = arith.constant 0 : index
    %249 = vector.load %arg18[%c0_277, %c0_278] : memref<45x64xbf16, #tpu.memory_space<vmem>>, vector<45x64xbf16>
    tpu.vector_store %arg18[%c0_277, %c0_278], %248 {strides = array<i32>} : memref<45x64xbf16, #tpu.memory_space<vmem>>, vector<45x64xbf16>,
    %c0_279 = arith.constant 0 : index
    %c0_280 = arith.constant 0 : index
    %250 = vector.load %arg18[%c0_279, %c0_280] : memref<45x64xbf16, #tpu.memory_space<vmem>>, vector<23x64xbf16>
    %c0_281 = arith.constant 0 : index
    %c0_282 = arith.constant 0 : index
    %c0_283 = arith.constant 0 : index
    %251 = vector.load %arg10[%c0_281, %c0_282, %c0_283] : memref<9x64x64xbf16, #tpu.memory_space<vmem>>, vector<1x64x64xbf16>
    %252 = vector.shape_cast %251 : vector<1x64x64xbf16> to vector<64x64xbf16>
    %cst_284 = arith.constant dense<0.000000e+00> : vector<23x64xf32>
    %253 = tpu.matmul %250, %252, %cst_284 {dimension_numbers = #tpu.dot_dimension_numbers<[1], [0], [0], [1], [0, 0, 1, 1], [], []>} : vector<23x64xbf16>, vector<64x64xbf16>, vector<23x64xf32> -> vector<23x64xf32>
    %c1_285 = arith.constant 1 : index
    %c0_286 = arith.constant 0 : index
    %254 = vector.load %arg18[%c1_285, %c0_286] : memref<45x64xbf16, #tpu.memory_space<vmem>>, vector<23x64xbf16>
    %c1_287 = arith.constant 1 : index
    %c0_288 = arith.constant 0 : index
    %c0_289 = arith.constant 0 : index
    %255 = vector.load %arg10[%c1_287, %c0_288, %c0_289] : memref<9x64x64xbf16, #tpu.memory_space<vmem>>, vector<1x64x64xbf16>
    %256 = vector.shape_cast %255 : vector<1x64x64xbf16> to vector<64x64xbf16>
    %cst_290 = arith.constant dense<0.000000e+00> : vector<23x64xf32>
    %257 = tpu.matmul %254, %256, %cst_290 {dimension_numbers = #tpu.dot_dimension_numbers<[1], [0], [0], [1], [0, 0, 1, 1], [], []>} : vector<23x64xbf16>, vector<64x64xbf16>, vector<23x64xf32> -> vector<23x64xf32>
    %258 = arith.addf %253, %257 : vector<23x64xf32>
    %c2_291 = arith.constant 2 : index
    %c0_292 = arith.constant 0 : index
    %259 = vector.load %arg18[%c2_291, %c0_292] : memref<45x64xbf16, #tpu.memory_space<vmem>>, vector<23x64xbf16>
    %c2_293 = arith.constant 2 : index
    %c0_294 = arith.constant 0 : index
    %c0_295 = arith.constant 0 : index
    %260 = vector.load %arg10[%c2_293, %c0_294, %c0_295] : memref<9x64x64xbf16, #tpu.memory_space<vmem>>, vector<1x64x64xbf16>
    %261 = vector.shape_cast %260 : vector<1x64x64xbf16> to vector<64x64xbf16>
    %cst_296 = arith.constant dense<0.000000e+00> : vector<23x64xf32>
    %262 = tpu.matmul %259, %261, %cst_296 {dimension_numbers = #tpu.dot_dimension_numbers<[1], [0], [0], [1], [0, 0, 1, 1], [], []>} : vector<23x64xbf16>, vector<64x64xbf16>, vector<23x64xf32> -> vector<23x64xf32>
    %263 = arith.addf %258, %262 : vector<23x64xf32>
    %c10_297 = arith.constant 10 : index
    %c0_298 = arith.constant 0 : index
    %264 = vector.load %arg18[%c10_297, %c0_298] : memref<45x64xbf16, #tpu.memory_space<vmem>>, vector<23x64xbf16>
    %c3_299 = arith.constant 3 : index
    %c0_300 = arith.constant 0 : index
    %c0_301 = arith.constant 0 : index
    %265 = vector.load %arg10[%c3_299, %c0_300, %c0_301] : memref<9x64x64xbf16, #tpu.memory_space<vmem>>, vector<1x64x64xbf16>
    %266 = vector.shape_cast %265 : vector<1x64x64xbf16> to vector<64x64xbf16>
    %cst_302 = arith.constant dense<0.000000e+00> : vector<23x64xf32>
    %267 = tpu.matmul %264, %266, %cst_302 {dimension_numbers = #tpu.dot_dimension_numbers<[1], [0], [0], [1], [0, 0, 1, 1], [], []>} : vector<23x64xbf16>, vector<64x64xbf16>, vector<23x64xf32> -> vector<23x64xf32>
    %268 = arith.addf %263, %267 : vector<23x64xf32>
    %c11_303 = arith.constant 11 : index
    %c0_304 = arith.constant 0 : index
    %269 = vector.load %arg18[%c11_303, %c0_304] : memref<45x64xbf16, #tpu.memory_space<vmem>>, vector<23x64xbf16>
    %c4_305 = arith.constant 4 : index
    %c0_306 = arith.constant 0 : index
    %c0_307 = arith.constant 0 : index
    %270 = vector.load %arg10[%c4_305, %c0_306, %c0_307] : memref<9x64x64xbf16, #tpu.memory_space<vmem>>, vector<1x64x64xbf16>
    %271 = vector.shape_cast %270 : vector<1x64x64xbf16> to vector<64x64xbf16>
    %cst_308 = arith.constant dense<0.000000e+00> : vector<23x64xf32>
    %272 = tpu.matmul %269, %271, %cst_308 {dimension_numbers = #tpu.dot_dimension_numbers<[1], [0], [0], [1], [0, 0, 1, 1], [], []>} : vector<23x64xbf16>, vector<64x64xbf16>, vector<23x64xf32> -> vector<23x64xf32>
    %273 = arith.addf %268, %272 : vector<23x64xf32>
    %c12_309 = arith.constant 12 : index
    %c0_310 = arith.constant 0 : index
    %274 = vector.load %arg18[%c12_309, %c0_310] : memref<45x64xbf16, #tpu.memory_space<vmem>>, vector<23x64xbf16>
    %c5_311 = arith.constant 5 : index
    %c0_312 = arith.constant 0 : index
    %c0_313 = arith.constant 0 : index
    %275 = vector.load %arg10[%c5_311, %c0_312, %c0_313] : memref<9x64x64xbf16, #tpu.memory_space<vmem>>, vector<1x64x64xbf16>
    %276 = vector.shape_cast %275 : vector<1x64x64xbf16> to vector<64x64xbf16>
    %cst_314 = arith.constant dense<0.000000e+00> : vector<23x64xf32>
    %277 = tpu.matmul %274, %276, %cst_314 {dimension_numbers = #tpu.dot_dimension_numbers<[1], [0], [0], [1], [0, 0, 1, 1], [], []>} : vector<23x64xbf16>, vector<64x64xbf16>, vector<23x64xf32> -> vector<23x64xf32>
    %278 = arith.addf %273, %277 : vector<23x64xf32>
    %c20_315 = arith.constant 20 : index
    %c0_316 = arith.constant 0 : index
    %279 = vector.load %arg18[%c20_315, %c0_316] : memref<45x64xbf16, #tpu.memory_space<vmem>>, vector<23x64xbf16>
    %c6_317 = arith.constant 6 : index
    %c0_318 = arith.constant 0 : index
    %c0_319 = arith.constant 0 : index
    %280 = vector.load %arg10[%c6_317, %c0_318, %c0_319] : memref<9x64x64xbf16, #tpu.memory_space<vmem>>, vector<1x64x64xbf16>
    %281 = vector.shape_cast %280 : vector<1x64x64xbf16> to vector<64x64xbf16>
    %cst_320 = arith.constant dense<0.000000e+00> : vector<23x64xf32>
    %282 = tpu.matmul %279, %281, %cst_320 {dimension_numbers = #tpu.dot_dimension_numbers<[1], [0], [0], [1], [0, 0, 1, 1], [], []>} : vector<23x64xbf16>, vector<64x64xbf16>, vector<23x64xf32> -> vector<23x64xf32>
    %283 = arith.addf %278, %282 : vector<23x64xf32>
    %c21_321 = arith.constant 21 : index
    %c0_322 = arith.constant 0 : index
    %284 = vector.load %arg18[%c21_321, %c0_322] : memref<45x64xbf16, #tpu.memory_space<vmem>>, vector<23x64xbf16>
    %c7_323 = arith.constant 7 : index
    %c0_324 = arith.constant 0 : index
    %c0_325 = arith.constant 0 : index
    %285 = vector.load %arg10[%c7_323, %c0_324, %c0_325] : memref<9x64x64xbf16, #tpu.memory_space<vmem>>, vector<1x64x64xbf16>
    %286 = vector.shape_cast %285 : vector<1x64x64xbf16> to vector<64x64xbf16>
    %cst_326 = arith.constant dense<0.000000e+00> : vector<23x64xf32>
    %287 = tpu.matmul %284, %286, %cst_326 {dimension_numbers = #tpu.dot_dimension_numbers<[1], [0], [0], [1], [0, 0, 1, 1], [], []>} : vector<23x64xbf16>, vector<64x64xbf16>, vector<23x64xf32> -> vector<23x64xf32>
    %288 = arith.addf %283, %287 : vector<23x64xf32>
    %c22_327 = arith.constant 22 : index
    %c0_328 = arith.constant 0 : index
    %289 = vector.load %arg18[%c22_327, %c0_328] : memref<45x64xbf16, #tpu.memory_space<vmem>>, vector<23x64xbf16>
    %c8_329 = arith.constant 8 : index
    %c0_330 = arith.constant 0 : index
    %c0_331 = arith.constant 0 : index
    %290 = vector.load %arg10[%c8_329, %c0_330, %c0_331] : memref<9x64x64xbf16, #tpu.memory_space<vmem>>, vector<1x64x64xbf16>
    %291 = vector.shape_cast %290 : vector<1x64x64xbf16> to vector<64x64xbf16>
    %cst_332 = arith.constant dense<0.000000e+00> : vector<23x64xf32>
    %292 = tpu.matmul %289, %291, %cst_332 {dimension_numbers = #tpu.dot_dimension_numbers<[1], [0], [0], [1], [0, 0, 1, 1], [], []>} : vector<23x64xbf16>, vector<64x64xbf16>, vector<23x64xf32> -> vector<23x64xf32>
    %293 = arith.addf %288, %292 : vector<23x64xf32>
    %c0_333 = arith.constant 0 : index
    %c0_334 = arith.constant 0 : index
    %294 = vector.load %arg11[%c0_333, %c0_334] : memref<1x64xf32, #tpu.memory_space<vmem>>, vector<1x64xf32>
    %295 = vector.broadcast %294 : vector<1x64xf32> to vector<23x64xf32>
    %296 = arith.addf %293, %295 : vector<23x64xf32>
    %cst_335 = arith.constant 0.000000e+00 : f32
    %297 = vector.broadcast %cst_335 : f32 to vector<23x64xf32>
    %298 = arith.maximumf %296, %297 : vector<23x64xf32>
    %299 = arith.truncf %298 : vector<23x64xf32> to vector<23x64xbf16>
    %c0_336 = arith.constant 0 : index
    %c0_337 = arith.constant 0 : index
    %300 = vector.load %arg19[%c0_336, %c0_337] : memref<23x64xbf16, #tpu.memory_space<vmem>>, vector<23x64xbf16>
    tpu.vector_store %arg19[%c0_336, %c0_337], %299 {strides = array<i32>} : memref<23x64xbf16, #tpu.memory_space<vmem>>, vector<23x64xbf16>,
    %c0_338 = arith.constant 0 : index
    %c0_339 = arith.constant 0 : index
    %301 = vector.load %arg19[%c0_338, %c0_339] : memref<23x64xbf16, #tpu.memory_space<vmem>>, vector<1x64xbf16>
    %c0_340 = arith.constant 0 : index
    %c0_341 = arith.constant 0 : index
    %c0_342 = arith.constant 0 : index
    %302 = vector.load %arg12[%c0_340, %c0_341, %c0_342] : memref<9x64x128xbf16, #tpu.memory_space<vmem>>, vector<1x64x128xbf16>
    %303 = vector.shape_cast %302 : vector<1x64x128xbf16> to vector<64x128xbf16>
    %cst_343 = arith.constant dense<0.000000e+00> : vector<1x128xf32>
    %304 = tpu.matmul %301, %303, %cst_343 {dimension_numbers = #tpu.dot_dimension_numbers<[1], [0], [0], [1], [0, 0, 1, 1], [], []>} : vector<1x64xbf16>, vector<64x128xbf16>, vector<1x128xf32> -> vector<1x128xf32>
    %c1_344 = arith.constant 1 : index
    %c0_345 = arith.constant 0 : index
    %305 = vector.load %arg19[%c1_344, %c0_345] : memref<23x64xbf16, #tpu.memory_space<vmem>>, vector<1x64xbf16>
    %c1_346 = arith.constant 1 : index
    %c0_347 = arith.constant 0 : index
    %c0_348 = arith.constant 0 : index
    %306 = vector.load %arg12[%c1_346, %c0_347, %c0_348] : memref<9x64x128xbf16, #tpu.memory_space<vmem>>, vector<1x64x128xbf16>
    %307 = vector.shape_cast %306 : vector<1x64x128xbf16> to vector<64x128xbf16>
    %cst_349 = arith.constant dense<0.000000e+00> : vector<1x128xf32>
    %308 = tpu.matmul %305, %307, %cst_349 {dimension_numbers = #tpu.dot_dimension_numbers<[1], [0], [0], [1], [0, 0, 1, 1], [], []>} : vector<1x64xbf16>, vector<64x128xbf16>, vector<1x128xf32> -> vector<1x128xf32>
    %309 = arith.addf %304, %308 : vector<1x128xf32>
    %c2_350 = arith.constant 2 : index
    %c0_351 = arith.constant 0 : index
    %310 = vector.load %arg19[%c2_350, %c0_351] : memref<23x64xbf16, #tpu.memory_space<vmem>>, vector<1x64xbf16>
    %c2_352 = arith.constant 2 : index
    %c0_353 = arith.constant 0 : index
    %c0_354 = arith.constant 0 : index
    %311 = vector.load %arg12[%c2_352, %c0_353, %c0_354] : memref<9x64x128xbf16, #tpu.memory_space<vmem>>, vector<1x64x128xbf16>
    %312 = vector.shape_cast %311 : vector<1x64x128xbf16> to vector<64x128xbf16>
    %cst_355 = arith.constant dense<0.000000e+00> : vector<1x128xf32>
    %313 = tpu.matmul %310, %312, %cst_355 {dimension_numbers = #tpu.dot_dimension_numbers<[1], [0], [0], [1], [0, 0, 1, 1], [], []>} : vector<1x64xbf16>, vector<64x128xbf16>, vector<1x128xf32> -> vector<1x128xf32>
    %314 = arith.addf %309, %313 : vector<1x128xf32>
    %c10_356 = arith.constant 10 : index
    %c0_357 = arith.constant 0 : index
    %315 = vector.load %arg19[%c10_356, %c0_357] : memref<23x64xbf16, #tpu.memory_space<vmem>>, vector<1x64xbf16>
    %c3_358 = arith.constant 3 : index
    %c0_359 = arith.constant 0 : index
    %c0_360 = arith.constant 0 : index
    %316 = vector.load %arg12[%c3_358, %c0_359, %c0_360] : memref<9x64x128xbf16, #tpu.memory_space<vmem>>, vector<1x64x128xbf16>
    %317 = vector.shape_cast %316 : vector<1x64x128xbf16> to vector<64x128xbf16>
    %cst_361 = arith.constant dense<0.000000e+00> : vector<1x128xf32>
    %318 = tpu.matmul %315, %317, %cst_361 {dimension_numbers = #tpu.dot_dimension_numbers<[1], [0], [0], [1], [0, 0, 1, 1], [], []>} : vector<1x64xbf16>, vector<64x128xbf16>, vector<1x128xf32> -> vector<1x128xf32>
    %319 = arith.addf %314, %318 : vector<1x128xf32>
    %c11_362 = arith.constant 11 : index
    %c0_363 = arith.constant 0 : index
    %320 = vector.load %arg19[%c11_362, %c0_363] : memref<23x64xbf16, #tpu.memory_space<vmem>>, vector<1x64xbf16>
    %c4_364 = arith.constant 4 : index
    %c0_365 = arith.constant 0 : index
    %c0_366 = arith.constant 0 : index
    %321 = vector.load %arg12[%c4_364, %c0_365, %c0_366] : memref<9x64x128xbf16, #tpu.memory_space<vmem>>, vector<1x64x128xbf16>
    %322 = vector.shape_cast %321 : vector<1x64x128xbf16> to vector<64x128xbf16>
    %cst_367 = arith.constant dense<0.000000e+00> : vector<1x128xf32>
    %323 = tpu.matmul %320, %322, %cst_367 {dimension_numbers = #tpu.dot_dimension_numbers<[1], [0], [0], [1], [0, 0, 1, 1], [], []>} : vector<1x64xbf16>, vector<64x128xbf16>, vector<1x128xf32> -> vector<1x128xf32>
    %324 = arith.addf %319, %323 : vector<1x128xf32>
    %c12_368 = arith.constant 12 : index
    %c0_369 = arith.constant 0 : index
    %325 = vector.load %arg19[%c12_368, %c0_369] : memref<23x64xbf16, #tpu.memory_space<vmem>>, vector<1x64xbf16>
    %c5_370 = arith.constant 5 : index
    %c0_371 = arith.constant 0 : index
    %c0_372 = arith.constant 0 : index
    %326 = vector.load %arg12[%c5_370, %c0_371, %c0_372] : memref<9x64x128xbf16, #tpu.memory_space<vmem>>, vector<1x64x128xbf16>
    %327 = vector.shape_cast %326 : vector<1x64x128xbf16> to vector<64x128xbf16>
    %cst_373 = arith.constant dense<0.000000e+00> : vector<1x128xf32>
    %328 = tpu.matmul %325, %327, %cst_373 {dimension_numbers = #tpu.dot_dimension_numbers<[1], [0], [0], [1], [0, 0, 1, 1], [], []>} : vector<1x64xbf16>, vector<64x128xbf16>, vector<1x128xf32> -> vector<1x128xf32>
    %329 = arith.addf %324, %328 : vector<1x128xf32>
    %c20_374 = arith.constant 20 : index
    %c0_375 = arith.constant 0 : index
    %330 = vector.load %arg19[%c20_374, %c0_375] : memref<23x64xbf16, #tpu.memory_space<vmem>>, vector<1x64xbf16>
    %c6_376 = arith.constant 6 : index
    %c0_377 = arith.constant 0 : index
    %c0_378 = arith.constant 0 : index
    %331 = vector.load %arg12[%c6_376, %c0_377, %c0_378] : memref<9x64x128xbf16, #tpu.memory_space<vmem>>, vector<1x64x128xbf16>
    %332 = vector.shape_cast %331 : vector<1x64x128xbf16> to vector<64x128xbf16>
    %cst_379 = arith.constant dense<0.000000e+00> : vector<1x128xf32>
    %333 = tpu.matmul %330, %332, %cst_379 {dimension_numbers = #tpu.dot_dimension_numbers<[1], [0], [0], [1], [0, 0, 1, 1], [], []>} : vector<1x64xbf16>, vector<64x128xbf16>, vector<1x128xf32> -> vector<1x128xf32>
    %334 = arith.addf %329, %333 : vector<1x128xf32>
    %c21_380 = arith.constant 21 : index
    %c0_381 = arith.constant 0 : index
    %335 = vector.load %arg19[%c21_380, %c0_381] : memref<23x64xbf16, #tpu.memory_space<vmem>>, vector<1x64xbf16>
    %c7_382 = arith.constant 7 : index
    %c0_383 = arith.constant 0 : index
    %c0_384 = arith.constant 0 : index
    %336 = vector.load %arg12[%c7_382, %c0_383, %c0_384] : memref<9x64x128xbf16, #tpu.memory_space<vmem>>, vector<1x64x128xbf16>
    %337 = vector.shape_cast %336 : vector<1x64x128xbf16> to vector<64x128xbf16>
    %cst_385 = arith.constant dense<0.000000e+00> : vector<1x128xf32>
    %338 = tpu.matmul %335, %337, %cst_385 {dimension_numbers = #tpu.dot_dimension_numbers<[1], [0], [0], [1], [0, 0, 1, 1], [], []>} : vector<1x64xbf16>, vector<64x128xbf16>, vector<1x128xf32> -> vector<1x128xf32>
    %339 = arith.addf %334, %338 : vector<1x128xf32>
    %c22_386 = arith.constant 22 : index
    %c0_387 = arith.constant 0 : index
    %340 = vector.load %arg19[%c22_386, %c0_387] : memref<23x64xbf16, #tpu.memory_space<vmem>>, vector<1x64xbf16>
    %c8_388 = arith.constant 8 : index
    %c0_389 = arith.constant 0 : index
    %c0_390 = arith.constant 0 : index
    %341 = vector.load %arg12[%c8_388, %c0_389, %c0_390] : memref<9x64x128xbf16, #tpu.memory_space<vmem>>, vector<1x64x128xbf16>
    %342 = vector.shape_cast %341 : vector<1x64x128xbf16> to vector<64x128xbf16>
    %cst_391 = arith.constant dense<0.000000e+00> : vector<1x128xf32>
    %343 = tpu.matmul %340, %342, %cst_391 {dimension_numbers = #tpu.dot_dimension_numbers<[1], [0], [0], [1], [0, 0, 1, 1], [], []>} : vector<1x64xbf16>, vector<64x128xbf16>, vector<1x128xf32> -> vector<1x128xf32>
    %344 = arith.addf %339, %343 : vector<1x128xf32>
    %c0_392 = arith.constant 0 : index
    %c0_393 = arith.constant 0 : index
    %345 = vector.load %arg13[%c0_392, %c0_393] : memref<1x128xf32, #tpu.memory_space<vmem>>, vector<1x128xf32>
    %346 = arith.addf %344, %345 : vector<1x128xf32>
    %cst_394 = arith.constant 0.000000e+00 : f32
    %347 = vector.broadcast %cst_394 : f32 to vector<1x128xf32>
    %348 = arith.maximumf %346, %347 : vector<1x128xf32>
    %c0_395 = arith.constant 0 : index
    %c0_396 = arith.constant 0 : index
    %c0_397 = arith.constant 0 : index
    %349 = vector.load %arg14[%c0_395, %c0_396, %c0_397] : memref<1x1x128xf32, #tpu.memory_space<vmem>>, vector<1x1x128xf32>
    %350 = vector.shape_cast %349 : vector<1x1x128xf32> to vector<1x128xf32>
    %351 = vector.shape_cast %348 : vector<1x128xf32> to vector<1x1x128xf32>
    tpu.vector_store %arg14[%c0_395, %c0_396, %c0_397], %351 {strides = array<i32>} : memref<1x1x128xf32, #tpu.memory_space<vmem>>, vector<1x1x128xf32>,
    return
  }
  func.func @transform_0(%arg0: i32) -> (i32, i32, i32, i32, i32) {
    %c0_i32 = arith.constant 0 : i32
    %c0_i32_0 = arith.constant 0 : i32
    %c0_i32_1 = arith.constant 0 : i32
    %c0_i32_2 = arith.constant 0 : i32
    %c0_i32_3 = arith.constant 0 : i32
    return %arg0, %c0_i32, %c0_i32_0, %c0_i32_1, %c0_i32_2 : i32, i32, i32, i32, i32
  }
  func.func @transform_1(%arg0: i32) -> (i32, i32) {
    %c0_i32 = arith.constant 0 : i32
    %c0_i32_0 = arith.constant 0 : i32
    %c0_i32_1 = arith.constant 0 : i32
    return %c0_i32, %c0_i32_0 : i32, i32
  }
  func.func @transform_2(%arg0: i32) -> (i32, i32) {
    %c0_i32 = arith.constant 0 : i32
    %c0_i32_0 = arith.constant 0 : i32
    %c0_i32_1 = arith.constant 0 : i32
    return %c0_i32, %c0_i32_0 : i32, i32
  }
  func.func @transform_3(%arg0: i32) -> (i32, i32, i32) {
    %c0_i32 = arith.constant 0 : i32
    %c0_i32_0 = arith.constant 0 : i32
    %c0_i32_1 = arith.constant 0 : i32
    %c0_i32_2 = arith.constant 0 : i32
    return %c0_i32, %c0_i32_0, %c0_i32_1 : i32, i32, i32
  }
  func.func @transform_4(%arg0: i32) -> (i32, i32) {
    %c0_i32 = arith.constant 0 : i32
    %c0_i32_0 = arith.constant 0 : i32
    %c0_i32_1 = arith.constant 0 : i32
    return %c0_i32, %c0_i32_0 : i32, i32
  }
  func.func @transform_5(%arg0: i32) -> (i32, i32, i32) {
    %c0_i32 = arith.constant 0 : i32
    %c0_i32_0 = arith.constant 0 : i32
    %c0_i32_1 = arith.constant 0 : i32
    %c0_i32_2 = arith.constant 0 : i32
    return %c0_i32, %c0_i32_0, %c0_i32_1 : i32, i32, i32
  }
  func.func @transform_6(%arg0: i32) -> (i32, i32) {
    %c0_i32 = arith.constant 0 : i32
    %c0_i32_0 = arith.constant 0 : i32
    %c0_i32_1 = arith.constant 0 : i32
    return %c0_i32, %c0_i32_0 : i32, i32
  }
  func.func @transform_7(%arg0: i32) -> (i32, i32, i32) {
    %c0_i32 = arith.constant 0 : i32
    %c0_i32_0 = arith.constant 0 : i32
    %c0_i32_1 = arith.constant 0 : i32
    %c0_i32_2 = arith.constant 0 : i32
    return %c0_i32, %c0_i32_0, %c0_i32_1 : i32, i32, i32
  }
  func.func @transform_8(%arg0: i32) -> (i32, i32) {
    %c0_i32 = arith.constant 0 : i32
    %c0_i32_0 = arith.constant 0 : i32
    %c0_i32_1 = arith.constant 0 : i32
    return %c0_i32, %c0_i32_0 : i32, i32
  }
  func.func @transform_9(%arg0: i32) -> (i32, i32, i32) {
    %c0_i32 = arith.constant 0 : i32
    %c0_i32_0 = arith.constant 0 : i32
    %c0_i32_1 = arith.constant 0 : i32
    %c0_i32_2 = arith.constant 0 : i32
    return %c0_i32, %c0_i32_0, %c0_i32_1 : i32, i32, i32
  }
  func.func @transform_10(%arg0: i32) -> (i32, i32) {
    %c0_i32 = arith.constant 0 : i32
    %c0_i32_0 = arith.constant 0 : i32
    %c0_i32_1 = arith.constant 0 : i32
    return %c0_i32, %c0_i32_0 : i32, i32
  }
  func.func @transform_11(%arg0: i32) -> (i32, i32, i32) {
    %c0_i32 = arith.constant 0 : i32
    %c0_i32_0 = arith.constant 0 : i32
    %c0_i32_1 = arith.constant 0 : i32
    %c0_i32_2 = arith.constant 0 : i32
    return %c0_i32, %c0_i32_0, %c0_i32_1 : i32, i32, i32
  }
  func.func @transform_12(%arg0: i32) -> (i32, i32) {
    %c0_i32 = arith.constant 0 : i32
    %c0_i32_0 = arith.constant 0 : i32
    %c0_i32_1 = arith.constant 0 : i32
    return %c0_i32, %c0_i32_0 : i32, i32
  }
  func.func @transform_13(%arg0: i32) -> (i32, i32, i32) {
    %c0_i32 = arith.constant 0 : i32
    %c0_i32_0 = arith.constant 0 : i32
    %c0_i32_1 = arith.constant 0 : i32
    return %arg0, %c0_i32, %c0_i32_0 : i32, i32, i32
  }
}

</mosaic_0001>

<bundles_post_ra>
// kernel: equi_image_encoder_forward.1
= control target key start
LH: loop header
LB: loop body
LE: loop exit
PB: predicated region body
PF: predicated region fallthrough
CT: control target
= control target key end

     0   :  { %s10522_s0 = inlined_call_operand.vmem [shape: bf16[2,2,2,100,128], index: 0, kind: input, shape index: {}]   ;;  %s10523_s1 = inlined_call_operand.vmem [shape: bf16[128,32], index: 1, kind: input, shape index: {}]   ;;  %s10524_s2 = inlined_call_operand.vmem [shape: f32[1,32], index: 2, kind: input, shape index: {}]   ;;  %s10525_s3 = inlined_call_operand.vmem [shape: bf16[16,32,64], index: 3, kind: input, shape index: {}]   ;;  %s10526_s4 = inlined_call_operand.vmem [shape: f32[1,64], index: 4, kind: input, shape index: {}]   ;;  %s10527_s5 = inlined_call_operand.vmem [shape: bf16[9,64,64], index: 5, kind: input, shape index: {}]   ;;  %s10528_s6 = inlined_call_operand.vmem [shape: f32[1,64], index: 6, kind: input, shape index: {}]   ;;  %s10529_s7 = inlined_call_operand.vmem [shape: bf16[9,64,64], index: 7, kind: input, shape index: {}]   ;;  %s10530_s8 = inlined_call_operand.vmem [shape: f32[1,64], index: 8, kind: input, shape index: {}]   ;;  %s10531_s9 = inlined_call_operand.vmem [shape: bf16[9,64,64], index: 9, kind: input, shape index: {}]   ;;  %s10532_s10 = inlined_call_operand.vmem [shape: f32[1,64], index: 10, kind: input, shape index: {}]   ;;  %s10533_s11 = inlined_call_operand.vmem [shape: bf16[9,64,128], index: 11, kind: input, shape index: {}]   ;;  %s10534_s12 = inlined_call_operand.vmem [shape: f32[1,128], index: 12, kind: input, shape index: {}]   ;;  %s10535_s13 = inlined_call_operand.hbm [shape: f32[2,1,128], index: 13, kind: output, shape index: {}]  }
   0x1   :  { %10536 = sst [smem:[#allocation11_spill]] %s10522_s0 }
   0x2   :  { %10537 = sst [smem:[#allocation12_spill]] %s10523_s1 }
   0x3   :  { %18 = vsyncpa [#allocation8], 0 }
   0x4   :  { %20 = vsyncpa [#allocation8 + $0x1], 0  ;;  %s8685_s25 = smov 0   ;;  %s8687_s26 = smov 0  }
   0x5   :  { %s8689_s27 = smov 0   ;;  %s8691_s28 = smov 0  }
   0x6 LB: > { %s8706_s29 = sadd.s32 4294967295, %s8613_s28   ;;  %s6510_s30 = sadd.s32 4294967294, %s8613_s28   ;;  %s8613_s28 = sphi %s8691_s28, %s10547_s28   ;;  %s8609_s27 = sphi %s8689_s27, %s10546_s27   ;;  %s8605_s26 = sphi %s8687_s26, %s10545_s26   ;;  %s8601_s25 = sphi %s8685_s25, %s10544_s25  }
   0x7   : > { %s8710_s14 = sadd.s32 1, %s8613_s28   ;;  %s311_s15 = sadd.s32 1, %s8609_s27 }
   0x8   : > { %s308_s16 = ssub.s32 %s8613_s28, %s8710_s14  ;;  %p321_p0 = scmp.ne.s32.totalorder %s8609_s27, %s8605_s26 }
   0x9   : > { %p309_p1 = scmp.eq.s32.totalorder %s308_s16, 0  ;;  %p322_p2 = scmp.eq.s32.totalorder %s8706_s29, 1 }
   0xa   : > { %p327_p3 = scmp.ne.s32.totalorder %s8605_s26, %s8601_s25  ;;  %p328_p4 = scmp.eq.s32.totalorder %s6510_s30, 1 }
   0xb   : > { %s8721_s17 = scalar_select %p309_p1, %s8609_s27, %s311_s15  }
   0xc   : > { %p8723_p5 = por %p322_p2, %p321_p0  ;;  %p8727_p6 = por %p328_p4, %p327_p3 }
   0xd   : > { %10538 = sst [smem:[#allocation10_spill]] %s8721_s17  ;;  %p6513_p7 = scmp.ge.s32.totalorder %s8613_s28, 1 }
   0xe   : > { %p390_p8 = scmp.lt.s32.totalorder %s8613_s28, 3 }
  0x10   : > { %p391_p9 = pnand %p6513_p7, %p390_p8 }
  0x11   : > { %s10541_s1 = sld [smem:[#allocation12_spill]] (!%p391_p9)  ;;  %p433_p10 = scmp.lt.s32.totalorder (!%p391_p9), %s8706_s29, 1 }
  0x12   : > { %394 = sbr.rel (%p391_p9) target bundleno = 1693 (0x69d), region = 72  ;;  %s10542_s0 = sld [smem:[#allocation11_spill]] (!%p391_p9) }
  0x13   : > { %s6451_s20 = scalar_lea.hbm (!%p391_p9), %s10535_s13, %s8706_s29  ;;  %s8566_s21 = scalar_lea.hbm (!%p391_p9), %s10535_s13, 2 }
  0x17   : > { %v8206_v0 = vld [vmem:[%s10541_s1 + $0x38] sm:$0xff]  ;;  %v8205_v1 = vld [vmem:[%s10541_s1 + $0x30] sm:$0xff]  ;;  %v8204_v2 = vld [vmem:[%s10541_s1 + $0x28] sm:$0xff]  ;;  %s434_s24 = scalar_select %p433_p10, %s8706_s29, 1  ;;  %vm629_vm0 = vcmask 257024   ;;  %vm1130_vm1 = vcmask 261120  }
  0x18   : > { %560 = vmatpush.bf16.msra.mxu0 %v8206_v0  ;;  %698 = vmatpush.bf16.msra.mxu1 %v8206_v0  ;;  %v8203_v3 = vld [vmem:[%s10541_s1 + $0x20] sm:$0xff]  ;;  %v8202_v4 = vld [vmem:[%s10541_s1 + $0x18] sm:$0xff]  ;;  %v8201_v5 = vld [vmem:[%s10541_s1 + $0x10] sm:$0xff]  ;;  %vm1292_vm2 = vsmask.f32 7424  ;;  %vm642_vm3 = vcmask 254976  }
  0x19   : > { %835 = vmatpush.bf16.msra.mxu2 %v8206_v0  ;;  %972 = vmatpush.bf16.msra.mxu3 %v8206_v0  ;;  %v8200_v6 = vld [vmem:[%s10541_s1 + $0x8] sm:$0xff]  ;;  %s8501_s16 = smul.u32 208, %s434_s24  ;;  %v8199_v7 = vld [vmem:[%s10541_s1] sm:$0xff]  ;;  %v8246_v17 = vld [vmem:[%s10525_s3 + $0x18] sm:$0xff]  ;;  %vm2099_vm4 = vcmask 1046528   ;;  %vm3206_vm6 = vcmask 519168  }
  0x1a   : > { %v8248_v16 = vld [vmem:[%s10525_s3 + $0x28] sm:$0xff]  ;;  %v8250_v18 = vld [vmem:[%s10525_s3 + $0x38] sm:$0xff]  ;;  %v8247_v32 = vld [vmem:[%s10525_s3 + $0x20] sm:$0xff]  ;;  %vm2336_vm5 = vsmask.f32 6400  ;;  %vm3336_vm7 = vcmask 523264  }
  0x1b   : > { %s8762_s17 = scalar_lea.vmem %s10542_s0, %s8501_s16  ;;  %v8238_v19 = vld [vmem:[%s10525_s3 + $0x8] sm:$0xff]  ;;  %v8245_v33 = vld [vmem:[%s10525_s3 + $0x10] sm:$0xff]  ;;  %v8237_v35 = vld [vmem:[%s10525_s3] sm:$0xff]  ;;  %vm3218_vm8 = vcmask 516096   ;;  %vm3219_vm9 = vsmask.f32 256 }
  0x1c   : > { %561 = vmatpush.bf16.msra.mxu0 %v8205_v1  ;;  %699 = vmatpush.bf16.msra.mxu1 %v8205_v1  ;;  %v8207_v8 = vld [vmem:[%s8762_s17] sm:$0xff]  ;;  %v8213_v9 = vld [vmem:[%s8762_s17 + $0x34] sm:$0xff]  ;;  %v8219_v10 = vld [vmem:[%s8762_s17 + $0x68] sm:$0xff]  ;;  %vm3841_vm11 = vcmask 1045504   ;;  %vm4072_vm12 = vsmask.f32 5376 }
  0x1d   : > { %836 = vmatpush.bf16.msra.mxu2 %v8205_v1  ;;  %973 = vmatpush.bf16.msra.mxu3 %v8205_v1  ;;  %v8225_v11 = vld [vmem:[%s8762_s17 + $0x9c] sm:$0xff]  ;;  %v8208_v12 = vld [vmem:[%s8762_s17 + $0x8] sm:$0xff]  ;;  %v8220_v14 = vld [vmem:[%s8762_s17 + $0x70] sm:$0xff]  ;;  %vm4242_vm13 = vcmask 1044480   ;;  %vm4372_vm14 = vcmask 517120   ;;  %s6455_s24 = sshll.u32 %s6451_s20, 4  ;;  %s6456_s24 = int_to_ptr.hbm [resolvable:$true] %s6455_s24 }
  0x1e   : > { %v8214_v13 = vld [vmem:[%s8762_s17 + $0x3c] sm:$0xff]  ;;  %v8226_v15 = vld [vmem:[%s8762_s17 + $0xa4] sm:$0xff]  ;;  %v8209_v20 = vld [vmem:[%s8762_s17 + $0x10] sm:$0xff]  ;;  %vm4373_vm15 = vsmask.f32 1280  ;;  %s8560_s1 = sshra.s32 %s6456_s24, 4  ;;  %s8561_s1 = int_to_ptr.hbm [resolvable:$true] %s8560_s1 }
  0x1f   : > { %v8215_v21 = vld [vmem:[%s8762_s17 + $0x44] sm:$0xff]  ;;  %v8221_v22 = vld [vmem:[%s8762_s17 + $0x78] sm:$0xff]  ;;  %v8227_v23 = vld [vmem:[%s8762_s17 + $0xac] sm:$0xff]  ;;  %s8562_s29 = scalar_lea.hbm %s8561_s1, 1  ;;  %p8567_p0 = scmp.lt.s32.totalorder %s8561_s1, %s10535_s13 }
  0x20   : > { %562 = vmatpush.bf16.msra.mxu0 %v8204_v2  ;;  %700 = vmatpush.bf16.msra.mxu1 %v8204_v2  ;;  %v8210_v24 = vld [vmem:[%s8762_s17 + $0x18] sm:$0xff]  ;;  %v8216_v25 = vld [vmem:[%s8762_s17 + $0x4c] sm:$0xff]  ;;  %v8222_v26 = vld [vmem:[%s8762_s17 + $0x80] sm:$0xff]  ;;  %p8563_p11 = scmp.ne.s32.totalorder %s8561_s1, %s8562_s29  ;;  %p8568_p1 = scmp.lt.s32.totalorder %s8566_s21, %s8562_s29 }
  0x21   : > { %837 = vmatpush.bf16.msra.mxu2 %v8204_v2  ;;  %974 = vmatpush.bf16.msra.mxu3 %v8204_v2  ;;  %v8228_v27 = vld [vmem:[%s8762_s17 + $0xb4] sm:$0xff]  ;;  %v8211_v28 = vld [vmem:[%s8762_s17 + $0x20] sm:$0xff]  ;;  %v8223_v30 = vld [vmem:[%s8762_s17 + $0x88] sm:$0xff] }
  0x22   : > { %v8217_v29 = vld [vmem:[%s8762_s17 + $0x54] sm:$0xff]  ;;  %v8229_v31 = vld [vmem:[%s8762_s17 + $0xbc] sm:$0xff]  ;;  %v8212_v36 = vld [vmem:[%s8762_s17 + $0x28] sm:$0xff]  ;;  %p8564_p12 = pnand %p8563_p11, %p8723_p5  ;;  %p8569_p2 = por %p8568_p1, %p8567_p0 }
  0x23   : > { %v8249_v34 = vld [vmem:[%s10525_s3 + $0x30] sm:$0xff]  ;;  %v8218_v37 = vld [vmem:[%s8762_s17 + $0x5c] sm:$0xff]  ;;  %v8230_v39 = vld [vmem:[%s8762_s17 + $0xc4] sm:$0xff] }
  0x24   : > { %563 = vmatpush.bf16.msra.mxu0 %v8203_v3  ;;  %701 = vmatpush.bf16.msra.mxu1 %v8203_v3  ;;  %v8224_v38 = vld [vmem:[%s8762_s17 + $0x90] sm:$0xff]  ;;  %v6583_v41 = vld [vmem:[%s8762_s17 + $0x64] sm:$0x3]  ;;  %v6620_v42 = vld [vmem:[%s8762_s17 + $0x98] sm:$0x3]  ;;  %p8565_p13 = pneg %p8564_p12 }
  0x25   : > { %838 = vmatpush.bf16.msra.mxu2 %v8203_v3  ;;  %975 = vmatpush.bf16.msra.mxu3 %v8203_v3  ;;  %v468_v40 = vld [vmem:[%s8762_s17 + $0x30] sm:$0x3]  ;;  %v6657_v43 = vld [vmem:[%s8762_s17 + $0xcc] sm:$0x3]  ;;  %v683_v45 = vunpack.c.l.b16 %v6583_v41  ;;  %v820_v46 = vunpack.c.l.b16 %v6620_v42  ;;  %v8819_v52 = vld [vmem:[%s10524_s2] ss:$0 sm:$0xff] }
  0x26   : > { %v497_v44 = vunpack.c.l.b16 %v468_v40  ;;  %v957_v47 = vunpack.c.l.b16 %v6657_v43  ;;  %v8266_v42 = vld [vmem:[%s10525_s3 + $0x58] sm:$0xff]  ;;  %vm3220_vm10 = vmand %vm3218_vm8, %vm3219_vm9  ;;  %s431_s17 = sand.u32 1, %s8605_s26   ;;  %p8570_p3 = pnand %p8569_p2, %p8565_p13 }
  0x27   : > { %v690_v49 = vpack.c.b16 %v683_v45, %v683_v45  ;;  %v827_v50 = vpack.c.b16 %v820_v46, %v820_v46  ;;  %s432_s0 = scalar_lea.vmem [#allocation7], %s431_s17  ;;  %s6443_s30 = scalar_lea.sflag [#allocation8], %s431_s17 }
  0x28   : > { %564 = vmatpush.bf16.msra.mxu0 %v8202_v4  ;;  %702 = vmatpush.bf16.msra.mxu1 %v8202_v4  ;;  %v504_v48 = vpack.c.b16 %v497_v44, %v497_v44  ;;  %v964_v51 = vpack.c.b16 %v957_v47, %v957_v47  ;;  %s6453_s23 = sshll.u32 %s432_s0, 4  ;;  %s6454_s23 = int_to_ptr.vmem [resolvable:$true] %s6453_s23 }
  0x29   : > { %839 = vmatpush.bf16.msra.mxu2 %v8202_v4  ;;  %976 = vmatpush.bf16.msra.mxu3 %v8202_v4 }
  0x2c   : > { %565 = vmatpush.bf16.msra.mxu0 %v8201_v5  ;;  %703 = vmatpush.bf16.msra.mxu1 %v8201_v5 }
  0x2d   : > { %840 = vmatpush.bf16.msra.mxu2 %v8201_v5  ;;  %977 = vmatpush.bf16.msra.mxu3 %v8201_v5 }
  0x30   : > { %566 = vmatpush.bf16.msra.mxu0 %v8200_v6  ;;  %704 = vmatpush.bf16.msra.mxu1 %v8200_v6 }
  0x31   : > { %841 = vmatpush.bf16.msra.mxu2 %v8200_v6  ;;  %978 = vmatpush.bf16.msra.mxu3 %v8200_v6 }
  0x34   : > { %567 = vmatpush.bf16.msra.mxu0 %v8199_v7  ;;  %705 = vmatpush.bf16.msra.mxu1 %v8199_v7 }
  0x35   : > { %842 = vmatpush.bf16.msra.mxu2 %v8199_v7  ;;  %979 = vmatpush.bf16.msra.mxu3 %v8199_v7 }
  0x37   : > { %568 = vmatmul.bf16.vlgmr.msra.gmra.mxu0 %v8207_v8  ;;  %706 = vmatmul.bf16.vlgmr.msra.gmra.mxu1 %v8213_v9 }
  0x38   : > { %843 = vmatmul.bf16.vlgmr.msra.gmra.mxu2 %v8219_v10  ;;  %980 = vmatmul.bf16.vlgmr.msra.gmra.mxu3 %v8225_v11 }
  0x39   : > { %1370 = vmatpush.bf16.msrb.mxu2 %v8248_v16  ;;  %1155 = vmatpush.bf16.msrb.mxu0 %v8246_v17 }
  0x3a   : > { %1497 = vmatpush.bf16.msrb.mxu3 %v8250_v18  ;;  %1254 = vmatpush.bf16.msrb.mxu1 %v8238_v19  ;;  %v8268_v19 = vld [vmem:[%s10525_s3 + $0x68] sm:$0xff] }
  0x3d   : > { %1371 = vmatpush.bf16.msrb.mxu2 %v8247_v32  ;;  %1156 = vmatpush.bf16.msrb.mxu0 %v8245_v33 }
  0x3e   : > { %1498 = vmatpush.bf16.msrb.mxu3 %v8249_v34  ;;  %1255 = vmatpush.bf16.msrb.mxu1 %v8237_v35 }
  0x41   : > { %1880 = vmatpush.bf16.msra.mxu2 %v8268_v19 }
  0x42   : > { %1753 = vmatpush.bf16.msra.mxu1 %v8266_v42 }
  0x47   : > { %573 = vmatmul.bf16.gmra.mxu0 %v8208_v12  ;;  %711 = vmatmul.bf16.gmra.mxu1 %v8214_v13 }
  0x48   : > { %848 = vmatmul.bf16.gmra.mxu2 %v8220_v14  ;;  %985 = vmatmul.bf16.gmra.mxu3 %v8226_v15 }
  0x57   : > { %578 = vmatmul.bf16.gmra.mxu0 %v8209_v20  ;;  %716 = vmatmul.bf16.gmra.mxu1 %v8215_v21 }
  0x58   : > { %853 = vmatmul.bf16.gmra.mxu2 %v8221_v22  ;;  %990 = vmatmul.bf16.gmra.mxu3 %v8227_v23 }
  0x67   : > { %583 = vmatmul.bf16.gmra.mxu0 %v8210_v24  ;;  %721 = vmatmul.bf16.gmra.mxu1 %v8216_v25 }
  0x68   : > { %858 = vmatmul.bf16.gmra.mxu2 %v8222_v26  ;;  %995 = vmatmul.bf16.gmra.mxu3 %v8228_v27 }
  0x77   : > { %588 = vmatmul.bf16.gmra.mxu0 %v8211_v28  ;;  %726 = vmatmul.bf16.gmra.mxu1 %v8217_v29 }
  0x78   : > { %863 = vmatmul.bf16.gmra.mxu2 %v8223_v30  ;;  %1000 = vmatmul.bf16.gmra.mxu3 %v8229_v31 }
  0x87   : > { %593 = vmatmul.bf16.gmra.mxu0 %v8212_v36  ;;  %731 = vmatmul.bf16.gmra.mxu1 %v8218_v37  ;;  %v8258_v36 = vld [vmem:[%s10525_s3 + $0x48] sm:$0xff]  ;;  %v8270_v37 = vld [vmem:[%s10525_s3 + $0x78] sm:$0xff] }
  0x88   : > { %868 = vmatmul.bf16.gmra.mxu2 %v8224_v38  ;;  %1005 = vmatmul.bf16.gmra.mxu3 %v8230_v39 }
  0x89   : > { %1625 = vmatpush.bf16.msra.mxu0 %v8258_v36  ;;  %2007 = vmatpush.bf16.msra.mxu3 %v8270_v37 }
  0x97   : > { %598 = vmatmul.bf16.gmra.mxu0 %v504_v48  ;;  %736 = vmatmul.bf16.gmra.mxu1 %v690_v49 }
  0x98   : > { %873 = vmatmul.bf16.gmra.mxu2 %v827_v50  ;;  %1010 = vmatmul.bf16.gmra.mxu3 %v964_v51 }
  0xb4   : > { %v569_v53 = vpop.f32.mrf.mxu0  ;;  %v707_v54 = vpop.f32.mrf.mxu1 }
  0xb5   : > { %v570_v55 = vadd.f32 %v8819_v52, %v569_v53  ;;  %v708_v56 = vadd.f32 %v8819_v52, %v707_v54 }
  0xb7   : > { %v603_v57 = vmax.f32 %v570_v55, 0.0  ;;  %v741_v58 = vmax.f32 %v708_v56, 0.0 }
  0xb9   : > { %v616_v59 = vpack.c.bf16 %v603_v57, %v603_v57  ;;  %v754_v60 = vpack.c.bf16 %v741_v58, %v741_v58 }
  0xbb   : > { %630 = vst.msk [vmem:[#allocation2] sm:$0xf] %vm629_vm0, %v616_v59  ;;  %v844_v61 = vpop.f32.mrf.mxu2  ;;  %v981_v62 = vpop.f32.mrf.mxu3 }
  0xbc   : > { %768 = vst.msk [vmem:[#allocation2 + $0x34] sm:$0xf] %vm629_vm0, %v754_v60  ;;  %v571_v63 = vpop.f32.mrf.mxu0  ;;  %v709_v0 = vpop.f32.mrf.mxu1  ;;  %v845_v1 = vadd.f32 %v8819_v52, %v844_v61  ;;  %v982_v2 = vadd.f32 %v8819_v52, %v981_v62 }
  0xbd   : > { %v572_v3 = vadd.f32 %v8819_v52, %v571_v63  ;;  %v710_v4 = vadd.f32 %v8819_v52, %v709_v0 }
  0xbe   : > { %v878_v5 = vmax.f32 %v845_v1, 0.0  ;;  %v1015_v6 = vmax.f32 %v982_v2, 0.0 }
  0xbf   : > { %v604_v7 = vmax.f32 %v572_v3, 0.0  ;;  %v742_v8 = vmax.f32 %v710_v4, 0.0 }
  0xc0   : > { %v891_v9 = vpack.c.bf16 %v878_v5, %v878_v5  ;;  %v1028_v12 = vpack.c.bf16 %v1015_v6, %v1015_v6 }
  0xc1   : > { %v617_v10 = vpack.c.bf16 %v604_v7, %v604_v7  ;;  %v755_v11 = vpack.c.bf16 %v742_v8, %v742_v8 }
  0xc2   : > { %905 = vst.msk [vmem:[#allocation2 + $0x68] sm:$0xf] %vm629_vm0, %v891_v9 }
  0xc3   : > { %631 = vst.msk [vmem:[#allocation2 + $0x4] sm:$0xf] %vm629_vm0, %v617_v10  ;;  %v846_v13 = vpop.f32.mrf.mxu2  ;;  %v983_v14 = vpop.f32.mrf.mxu3 }
  0xc4   : > { %769 = vst.msk [vmem:[#allocation2 + $0x38] sm:$0xf] %vm629_vm0, %v755_v11  ;;  %v574_v15 = vpop.f32.mrf.mxu0  ;;  %v712_v16 = vpop.f32.mrf.mxu1  ;;  %v847_v17 = vadd.f32 %v8819_v52, %v846_v13  ;;  %v984_v18 = vadd.f32 %v8819_v52, %v983_v14 }
  0xc5   : > { %v575_v20 = vadd.f32 %v8819_v52, %v574_v15  ;;  %v713_v21 = vadd.f32 %v8819_v52, %v712_v16  ;;  %1042 = vst.msk [vmem:[#allocation2 + $0x9c] sm:$0xf] %vm629_vm0, %v1028_v12 }
  0xc6   : > { %v879_v22 = vmax.f32 %v847_v17, 0.0  ;;  %v1016_v23 = vmax.f32 %v984_v18, 0.0 }
  0xc7   : > { %v605_v24 = vmax.f32 %v575_v20, 0.0  ;;  %v743_v25 = vmax.f32 %v713_v21, 0.0 }
  0xc8   : > { %v892_v26 = vpack.c.bf16 %v879_v22, %v879_v22  ;;  %v1029_v29 = vpack.c.bf16 %v1016_v23, %v1016_v23 }
  0xc9   : > { %v618_v27 = vpack.c.bf16 %v605_v24, %v605_v24  ;;  %v756_v28 = vpack.c.bf16 %v743_v25, %v743_v25 }
  0xca   : > { %v8840_v30 = vld [vmem:[#allocation2] sm:$0xff]  ;;  %906 = vst.msk [vmem:[#allocation2 + $0x6c] sm:$0xf] %vm629_vm0, %v892_v26 }
  0xcb   : > { %632 = vst.msk [vmem:[#allocation2 + $0x8] sm:$0xf] %vm629_vm0, %v618_v27  ;;  %v8844_v31 = vld [vmem:[#allocation2 + $0x34] sm:$0xff]  ;;  %v849_v32 = vpop.f32.mrf.mxu2  ;;  %v986_v33 = vpop.f32.mrf.mxu3  ;;  %6756 = vmatmul.msk.bf16.vlgmr.msrb.gmra.mxu1 %vm1130_vm1, %v8840_v30  ;;  %v1295_v60 = vshll.u32 %v8840_v30, 16  ;;  %v1293_v14 = vshrl.u32 %v8840_v30, 16 }
  0xcc   : > { %770 = vst.msk [vmem:[#allocation2 + $0x3c] sm:$0xf] %vm629_vm0, %v756_v28  ;;  %v576_v34 = vpop.f32.mrf.mxu0  ;;  %v714_v35 = vpop.f32.mrf.mxu1  ;;  %v850_v38 = vadd.f32 %v8819_v52, %v849_v32  ;;  %v987_v39 = vadd.f32 %v8819_v52, %v986_v33  ;;  %6718 = vmatmul.msk.bf16.vlgmr.msrb.gmra.mxu0 %vm1130_vm1, %v8844_v31  ;;  %v1422_v1 = vshll.u32 %v8844_v31, 16  ;;  %v1420_v20 = vshrl.u32 %v8844_v31, 16 }
  0xcd   : > { %v577_v40 = vadd.f32 %v8819_v52, %v576_v34  ;;  %v715_v41 = vadd.f32 %v8819_v52, %v714_v35  ;;  %1043 = vst.msk [vmem:[#allocation2 + $0xa0] sm:$0xf] %vm629_vm0, %v1029_v29  ;;  %v1297_v7 = vrot.slane %v1295_v60, 1 }
  0xce   : > { %v880_v43 = vmax.f32 %v850_v38, 0.0  ;;  %v1017_v44 = vmax.f32 %v987_v39, 0.0  ;;  %v1424_v9 = vrot.slane %v1422_v1, 1 }
  0xcf   : > { %v606_v45 = vmax.f32 %v577_v40, 0.0  ;;  %v744_v46 = vmax.f32 %v715_v41, 0.0  ;;  %v1298_v22 = vor.u32 %v1297_v7, %v1293_v14 }
  0xd0   : > { %v893_v47 = vpack.c.bf16 %v880_v43, %v880_v43  ;;  %v1030_v50 = vpack.c.bf16 %v1017_v44, %v1017_v44  ;;  %v1425_v28 = vor.u32 %v1424_v9, %v1420_v20 }
  0xd1   : > { %v619_v48 = vpack.c.bf16 %v606_v45, %v606_v45  ;;  %v757_v49 = vpack.c.bf16 %v744_v46, %v744_v46 }
  0xd2   : > { %907 = vst.msk [vmem:[#allocation2 + $0x70] sm:$0xf] %vm629_vm0, %v893_v47 }
  0xd3   : > { %633 = vst.msk [vmem:[#allocation2 + $0xc] sm:$0xf] %vm629_vm0, %v619_v48  ;;  %v851_v51 = vpop.f32.mrf.mxu2  ;;  %v988_v53 = vpop.f32.mrf.mxu3 }
  0xd4   : > { %771 = vst.msk [vmem:[#allocation2 + $0x40] sm:$0xf] %vm629_vm0, %v757_v49  ;;  %v579_v54 = vpop.f32.mrf.mxu0  ;;  %v717_v55 = vpop.f32.mrf.mxu1  ;;  %v852_v56 = vadd.f32 %v8819_v52, %v851_v51  ;;  %v989_v57 = vadd.f32 %v8819_v52, %v988_v53 }
  0xd5   : > { %v580_v58 = vadd.f32 %v8819_v52, %v579_v54  ;;  %v718_v59 = vadd.f32 %v8819_v52, %v717_v55  ;;  %1044 = vst.msk [vmem:[#allocation2 + $0xa4] sm:$0xf] %vm629_vm0, %v1030_v50 }
  0xd6   : > { %v881_v61 = vmax.f32 %v852_v56, 0.0  ;;  %v1018_v62 = vmax.f32 %v989_v57, 0.0 }
  0xd7   : > { %v607_v63 = vmax.f32 %v580_v58, 0.0  ;;  %v745_v0 = vmax.f32 %v718_v59, 0.0 }
  0xd8   : > { %v894_v2 = vpack.c.bf16 %v881_v61, %v881_v61  ;;  %v1031_v5 = vpack.c.bf16 %v1018_v62, %v1018_v62 }
  0xd9   : > { %v620_v3 = vpack.c.bf16 %v607_v63, %v607_v63  ;;  %v758_v4 = vpack.c.bf16 %v745_v0, %v745_v0 }
  0xda   : > { %v8875_v6 = vld [vmem:[#allocation2 + $0x8] sm:$0xff]  ;;  %908 = vst.msk [vmem:[#allocation2 + $0x74] sm:$0xf] %vm629_vm0, %v894_v2 }
  0xdb   : > { %634 = vst.msk [vmem:[#allocation2 + $0x10] sm:$0xf] %vm629_vm0, %v620_v3  ;;  %v8879_v8 = vld [vmem:[#allocation2 + $0x3c] sm:$0xff]  ;;  %v854_v10 = vpop.f32.mrf.mxu2  ;;  %v991_v11 = vpop.f32.mrf.mxu3  ;;  %6757 = vmatmul.msk.bf16.gmra.mxu1 %vm1130_vm1, %v8875_v6  ;;  %v1299_v15 = vshll.u32 %v8875_v6, 16  ;;  %v1303_v59 = vshrl.u32 %v8875_v6, 16 }
  0xdc   : > { %772 = vst.msk [vmem:[#allocation2 + $0x44] sm:$0xf] %vm629_vm0, %v758_v4  ;;  %v581_v12 = vpop.f32.mrf.mxu0  ;;  %v719_v13 = vpop.f32.mrf.mxu1  ;;  %v855_v16 = vadd.f32 %v8819_v52, %v854_v10  ;;  %v992_v17 = vadd.f32 %v8819_v52, %v991_v11  ;;  %6719 = vmatmul.msk.bf16.gmra.mxu0 %vm1130_vm1, %v8879_v8  ;;  %v1426_v21 = vshll.u32 %v8879_v8, 16  ;;  %v1430_v1 = vshrl.u32 %v8879_v8, 16 }
  0xdd   : > { %v582_v18 = vadd.f32 %v8819_v52, %v581_v12  ;;  %v720_v19 = vadd.f32 %v8819_v52, %v719_v13  ;;  %1045 = vst.msk [vmem:[#allocation2 + $0xa8] sm:$0xf] %vm629_vm0, %v1031_v5  ;;  %v1301_v23 = vrot.slane %v1299_v15, 1 }
  0xde   : > { %v882_v24 = vmax.f32 %v855_v16, 0.0  ;;  %v1019_v25 = vmax.f32 %v992_v17, 0.0  ;;  %v1428_v29 = vrot.slane %v1426_v21, 1 }
  0xdf   : > { %v608_v26 = vmax.f32 %v582_v18, 0.0  ;;  %v746_v27 = vmax.f32 %v720_v19, 0.0  ;;  %v1302_v30 = vsel %vm1292_vm2, %v1298_v22, %v1301_v23  ;;  %v1305_v3 = vor.u32 %v1303_v59, %v1301_v23  ;;  %v8267_v23 = vld [vmem:[%s10525_s3 + $0x60] sm:$0xff] }
  0xe0   : > { %v895_v32 = vpack.c.bf16 %v882_v24, %v882_v24  ;;  %6774 = vmatmul.msk.bf16.vlgmr.msrb.gmra.mxu2 %vm1130_vm1, %v1302_v30  ;;  %v1429_v31 = vsel %vm1292_vm2, %v1425_v28, %v1428_v29  ;;  %v1032_v35 = vpack.c.bf16 %v1019_v25, %v1019_v25  ;;  %v1432_v10 = vor.u32 %v1430_v1, %v1428_v29 }
  0xe1   : > { %v621_v33 = vpack.c.bf16 %v608_v26, %v608_v26  ;;  %v759_v34 = vpack.c.bf16 %v746_v27, %v746_v27  ;;  %6792 = vmatmul.msk.bf16.vlgmr.msrb.gmra.mxu3 %vm1130_vm1, %v1429_v31  ;;  %1881 = vmatpush.bf16.msra.mxu2 %v8267_v23 }
  0xe2   : > { %909 = vst.msk [vmem:[#allocation2 + $0x78] sm:$0xf] %vm629_vm0, %v895_v32 }
  0xe3   : > { %635 = vst.msk [vmem:[#allocation2 + $0x14] sm:$0xf] %vm629_vm0, %v621_v33  ;;  %v856_v36 = vpop.f32.mrf.mxu2  ;;  %v993_v37 = vpop.f32.mrf.mxu3 }
  0xe4   : > { %773 = vst.msk [vmem:[#allocation2 + $0x48] sm:$0xf] %vm629_vm0, %v759_v34  ;;  %v584_v38 = vpop.f32.mrf.mxu0  ;;  %v722_v39 = vpop.f32.mrf.mxu1  ;;  %v857_v40 = vadd.f32 %v8819_v52, %v856_v36  ;;  %v994_v41 = vadd.f32 %v8819_v52, %v993_v37 }
  0xe5   : > { %v585_v42 = vadd.f32 %v8819_v52, %v584_v38  ;;  %v723_v43 = vadd.f32 %v8819_v52, %v722_v39  ;;  %1046 = vst.msk [vmem:[#allocation2 + $0xac] sm:$0xf] %vm629_vm0, %v1032_v35 }
  0xe6   : > { %v883_v44 = vmax.f32 %v857_v40, 0.0  ;;  %v1020_v45 = vmax.f32 %v994_v41, 0.0 }
  0xe7   : > { %v609_v46 = vmax.f32 %v585_v42, 0.0  ;;  %v747_v47 = vmax.f32 %v723_v43, 0.0  ;;  %v8257_v42 = vld [vmem:[%s10525_s3 + $0x40] sm:$0xff]  ;;  %v8269_v43 = vld [vmem:[%s10525_s3 + $0x70] sm:$0xff] }
  0xe8   : > { %v896_v48 = vpack.c.bf16 %v883_v44, %v883_v44  ;;  %v1033_v51 = vpack.c.bf16 %v1020_v45, %v1020_v45  ;;  %1626 = vmatpush.bf16.msra.mxu0 %v8257_v42  ;;  %2008 = vmatpush.bf16.msra.mxu3 %v8269_v43 }
  0xe9   : > { %v622_v49 = vpack.c.bf16 %v609_v46, %v609_v46  ;;  %v760_v50 = vpack.c.bf16 %v747_v47, %v747_v47 }
  0xea   : > { %v8907_v53 = vld [vmem:[#allocation2 + $0x10] sm:$0xff]  ;;  %910 = vst.msk [vmem:[#allocation2 + $0x7c] sm:$0xf] %vm629_vm0, %v896_v48 }
  0xeb   : > { %636 = vst.msk [vmem:[#allocation2 + $0x18] sm:$0xf] %vm629_vm0, %v622_v49  ;;  %v8911_v54 = vld [vmem:[#allocation2 + $0x44] sm:$0xff]  ;;  %v859_v55 = vpop.f32.mrf.mxu2  ;;  %v996_v56 = vpop.f32.mrf.mxu3  ;;  %6758 = vmatmul.msk.bf16.gmra.mxu1 %vm1130_vm1, %v8907_v53  ;;  %v1306_v60 = vshll.u32 %v8907_v53, 16  ;;  %v1310_v40 = vshrl.u32 %v8907_v53, 16 }
  0xec   : > { %774 = vst.msk [vmem:[#allocation2 + $0x4c] sm:$0xf] %vm629_vm0, %v760_v50  ;;  %v586_v57 = vpop.f32.mrf.mxu0  ;;  %v724_v58 = vpop.f32.mrf.mxu1  ;;  %v860_v61 = vadd.f32 %v8819_v52, %v859_v55  ;;  %v997_v62 = vadd.f32 %v8819_v52, %v996_v56  ;;  %6720 = vmatmul.msk.bf16.gmra.mxu0 %vm1130_vm1, %v8911_v54  ;;  %v1433_v2 = vshll.u32 %v8911_v54, 16  ;;  %v1437_v48 = vshrl.u32 %v8911_v54, 16  ;;  %v8265_v50 = vld [vmem:[%s10525_s3 + $0x50] sm:$0xff] }
  0xed   : > { %v587_v63 = vadd.f32 %v8819_v52, %v586_v57  ;;  %v725_v0 = vadd.f32 %v8819_v52, %v724_v58  ;;  %1047 = vst.msk [vmem:[#allocation2 + $0xb0] sm:$0xf] %vm629_vm0, %v1033_v51  ;;  %v1308_v4 = vrot.slane %v1306_v60, 1  ;;  %1754 = vmatpush.bf16.msra.mxu1 %v8265_v50 }
  0xee   : > { %v884_v5 = vmax.f32 %v860_v61, 0.0  ;;  %v1021_v6 = vmax.f32 %v997_v62, 0.0  ;;  %v1435_v11 = vrot.slane %v1433_v2, 1 }
  0xef   : > { %v610_v7 = vmax.f32 %v587_v63, 0.0  ;;  %v748_v9 = vmax.f32 %v725_v0, 0.0  ;;  %v1309_v12 = vsel %vm1292_vm2, %v1305_v3, %v1308_v4  ;;  %v1312_v51 = vor.u32 %v1310_v40, %v1308_v4 }
  0xf0   : > { %v897_v13 = vpack.c.bf16 %v884_v5, %v884_v5  ;;  %6775 = vmatmul.msk.bf16.gmra.mxu2 %vm1130_vm1, %v1309_v12  ;;  %v1436_v8 = vsel %vm1292_vm2, %v1432_v10, %v1435_v11  ;;  %v1034_v16 = vpack.c.bf16 %v1021_v6, %v1021_v6  ;;  %v1439_v59 = vor.u32 %v1437_v48, %v1435_v11 }
  0xf1   : > { %v623_v14 = vpack.c.bf16 %v610_v7, %v610_v7  ;;  %v761_v15 = vpack.c.bf16 %v748_v9, %v748_v9  ;;  %6793 = vmatmul.msk.bf16.gmra.mxu3 %vm1130_vm1, %v1436_v8 }
  0xf2   : > { %911 = vst.msk [vmem:[#allocation2 + $0x80] sm:$0xf] %vm629_vm0, %v897_v13 }
  0xf3   : > { %637 = vst.msk [vmem:[#allocation2 + $0x1c] sm:$0xf] %vm629_vm0, %v623_v14  ;;  %v861_v17 = vpop.f32.mrf.mxu2  ;;  %v998_v18 = vpop.f32.mrf.mxu3 }
  0xf4   : > { %775 = vst.msk [vmem:[#allocation2 + $0x50] sm:$0xf] %vm629_vm0, %v761_v15  ;;  %v589_v19 = vpop.f32.mrf.mxu0  ;;  %v727_v20 = vpop.f32.mrf.mxu1  ;;  %v862_v21 = vadd.f32 %v8819_v52, %v861_v17  ;;  %v999_v22 = vadd.f32 %v8819_v52, %v998_v18 }
  0xf5   : > { %v590_v24 = vadd.f32 %v8819_v52, %v589_v19  ;;  %v728_v25 = vadd.f32 %v8819_v52, %v727_v20  ;;  %1048 = vst.msk [vmem:[#allocation2 + $0xb4] sm:$0xf] %vm629_vm0, %v1034_v16 }
  0xf6   : > { %v885_v26 = vmax.f32 %v862_v21, 0.0  ;;  %v1022_v27 = vmax.f32 %v999_v22, 0.0 }
  0xf7   : > { %v611_v28 = vmax.f32 %v590_v24, 0.0  ;;  %v749_v29 = vmax.f32 %v728_v25, 0.0 }
  0xf8   : > { %v898_v30 = vpack.c.bf16 %v885_v26, %v885_v26  ;;  %v1035_v34 = vpack.c.bf16 %v1022_v27, %v1022_v27 }
  0xf9   : > { %v624_v32 = vpack.c.bf16 %v611_v28, %v611_v28  ;;  %v762_v33 = vpack.c.bf16 %v749_v29, %v749_v29 }
  0xfa   : > { %v8942_v31 = vld [vmem:[#allocation2 + $0x18] sm:$0xff]  ;;  %912 = vst.msk [vmem:[#allocation2 + $0x84] sm:$0xf] %vm629_vm0, %v898_v30 }
  0xfb   : > { %638 = vst.msk [vmem:[#allocation2 + $0x20] sm:$0xf] %vm629_vm0, %v624_v32  ;;  %v8946_v35 = vld [vmem:[#allocation2 + $0x4c] sm:$0xff]  ;;  %v864_v36 = vpop.f32.mrf.mxu2  ;;  %v1001_v37 = vpop.f32.mrf.mxu3  ;;  %6759 = vmatmul.msk.bf16.gmra.mxu1 %vm1130_vm1, %v8942_v31  ;;  %v1313_v41 = vshll.u32 %v8942_v31, 16  ;;  %v1317_v24 = vshrl.u32 %v8942_v31, 16 }
  0xfc   : > { %776 = vst.msk [vmem:[#allocation2 + $0x54] sm:$0xf] %vm629_vm0, %v762_v33  ;;  %v591_v38 = vpop.f32.mrf.mxu0  ;;  %v729_v39 = vpop.f32.mrf.mxu1  ;;  %v865_v44 = vadd.f32 %v8819_v52, %v864_v36  ;;  %v1002_v45 = vadd.f32 %v8819_v52, %v1001_v37  ;;  %6721 = vmatmul.msk.bf16.gmra.mxu0 %vm1130_vm1, %v8946_v35  ;;  %v1440_v49 = vshll.u32 %v8946_v35, 16  ;;  %v1444_v30 = vshrl.u32 %v8946_v35, 16 }
  0xfd   : > { %v592_v46 = vadd.f32 %v8819_v52, %v591_v38  ;;  %v730_v47 = vadd.f32 %v8819_v52, %v729_v39  ;;  %1049 = vst.msk [vmem:[#allocation2 + $0xb8] sm:$0xf] %vm629_vm0, %v1035_v34  ;;  %v1315_v53 = vrot.slane %v1313_v41, 1 }
  0xfe   : > { %v886_v55 = vmax.f32 %v865_v44, 0.0  ;;  %v1023_v56 = vmax.f32 %v1002_v45, 0.0  ;;  %v1442_v60 = vrot.slane %v1440_v49, 1 }
  0xff   : > { %v612_v57 = vmax.f32 %v592_v46, 0.0  ;;  %v750_v58 = vmax.f32 %v730_v47, 0.0  ;;  %v1316_v54 = vsel %vm1292_vm2, %v1312_v51, %v1315_v53  ;;  %v1319_v33 = vor.u32 %v1317_v24, %v1315_v53 }
 0x100   : > { %v899_v61 = vpack.c.bf16 %v886_v55, %v886_v55  ;;  %6776 = vmatmul.msk.bf16.gmra.mxu2 %vm1130_vm1, %v1316_v54  ;;  %v1443_v0 = vsel %vm1292_vm2, %v1439_v59, %v1442_v60  ;;  %v1036_v1 = vpack.c.bf16 %v1023_v56, %v1023_v56  ;;  %v1446_v39 = vor.u32 %v1444_v30, %v1442_v60  ;;  %v8259_v30 = vld [vmem:[#allocation2 + $0x9c] sm:$0xff] }
 0x101   : > { %v625_v62 = vpack.c.bf16 %v612_v57, %v612_v57  ;;  %v763_v63 = vpack.c.bf16 %v750_v58, %v750_v58  ;;  %6794 = vmatmul.msk.bf16.gmra.mxu3 %vm1130_vm1, %v1443_v0 }
 0x102   : > { %913 = vst.msk [vmem:[#allocation2 + $0x88] sm:$0xf] %vm629_vm0, %v899_v61 }
 0x103   : > { %639 = vst.msk [vmem:[#allocation2 + $0x24] sm:$0xf] %vm629_vm0, %v625_v62  ;;  %v866_v2 = vpop.f32.mrf.mxu2  ;;  %v1003_v3 = vpop.f32.mrf.mxu3 }
 0x104   : > { %777 = vst.msk [vmem:[#allocation2 + $0x58] sm:$0xf] %vm629_vm0, %v763_v63  ;;  %v594_v4 = vpop.f32.mrf.mxu0  ;;  %v732_v5 = vpop.f32.mrf.mxu1  ;;  %v867_v6 = vadd.f32 %v8819_v52, %v866_v2  ;;  %v1004_v7 = vadd.f32 %v8819_v52, %v1003_v3 }
 0x105   : > { %v595_v9 = vadd.f32 %v8819_v52, %v594_v4  ;;  %v733_v10 = vadd.f32 %v8819_v52, %v732_v5  ;;  %1050 = vst.msk [vmem:[#allocation2 + $0xbc] sm:$0xf] %vm629_vm0, %v1036_v1 }
 0x106   : > { %v887_v11 = vmax.f32 %v867_v6, 0.0  ;;  %v1024_v12 = vmax.f32 %v1004_v7, 0.0 }
 0x107   : > { %v613_v13 = vmax.f32 %v595_v9, 0.0  ;;  %v751_v14 = vmax.f32 %v733_v10, 0.0 }
 0x108   : > { %v900_v15 = vpack.c.bf16 %v887_v11, %v887_v11  ;;  %v1037_v17 = vpack.c.bf16 %v1024_v12, %v1024_v12 }
 0x109   : > { %v626_v8 = vpack.c.bf16 %v613_v13, %v613_v13  ;;  %v764_v16 = vpack.c.bf16 %v751_v14, %v751_v14 }
 0x10a   : > { %v8983_v18 = vld [vmem:[#allocation2 + $0x20] sm:$0xff]  ;;  %914 = vst.msk [vmem:[#allocation2 + $0x8c] sm:$0xf] %vm629_vm0, %v900_v15 }
 0x10b   : > { %640 = vst.msk [vmem:[#allocation2 + $0x28] sm:$0xf] %vm629_vm0, %v626_v8  ;;  %v8987_v19 = vld [vmem:[#allocation2 + $0x54] sm:$0xff]  ;;  %v869_v20 = vpop.f32.mrf.mxu2  ;;  %v1006_v21 = vpop.f32.mrf.mxu3  ;;  %6760 = vmatmul.msk.bf16.gmra.mxu1 %vm1130_vm1, %v8983_v18  ;;  %v1320_v25 = vshll.u32 %v8983_v18, 16  ;;  %v1324_v12 = vshrl.u32 %v8983_v18, 16 }
 0x10c   : > { %778 = vst.msk [vmem:[#allocation2 + $0x5c] sm:$0xf] %vm629_vm0, %v764_v16  ;;  %v596_v22 = vpop.f32.mrf.mxu0  ;;  %v734_v23 = vpop.f32.mrf.mxu1  ;;  %v870_v26 = vadd.f32 %v8819_v52, %v869_v20  ;;  %v1007_v27 = vadd.f32 %v8819_v52, %v1006_v21  ;;  %6722 = vmatmul.msk.bf16.gmra.mxu0 %vm1130_vm1, %v8987_v19  ;;  %v1447_v32 = vshll.u32 %v8987_v19, 16  ;;  %v1451_v14 = vshrl.u32 %v8987_v19, 16  ;;  %v8288_v19 = vld [vmem:[%s10525_s3 + $0xa8] sm:$0xff] }
 0x10d   : > { %v597_v28 = vadd.f32 %v8819_v52, %v596_v22  ;;  %v735_v29 = vadd.f32 %v8819_v52, %v734_v23  ;;  %1051 = vst.msk [vmem:[#allocation2 + $0xc0] sm:$0xf] %vm629_vm0, %v1037_v17  ;;  %v1322_v34 = vrot.slane %v1320_v25, 1  ;;  %v8278_v25 = vld [vmem:[%s10525_s3 + $0x88] sm:$0xff]  ;;  %2426 = vmatpush.bf16.msrb.mxu2 %v8288_v19 }
 0x10e   : > { %v888_v31 = vmax.f32 %v870_v26, 0.0  ;;  %v1025_v36 = vmax.f32 %v1007_v27, 0.0  ;;  %v1449_v40 = vrot.slane %v1447_v32, 1  ;;  %v8290_v26 = vld [vmem:[%s10525_s3 + $0xb8] sm:$0xff]  ;;  %2147 = vmatpush.bf16.msrb.mxu0 %v8278_v25  ;;  %v8251_v32 = vld [vmem:[#allocation2 + $0x68] sm:$0xff] }
 0x10f   : > { %v614_v37 = vmax.f32 %v597_v28, 0.0  ;;  %v752_v38 = vmax.f32 %v735_v29, 0.0  ;;  %v1323_v41 = vsel %vm1292_vm2, %v1319_v33, %v1322_v34  ;;  %v1326_v17 = vor.u32 %v1324_v12, %v1322_v34  ;;  %v8286_v29 = vld [vmem:[%s10525_s3 + $0x98] sm:$0xff]  ;;  %2565 = vmatpush.bf16.msrb.mxu3 %v8290_v26 }
 0x110   : > { %v901_v42 = vpack.c.bf16 %v888_v31, %v888_v31  ;;  %6777 = vmatmul.msk.bf16.gmra.mxu2 %vm1130_vm1, %v1323_v41  ;;  %v1450_v35 = vsel %vm1292_vm2, %v1446_v39, %v1449_v40  ;;  %v1038_v45 = vpack.c.bf16 %v1025_v36, %v1025_v36  ;;  %v1453_v21 = vor.u32 %v1451_v14, %v1449_v40  ;;  %v8260_v39 = vld [vmem:[#allocation2 + $0xa4] sm:$0xff]  ;;  %v8262_v12 = vld [vmem:[#allocation2 + $0xb4] sm:$0xff] }
 0x111   : > { %v627_v43 = vpack.c.bf16 %v614_v37, %v614_v37  ;;  %v765_v44 = vpack.c.bf16 %v752_v38, %v752_v38  ;;  %6795 = vmatmul.msk.bf16.gmra.mxu3 %vm1130_vm1, %v1450_v35  ;;  %2286 = vmatpush.bf16.msrb.mxu1 %v8286_v29  ;;  %v8252_v37 = vld [vmem:[#allocation2 + $0x70] sm:$0xff]  ;;  %v1805_v38 = vshll.u32 %v8251_v32, 16  ;;  %v1932_v40 = vshll.u32 %v8259_v30, 16 }
 0x112   : > { %915 = vst.msk [vmem:[#allocation2 + $0x90] sm:$0xf] %vm629_vm0, %v901_v42  ;;  %v6746_v63 = vld [vmem:[#allocation2 + $0x28] sm:$0xf]  ;;  %v1809_v41 = vshll.u32 %v8252_v37, 16  ;;  %v1803_v42 = vshrl.u32 %v8251_v32, 16 }
 0x113   : > { %641 = vst.msk [vmem:[#allocation2 + $0x2c] sm:$0xf] %vm629_vm0, %v627_v43  ;;  %v871_v46 = vpop.f32.mrf.mxu2  ;;  %v1008_v47 = vpop.f32.mrf.mxu3  ;;  %v6708_v1 = vld [vmem:[#allocation2 + $0x5c] sm:$0xf]  ;;  %v1807_v43 = vrot.slane %v1805_v38, 1  ;;  %v1930_v35 = vshrl.u32 %v8259_v30, 16 }
 0x114   : > { %779 = vst.msk [vmem:[#allocation2 + $0x60] sm:$0xf] %vm629_vm0, %v765_v44  ;;  %v599_v48 = vpop.f32.mrf.mxu0  ;;  %v737_v49 = vpop.f32.mrf.mxu1  ;;  %v872_v50 = vadd.f32 %v8819_v52, %v871_v46  ;;  %v1009_v51 = vadd.f32 %v8819_v52, %v1008_v47  ;;  %v1936_v44 = vshll.u32 %v8260_v39, 16  ;;  %v1811_v46 = vrot.slane %v1809_v41, 1 }
 0x115   : > { %v600_v53 = vadd.f32 %v8819_v52, %v599_v48  ;;  %v738_v55 = vadd.f32 %v8819_v52, %v737_v49  ;;  %1052 = vst.msk [vmem:[#allocation2 + $0xc4] sm:$0xf] %vm629_vm0, %v1038_v45  ;;  %v1934_v45 = vrot.slane %v1932_v40, 1  ;;  %v1808_v47 = vor.u32 %v1807_v43, %v1803_v42 }
 0x116   : > { %v889_v56 = vmax.f32 %v872_v50, 0.0  ;;  %v1026_v57 = vmax.f32 %v1009_v51, 0.0  ;;  %v1938_v48 = vrot.slane %v1936_v44, 1 }
 0x117   : > { %v615_v58 = vmax.f32 %v600_v53, 0.0  ;;  %v753_v59 = vmax.f32 %v738_v55, 0.0  ;;  %v1935_v49 = vor.u32 %v1934_v45, %v1930_v35  ;;  %v1812_v50 = vsel %vm1292_vm2, %v1808_v47, %v1811_v46  ;;  %v8253_v53 = vld [vmem:[#allocation2 + $0x78] sm:$0xff]  ;;  %v8261_v55 = vld [vmem:[#allocation2 + $0xac] sm:$0xff] }
 0x118   : > { %v902_v60 = vpack.c.bf16 %v889_v56, %v889_v56  ;;  %v1039_v62 = vpack.c.bf16 %v1026_v57, %v1026_v57  ;;  %v1813_v57 = vshrl.u32 %v8252_v37, 16 }
 0x119   : > { %v628_v54 = vpack.c.bf16 %v615_v58, %v615_v58  ;;  %v766_v61 = vpack.c.bf16 %v753_v59, %v753_v59  ;;  %v1939_v51 = vsel %vm1292_vm2, %v1935_v49, %v1938_v48  ;;  %v1816_v58 = vshll.u32 %v8253_v53, 16 }
 0x11a   : > { %v8236_v0 = vld [vmem:[#allocation2 + $0x28] sm:$0x10]  ;;  %916 = vst.msk [vmem:[#allocation2 + $0x94] sm:$0xf] %vm629_vm0, %v902_v60  ;;  %v1940_v60 = vshrl.u32 %v8260_v39, 16 }
 0x11b   : > { %643 = vst.msk [vmem:[#allocation2 + $0x30] sm:$0x3] %vm642_vm3, %v628_v54  ;;  %v8244_v2 = vld [vmem:[#allocation2 + $0x5c] sm:$0x10]  ;;  %v6747_v3 = vor.u32 %v8236_v0, %v6746_v63  ;;  %v874_v4 = vpop.f32.mrf.mxu2  ;;  %v1011_v5 = vpop.f32.mrf.mxu3  ;;  %v1943_v54 = vshll.u32 %v8261_v55, 16  ;;  %v1818_v63 = vrot.slane %v1816_v58, 1 }
 0x11c   : > { %780 = vst.msk [vmem:[#allocation2 + $0x64] sm:$0x3] %vm642_vm3, %v766_v61  ;;  %v6709_v6 = vor.u32 %v8244_v2, %v6708_v1  ;;  %v875_v7 = vadd.f32 %v8819_v52, %v874_v4  ;;  %v1012_v9 = vadd.f32 %v8819_v52, %v1011_v5  ;;  %v601_v10 = vpop.f32.mrf.mxu0  ;;  %v739_v11 = vpop.f32.mrf.mxu1  ;;  %v1942_v0 = vor.u32 %v1940_v60, %v1938_v48  ;;  %v6866_v58 = vld [vmem:[#allocation2 + $0xc4] sm:$0xf] }
 0x11d   : > { %6761 = vmatmul.msk.bf16.gmra.mxu1 %vm1130_vm1, %v6747_v3  ;;  %v1327_v13 = vshll.u32 %v6747_v3, 16  ;;  %1053 = vst.msk [vmem:[#allocation2 + $0xc8] sm:$0xf] %vm629_vm0, %v1039_v62  ;;  %v1331_v33 = vshrl.u32 %v6747_v3, 16  ;;  %v1815_v62 = vor.u32 %v1813_v57, %v1811_v46  ;;  %v1945_v1 = vrot.slane %v1943_v54, 1  ;;  %v8289_v10 = vld [vmem:[%s10525_s3 + $0xb0] sm:$0xff]  ;;  %vm4374_vm0 = vmand %vm4372_vm14, %vm4373_vm15 }
 0x11e   : > { %6723 = vmatmul.msk.bf16.gmra.mxu0 %vm1130_vm1, %v6709_v6  ;;  %v1454_v15 = vshll.u32 %v6709_v6, 16  ;;  %v890_v8 = vmax.f32 %v875_v7, 0.0  ;;  %v1027_v16 = vmax.f32 %v1012_v9, 0.0  ;;  %v1458_v34 = vshrl.u32 %v6709_v6, 16  ;;  %v8287_v7 = vld [vmem:[%s10525_s3 + $0xa0] sm:$0xff]  ;;  %2566 = vmatpush.bf16.msrb.mxu3 %v8289_v10 }
 0x11f   : > { %v1329_v20 = vrot.slane %v1327_v13, 1  ;;  %v1819_v3 = vsel %vm1292_vm2, %v1815_v62, %v1818_v63  ;;  %v1946_v5 = vsel %vm1292_vm2, %v1942_v0, %v1945_v1  ;;  %v8277_v9 = vld [vmem:[%s10525_s3 + $0x80] sm:$0xff]  ;;  %2427 = vmatpush.bf16.msrb.mxu2 %v8287_v7  ;;  %v8285_v13 = vld [vmem:[%s10525_s3 + $0x90] sm:$0xff] }
 0x120   : > { %v1456_v52 = vrot.slane %v1454_v15, 1  ;;  %v903_v22 = vpack.c.bf16 %v890_v8, %v890_v8  ;;  %v1040_v23 = vpack.c.bf16 %v1027_v16, %v1027_v16  ;;  %v8254_v11 = vld [vmem:[#allocation2 + $0x80] sm:$0xff]  ;;  %2148 = vmatpush.bf16.msrb.mxu0 %v8277_v9  ;;  %v1820_v15 = vshrl.u32 %v8253_v53, 16  ;;  %2287 = vmatpush.bf16.msrb.mxu1 %v8285_v13 }
 0x121   : > { %v1330_v24 = vsel %vm1292_vm2, %v1326_v17, %v1329_v20  ;;  %v1333_v31 = vor.u32 %v1331_v33, %v1329_v20  ;;  %v1823_v8 = vshll.u32 %v8254_v11, 16  ;;  %v1947_v17 = vshrl.u32 %v8261_v55, 16  ;;  %v8263_v33 = vld [vmem:[#allocation2 + $0xbc] sm:$0xff] }
 0x122   : > { %6778 = vmatmul.msk.bf16.gmra.mxu2 %vm1130_vm1, %v1330_v24  ;;  %v1457_v18 = vsel %vm1292_vm2, %v1453_v21, %v1456_v52  ;;  %917 = vst.msk [vmem:[#allocation2 + $0x98] sm:$0x3] %vm642_vm3, %v903_v22  ;;  %v1460_v36 = vor.u32 %v1458_v34, %v1456_v52  ;;  %v1950_v20 = vshll.u32 %v8262_v12, 16  ;;  %v1822_v52 = vor.u32 %v1820_v15, %v1818_v63 }
 0x123   : > { %6796 = vmatmul.msk.bf16.gmra.mxu3 %vm1130_vm1, %v1457_v18  ;;  %1054 = vst.msk [vmem:[#allocation2 + $0xcc] sm:$0x3] %vm642_vm3, %v1040_v23  ;;  %v876_v27 = vpop.f32.mrf.mxu2  ;;  %v1013_v28 = vpop.f32.mrf.mxu3  ;;  %v1825_v22 = vrot.slane %v1823_v8, 1  ;;  %v1949_v23 = vor.u32 %v1947_v17, %v1945_v1  ;;  %v1957_v40 = vshll.u32 %v8263_v33, 16  ;;  %vm5261_vm3 = vsmask.f32 2304 }
 0x124   : > { %v1952_v24 = vrot.slane %v1950_v20, 1 }
 0x125   : > { %v1826_v19 = vsel %vm1292_vm2, %v1822_v52, %v1825_v22  ;;  %v1959_v47 = vrot.slane %v1957_v40, 1 }
 0x126   : > { %v1953_v26 = vsel %vm1292_vm2, %v1949_v23, %v1952_v24  ;;  %v8279_v23 = vld [vmem:[#allocation2 + $0x38] sm:$0xf0] }
 0x12d   : > { %6876 = vmatmul.msk.bf16.vlgmr.msra.gmra.mxu1 %vm1130_vm1, %v8259_v30 }
 0x12e   : > { %6834 = vmatmul.msk.bf16.vlgmr.msra.gmra.mxu0 %vm1130_vm1, %v8251_v32  ;;  %v8255_v32 = vld [vmem:[#allocation2 + $0x88] sm:$0xff] }
 0x132   : > { %6779 = vmatmul.msk.bf16.gmra.mxu2 %vm1130_vm1, %v1333_v31 }
 0x133   : > { %6797 = vmatmul.msk.bf16.gmra.mxu3 %vm1130_vm1, %v1460_v36  ;;  %v1827_v36 = vshrl.u32 %v8254_v11, 16 }
 0x135   : > { %v1829_v35 = vor.u32 %v1827_v36, %v1825_v22  ;;  %v8271_v22 = vld [vmem:[#allocation2 + $0x4] sm:$0xf0] }
 0x13d   : > { %6877 = vmatmul.msk.bf16.gmra.mxu1 %vm1130_vm1, %v8260_v39  ;;  %v1954_v39 = vshrl.u32 %v8262_v12, 16 }
 0x13e   : > { %6835 = vmatmul.msk.bf16.gmra.mxu0 %vm1130_vm1, %v8252_v37  ;;  %v1830_v37 = vshll.u32 %v8255_v32, 16 }
 0x13f   : > { %v1956_v46 = vor.u32 %v1954_v39, %v1952_v24  ;;  %v9111_v24 = vld [vmem:[#allocation2 + $0x40] sm:$0xff] }
 0x140   : > { %v1832_v45 = vrot.slane %v1830_v37, 1  ;;  %v2240_v37 = vrot.slane %v9111_v24, 1 }
 0x142   : > { %6894 = vmatmul.msk.bf16.vlgmr.msra.gmra.mxu2 %vm1130_vm1, %v1812_v50  ;;  %v1833_v50 = vsel %vm1292_vm2, %v1829_v35, %v1832_v45 }
 0x143   : > { %6912 = vmatmul.msk.bf16.vlgmr.msra.gmra.mxu3 %vm1130_vm1, %v1939_v51 }
 0x148   : > { %v1257_v56 = vpop.f32.mrf.mxu1 }
 0x149   : > { %v1158_v59 = vpop.f32.mrf.mxu0 }
 0x14a   : > { %v1258_v61 = vadd.f32 %v1257_v56, %v1158_v59  ;;  %v8256_v56 = vld [vmem:[#allocation2 + $0x90] sm:$0x10]  ;;  %v8264_v59 = vld [vmem:[#allocation2 + $0xc4] sm:$0x10] }
 0x14b   : > { %v9091_v63 = vor.u32 %v8264_v59, %v6866_v58 }
 0x14d   : > { %6878 = vmatmul.msk.bf16.gmra.mxu1 %vm1130_vm1, %v8261_v55  ;;  %v6824_v55 = vld [vmem:[#allocation2 + $0x90] sm:$0xf] }
 0x14e   : > { %6836 = vmatmul.msk.bf16.gmra.mxu0 %vm1130_vm1, %v8253_v53  ;;  %v1960_v53 = vsel %vm1292_vm2, %v1956_v46, %v1959_v47  ;;  %v9089_v62 = vor.u32 %v8256_v56, %v6824_v55 }
 0x150   : > { %v1259_v2 = vpop.f32.mrf.mxu1  ;;  %v1841_v46 = vshrl.u32 %v9089_v62, 16 }
 0x151   : > { %v1160_v4 = vpop.f32.mrf.mxu0 }
 0x152   : > { %6895 = vmatmul.msk.bf16.gmra.mxu2 %vm1130_vm1, %v1819_v3  ;;  %v1260_v6 = vadd.f32 %v1259_v2, %v1160_v4  ;;  %v1834_v2 = vshrl.u32 %v8255_v32, 16  ;;  %v1837_v3 = vshll.u32 %v9089_v62, 16 }
 0x153   : > { %6913 = vmatmul.msk.bf16.gmra.mxu3 %vm1130_vm1, %v1946_v5  ;;  %v1961_v5 = vshrl.u32 %v8263_v33, 16 }
 0x154   : > { %v1839_v13 = vrot.slane %v1837_v3, 1  ;;  %v2485_v3 = vshrl.u32 %v9111_v24, 16 }
 0x156   : > { %v1843_v55 = vor.u32 %v1841_v46, %v1839_v13 }
 0x158   : > { %v1262_v14 = vpop.f32.mrf.mxu1 }
 0x159   : > { %v1163_v16 = vpop.f32.mrf.mxu0 }
 0x15a   : > { %v1263_v21 = vadd.f32 %v1262_v14, %v1163_v16  ;;  %v1963_v14 = vor.u32 %v1961_v5, %v1959_v47 }
 0x15d   : > { %6879 = vmatmul.msk.bf16.gmra.mxu1 %vm1130_vm1, %v8262_v12  ;;  %v1836_v12 = vor.u32 %v1834_v2, %v1832_v45 }
 0x15e   : > { %6837 = vmatmul.msk.bf16.gmra.mxu0 %vm1130_vm1, %v8254_v11 }
 0x15f   : > { %v1840_v17 = vsel %vm1292_vm2, %v1836_v12, %v1839_v13 }
 0x160   : > { %v1264_v18 = vpop.f32.mrf.mxu1 }
 0x161   : > { %v1165_v25 = vpop.f32.mrf.mxu0 }
 0x162   : > { %6896 = vmatmul.msk.bf16.gmra.mxu2 %vm1130_vm1, %v1826_v19  ;;  %v1265_v27 = vadd.f32 %v1264_v18, %v1165_v25  ;;  %v8308_v19 = vld [vmem:[%s10525_s3 + $0xe8] sm:$0xff] }
 0x163   : > { %6914 = vmatmul.msk.bf16.gmra.mxu3 %vm1130_vm1, %v1953_v26  ;;  %v1373_v28 = vpop.f32.mrf.mxu2  ;;  %v8298_v25 = vld [vmem:[%s10525_s3 + $0xc8] sm:$0xff]  ;;  %v8310_v26 = vld [vmem:[%s10525_s3 + $0xf8] sm:$0xff]  ;;  %2982 = vmatpush.bf16.msra.mxu2 %v8308_v19 }
 0x164   : > { %v1403_v29 = vadd.f32 %v1373_v28, %v1258_v61  ;;  %v1500_v30 = vpop.f32.mrf.mxu3  ;;  %2704 = vmatpush.bf16.msra.mxu0 %v8298_v25  ;;  %3121 = vmatpush.bf16.msra.mxu3 %v8310_v26 }
 0x166   : > { %v9077_v34 = vadd.f32 %v1500_v30, %v1403_v29  ;;  %v9122_v29 = vld [vmem:[#allocation2 + $0xc] sm:$0xff]  ;;  %v6966_v30 = vld [vmem:[#allocation2 + $0x38] sm:$0xe] }
 0x167   : > { %v2101_v40 = vrot.slane %v9122_v29, 1  ;;  %v2349_v2 = vshll.u32 %v9122_v29, 16 }
 0x168   : > { %v1267_v31 = vpop.f32.mrf.mxu1 }
 0x169   : > { %v1168_v38 = vpop.f32.mrf.mxu0 }
 0x16a   : > { %v1268_v41 = vadd.f32 %v1267_v31, %v1168_v38  ;;  %v8306_v38 = vld [vmem:[%s10525_s3 + $0xd8] sm:$0xff] }
 0x16b   : > { %v1375_v42 = vpop.f32.mrf.mxu2  ;;  %2843 = vmatpush.bf16.msra.mxu1 %v8306_v38 }
 0x16c   : > { %v1404_v43 = vadd.f32 %v1375_v42, %v1260_v6  ;;  %v1502_v44 = vpop.f32.mrf.mxu3  ;;  %v1964_v6 = vshll.u32 %v9091_v63, 16 }
 0x16d   : > { %6880 = vmatmul.msk.bf16.gmra.mxu1 %vm1130_vm1, %v8263_v33  ;;  %v6967_v33 = vor.u32 %v8279_v23, %v6966_v30 }
 0x16e   : > { %6838 = vmatmul.msk.bf16.gmra.mxu0 %vm1130_vm1, %v8255_v32  ;;  %v9081_v48 = vadd.f32 %v1502_v44, %v1404_v43  ;;  %v1966_v15 = vrot.slane %v1964_v6, 1  ;;  %v6924_v32 = vld [vmem:[#allocation2 + $0x4] sm:$0xe] }
 0x16f   : > { %v6925_v36 = vor.u32 %v8271_v22, %v6924_v32  ;;  %v2239_v42 = vrot.slane %v6967_v33, 1  ;;  %v2480_v12 = vshll.u32 %v6967_v33, 16 }
 0x170   : > { %v1269_v49 = vpop.f32.mrf.mxu1 }
 0x171   : > { %v1170_v51 = vpop.f32.mrf.mxu0  ;;  %v2100_v44 = vrot.slane %v6925_v36, 1  ;;  %v2241_v45 = vsel %vm2099_vm4, %v2239_v42, %v2240_v37  ;;  %v2338_v6 = vshrl.u32 %v6925_v36, 16  ;;  %v2482_v25 = vrot.slane %v2480_v12, 2 }
 0x172   : > { %6897 = vmatmul.msk.bf16.gmra.mxu2 %vm1130_vm1, %v1833_v50  ;;  %v9086_v57 = vadd.f32 %v1269_v49, %v1170_v51  ;;  %v1968_v51 = vshrl.u32 %v9091_v63, 16 }
 0x173   : > { %6915 = vmatmul.msk.bf16.gmra.mxu3 %vm1130_vm1, %v1960_v53  ;;  %v1378_v60 = vpop.f32.mrf.mxu2  ;;  %v2102_v50 = vsel %vm2099_vm4, %v2100_v44, %v2101_v40  ;;  %v9176_v44 = vld [vmem:[#allocation2 + $0x1c] sm:$0xff] }
 0x174   : > { %v1405_v54 = vadd.f32 %v1378_v60, %v1263_v21  ;;  %v1505_v61 = vpop.f32.mrf.mxu3  ;;  %v1967_v21 = vsel %vm1292_vm2, %v1963_v14, %v1966_v15  ;;  %v1970_v58 = vor.u32 %v1968_v51, %v1966_v15  ;;  %v2351_v14 = vrot.slane %v2349_v2, 2 }
 0x176   : > { %v9093_v0 = vadd.f32 %v1505_v61, %v1405_v54  ;;  %v9146_v54 = vld [vmem:[#allocation2 + $0x48] sm:$0xff] }
 0x178   : > { %v1272_v1 = vpop.f32.mrf.mxu1 }
 0x179   : > { %v1173_v4 = vpop.f32.mrf.mxu0 }
 0x17a   : > { %v9097_v7 = vadd.f32 %v1272_v1, %v1173_v4  ;;  %v2346_v1 = vshrl.u32 %v9122_v29, 16  ;;  %v2488_v4 = vshll.u32 %v9111_v24, 16 }
 0x17b   : > { %v1380_v9 = vpop.f32.mrf.mxu2 }
 0x17c   : > { %v1406_v10 = vadd.f32 %v1380_v9, %v1265_v27  ;;  %v1507_v11 = vpop.f32.mrf.mxu3  ;;  %v2341_v9 = vshll.u32 %v6925_v36, 16  ;;  %v2348_v13 = vrot.slane %v2346_v1, 1 }
 0x17d   : > { %6881 = vmatmul.msk.bf16.gmra.mxu1 %vm1130_vm1, %v9091_v63  ;;  %v9149_v63 = vld [vmem:[#allocation2 + $0x14] sm:$0xff] }
 0x17e   : > { %6839 = vmatmul.msk.bf16.gmra.mxu0 %vm1130_vm1, %v9089_v62  ;;  %v9103_v8 = vadd.f32 %v1507_v11, %v1406_v10  ;;  %v2242_v10 = vrot.slane %v9146_v54, 1  ;;  %v2477_v11 = vshrl.u32 %v6967_v33, 16  ;;  %v2343_v22 = vrot.slane %v2341_v9, 2 }
 0x17f   : > { %v2352_v29 = vor.u32 %v2351_v14, %v2348_v13 }
 0x180   : > { %v1274_v16 = vpop.f32.mrf.mxu1  ;;  %v2479_v19 = vrot.slane %v2477_v11, 1 }
 0x181   : > { %v1175_v20 = vpop.f32.mrf.mxu0 }
 0x182   : > { %6898 = vmatmul.msk.bf16.gmra.mxu2 %vm1130_vm1, %v1840_v17  ;;  %v9108_v52 = vadd.f32 %v1274_v16, %v1175_v20  ;;  %v2487_v16 = vrot.slane %v2485_v3, 1  ;;  %v2490_v17 = vrot.slane %v2488_v4, 2  ;;  %v2483_v36 = vor.u32 %v2482_v25, %v2479_v19  ;;  %v8297_v25 = vld [vmem:[%s10525_s3 + $0xc0] sm:$0xff] }
 0x183   : > { %6916 = vmatmul.msk.bf16.gmra.mxu3 %vm1130_vm1, %v1967_v21  ;;  %v1383_v18 = vpop.f32.mrf.mxu2  ;;  %v2340_v21 = vrot.slane %v2338_v6, 1  ;;  %2705 = vmatpush.bf16.msra.mxu0 %v8297_v25 }
 0x184   : > { %v1407_v27 = vadd.f32 %v1383_v18, %v1268_v41  ;;  %v1510_v28 = vpop.f32.mrf.mxu3  ;;  %v2243_v18 = vsel %vm2099_vm4, %v2240_v37, %v2242_v10  ;;  %v2491_v30 = vor.u32 %v2490_v17, %v2487_v16  ;;  %v9204_v16 = vld [vmem:[#allocation2 + $0x24] sm:$0xff]  ;;  %v2364_v17 = vshrl.u32 %v9176_v44, 16 }
 0x185   : > { %v2344_v33 = vor.u32 %v2343_v22, %v2340_v21 }
 0x186   : > { %v9124_v31 = vadd.f32 %v1510_v28, %v1407_v27 }
 0x187   : > { %v2353_v37 = vsel %vm2336_vm5, %v2344_v33, %v2352_v29 }
 0x188   : > { %v1277_v39 = vpop.f32.mrf.mxu1 }
 0x189   : > { %v1178_v41 = vpop.f32.mrf.mxu0 }
 0x18a   : > { %v9131_v43 = vadd.f32 %v1277_v39, %v1178_v41  ;;  %v9174_v41 = vld [vmem:[#allocation2 + $0x50] sm:$0xff] }
 0x18b   : > { %v1385_v35 = vpop.f32.mrf.mxu2  ;;  %v2506_v19 = vshll.u32 %v9174_v41, 16 }
 0x18c   : > { %v1408_v47 = vadd.f32 %v1385_v35, %v9086_v57  ;;  %v1512_v49 = vpop.f32.mrf.mxu3  ;;  %v2355_v35 = vshrl.u32 %v9149_v63, 16 }
 0x18d   : > { %6996 = vmatmul.msk.bf16.vlgmr.msrb.gmra.mxu1 %vm1130_vm1, %v2241_v45  ;;  %v2358_v45 = vshll.u32 %v9149_v63, 16 }
 0x18e   : > { %6954 = vmatmul.msk.bf16.vlgmr.msrb.gmra.mxu0 %vm1130_vm1, %v2102_v50  ;;  %v9140_v53 = vadd.f32 %v1512_v49, %v1408_v47  ;;  %v2494_v49 = vshrl.u32 %v9146_v54, 16  ;;  %v2497_v50 = vshll.u32 %v9146_v54, 16 }
 0x190   : > { %v1279_v56 = vpop.f32.mrf.mxu1 }
 0x191   : > { %v1180_v59 = vpop.f32.mrf.mxu0 }
 0x192   : > { %6899 = vmatmul.msk.bf16.gmra.mxu2 %vm1130_vm1, %v1843_v55  ;;  %v9143_v60 = vadd.f32 %v1279_v56, %v1180_v59  ;;  %v2244_v55 = vrot.slane %v9174_v41, 1  ;;  %v2105_v56 = vrot.slane %v9176_v44, 1  ;;  %v2360_v59 = vrot.slane %v2358_v45, 2 }
 0x193   : > { %6917 = vmatmul.msk.bf16.gmra.mxu3 %vm1130_vm1, %v1970_v58  ;;  %v1388_v57 = vpop.f32.mrf.mxu2  ;;  %v2357_v58 = vrot.slane %v2355_v35, 1 }
 0x194   : > { %v1409_v61 = vadd.f32 %v1388_v57, %v9097_v7  ;;  %v1515_v62 = vpop.f32.mrf.mxu3  ;;  %v2103_v7 = vrot.slane %v9149_v63, 1 }
 0x195   : > { %v2361_v54 = vor.u32 %v2360_v59, %v2357_v58 }
 0x196   : > { %v9155_v5 = vadd.f32 %v1515_v62, %v1409_v61  ;;  %v2104_v28 = vsel %vm2099_vm4, %v2101_v40, %v2103_v7  ;;  %v2496_v61 = vrot.slane %v2494_v49, 1  ;;  %v2499_v62 = vrot.slane %v2497_v50, 2 }
 0x197   : > { %v2106_v3 = vsel %vm2099_vm4, %v2103_v7, %v2105_v56 }
 0x198   : > { %v2500_v11 = vor.u32 %v2499_v62, %v2496_v61  ;;  %v6986_v61 = vld [vmem:[#allocation2 + $0x60] sm:$0xf]  ;;  %v6944_v62 = vld [vmem:[#allocation2 + $0x2c] sm:$0xf] }
 0x19a   : > { %v1282_v15 = vpop.f32.mrf.mxu1 }
 0x19b   : > { %v1183_v20 = vpop.f32.mrf.mxu0  ;;  %v1390_v24 = vpop.f32.mrf.mxu2 }
 0x19c   : > { %v9159_v23 = vadd.f32 %v1282_v15, %v1183_v20  ;;  %v1410_v26 = vadd.f32 %v1390_v24, %v9108_v52  ;;  %v1517_v27 = vpop.f32.mrf.mxu3  ;;  %v2492_v52 = vsel %vm2336_vm5, %v2483_v36, %v2491_v30  ;;  %v9202_v15 = vld [vmem:[#allocation2 + $0x58] sm:$0xff]  ;;  %v2367_v20 = vshll.u32 %v9176_v44, 16 }
 0x19d   : > { %6997 = vmatmul.msk.bf16.gmra.mxu1 %vm1130_vm1, %v2243_v18  ;;  %v2503_v18 = vshrl.u32 %v9174_v41, 16 }
 0x19e   : > { %6955 = vmatmul.msk.bf16.gmra.mxu0 %vm1130_vm1, %v2104_v28  ;;  %v9166_v32 = vadd.f32 %v1517_v27, %v1410_v26  ;;  %v8309_v26 = vld [vmem:[%s10525_s3 + $0xf0] sm:$0xff]  ;;  %v2369_v33 = vrot.slane %v2367_v20, 2 }
 0x19f   : > { %v8305_v28 = vld [vmem:[%s10525_s3 + $0xd0] sm:$0xff]  ;;  %3122 = vmatpush.bf16.msra.mxu3 %v8309_v26 }
 0x1a0   : > { %2844 = vmatpush.bf16.msra.mxu1 %v8305_v28 }
 0x1a2   : > { %v1284_v38 = vpop.f32.mrf.mxu1  ;;  %7014 = vmatmul.msk.bf16.vlgmr.msrb.gmra.mxu2 %vm1130_vm1, %v2353_v37  ;;  %v2505_v37 = vrot.slane %v2503_v18, 1 }
 0x1a3   : > { %v1185_v39 = vpop.f32.mrf.mxu0  ;;  %7032 = vmatmul.msk.bf16.vlgmr.msrb.gmra.mxu3 %vm1130_vm1, %v2492_v52 }
 0x1a4   : > { %v9172_v40 = vadd.f32 %v1284_v38, %v1185_v39  ;;  %v2508_v38 = vrot.slane %v2506_v19, 2 }
 0x1a5   : > { %v1393_v42 = vpop.f32.mrf.mxu2 }
 0x1a6   : > { %v1411_v46 = vadd.f32 %v1393_v42, %v9131_v43  ;;  %v1520_v47 = vpop.f32.mrf.mxu3  ;;  %v2245_v43 = vsel %vm2099_vm4, %v2242_v10, %v2244_v55  ;;  %v2501_v10 = vsel %vm2336_vm5, %v2491_v30, %v2500_v11  ;;  %v2366_v30 = vrot.slane %v2364_v17, 1 }
 0x1a7   : > { %v2509_v49 = vor.u32 %v2508_v38, %v2505_v37 }
 0x1a8   : > { %v9183_v51 = vadd.f32 %v1520_v47, %v1411_v46  ;;  %v2370_v35 = vor.u32 %v2369_v33, %v2366_v30 }
 0x1aa   : > { %v1756_v57 = vpop.f32.mrf.mxu1  ;;  %v2371_v58 = vsel %vm2336_vm5, %v2361_v54, %v2370_v35 }
 0x1ab   : > { %v1628_v1 = vpop.f32.mrf.mxu0 }
 0x1ac   : > { %v1658_v63 = vadd.f32 %v1628_v1, %v9077_v34  ;;  %v2362_v34 = vsel %vm2336_vm5, %v2352_v29, %v2361_v54  ;;  %v2107_v29 = vrot.slane %v9204_v16, 1 }
 0x1ad   : > { %v1395_v2 = vpop.f32.mrf.mxu2  ;;  %6998 = vmatmul.msk.bf16.gmra.mxu1 %vm1130_vm1, %v2245_v43 }
 0x1ae   : > { %v9191_v4 = vadd.f32 %v1756_v57, %v1658_v63  ;;  %v1412_v6 = vadd.f32 %v1395_v2, %v9143_v60  ;;  %v1522_v9 = vpop.f32.mrf.mxu3  ;;  %6956 = vmatmul.msk.bf16.gmra.mxu0 %vm1130_vm1, %v2106_v3  ;;  %v2108_v44 = vsel %vm2099_vm4, %v2105_v56, %v2107_v29  ;;  %v8276_v56 = vld [vmem:[#allocation2 + $0x2c] sm:$0x30]  ;;  %v2373_v2 = vshrl.u32 %v9204_v16, 16 }
 0x1af   : > { %v6945_v43 = vor.u32 %v8276_v56, %v6944_v62  ;;  %v2376_v3 = vshll.u32 %v9204_v16, 16 }
 0x1b0   : > { %v9195_v12 = vadd.f32 %v1522_v9, %v1412_v6 }
 0x1b1   : > { %v2385_v37 = vshll.u32 %v6945_v43, 16 }
 0x1b2   : > { %v1758_v13 = vpop.f32.mrf.mxu1  ;;  %7015 = vmatmul.msk.bf16.gmra.mxu2 %vm1130_vm1, %v2362_v34  ;;  %v2515_v34 = vshll.u32 %v9202_v15, 16 }
 0x1b3   : > { %v1630_v7 = vpop.f32.mrf.mxu0  ;;  %7033 = vmatmul.msk.bf16.gmra.mxu3 %vm1130_vm1, %v2501_v10 }
 0x1b4   : > { %v1659_v14 = vadd.f32 %v1630_v7, %v9081_v48  ;;  %v8307_v48 = vld [vmem:[%s10525_s3 + $0xe0] sm:$0xff]  ;;  %v2375_v7 = vrot.slane %v2373_v2, 1  ;;  %v2517_v20 = vrot.slane %v2515_v34, 2  ;;  %v7044_v2 = vld [vmem:[#allocation2 + $0x6c] sm:$0xe] }
 0x1b5   : > { %v1398_v60 = vpop.f32.mrf.mxu2  ;;  %2983 = vmatpush.bf16.msra.mxu2 %v8307_v48 }
 0x1b6   : > { %v9208_v21 = vadd.f32 %v1758_v13, %v1659_v14  ;;  %v1413_v22 = vadd.f32 %v1398_v60, %v9159_v23  ;;  %v1525_v24 = vpop.f32.mrf.mxu3  ;;  %v2246_v23 = vrot.slane %v9202_v15, 1  ;;  %v2378_v14 = vrot.slane %v2376_v3, 2  ;;  %v8291_v3 = vld [vmem:[#allocation2 + $0x6c] sm:$0xf0] }
 0x1b8   : > { %v9222_v27 = vadd.f32 %v1525_v24, %v1413_v22  ;;  %v2247_v41 = vsel %vm2099_vm4, %v2244_v55, %v2246_v23  ;;  %v2510_v55 = vsel %vm2336_vm5, %v2500_v11, %v2509_v49  ;;  %v2512_v11 = vshrl.u32 %v9202_v15, 16 }
 0x1b9   : > { %v2379_v15 = vor.u32 %v2378_v14, %v2375_v7 }
 0x1ba   : > { %v1761_v36 = vpop.f32.mrf.mxu1  ;;  %v2514_v17 = vrot.slane %v2512_v11, 1 }
 0x1bb   : > { %v1633_v52 = vpop.f32.mrf.mxu0  ;;  %v2380_v30 = vsel %vm2336_vm5, %v2370_v35, %v2379_v15 }
 0x1bc   : > { %v1660_v39 = vadd.f32 %v1633_v52, %v9093_v0  ;;  %v8284_v0 = vld [vmem:[#allocation2 + $0x60] sm:$0x30]  ;;  %v2518_v26 = vor.u32 %v2517_v20, %v2514_v17 }
 0x1bd   : > { %v1400_v42 = vpop.f32.mrf.mxu2  ;;  %6999 = vmatmul.msk.bf16.gmra.mxu1 %vm1130_vm1, %v2247_v41  ;;  %v6987_v1 = vor.u32 %v8284_v0, %v6986_v61 }
 0x1be   : > { %v1788_v45 = vadd.f32 %v1761_v36, %v1660_v39  ;;  %v1414_v46 = vadd.f32 %v1400_v42, %v9172_v40  ;;  %v1527_v47 = vpop.f32.mrf.mxu3  ;;  %6957 = vmatmul.msk.bf16.gmra.mxu0 %vm1130_vm1, %v2108_v44 }
 0x1bf   : > { %v2248_v10 = vrot.slane %v6987_v1, 1  ;;  %v2521_v41 = vshrl.u32 %v6987_v1, 16  ;;  %v2524_v42 = vshll.u32 %v6987_v1, 16  ;;  %v7086_v1 = vld [vmem:[#allocation2 + $0xa0] sm:$0xe] }
 0x1c0   : > { %v9235_v50 = vadd.f32 %v1527_v47, %v1414_v46  ;;  %v2387_v46 = vrot.slane %v2385_v37, 2 }
 0x1c1   : > { %v2249_v24 = vsel %vm2099_vm4, %v2246_v23, %v2248_v10  ;;  %v2519_v23 = vsel %vm2336_vm5, %v2509_v49, %v2518_v26  ;;  %v2526_v49 = vrot.slane %v2524_v42, 2 }
 0x1c2   : > { %v1763_v59 = vpop.f32.mrf.mxu1  ;;  %7016 = vmatmul.msk.bf16.gmra.mxu2 %vm1130_vm1, %v2371_v58  ;;  %v2523_v58 = vrot.slane %v2521_v41, 1 }
 0x1c3   : > { %v1635_v57 = vpop.f32.mrf.mxu0  ;;  %7034 = vmatmul.msk.bf16.gmra.mxu3 %vm1130_vm1, %v2510_v55 }
 0x1c4   : > { %v1661_v40 = vadd.f32 %v1635_v57, %v9103_v8  ;;  %v2109_v8 = vrot.slane %v6945_v43, 1  ;;  %v2527_v61 = vor.u32 %v2526_v49, %v2523_v58 }
 0x1c5   : > { %v1883_v63 = vpop.f32.mrf.mxu2 }
 0x1c6   : > { %v1789_v54 = vadd.f32 %v1763_v59, %v1661_v40  ;;  %v1913_v6 = vadd.f32 %v1883_v63, %v9191_v4  ;;  %v2010_v9 = vpop.f32.mrf.mxu3  ;;  %v2110_v18 = vsel %vm2099_vm4, %v2107_v29, %v2109_v8  ;;  %v8299_v63 = vld [vmem:[#allocation2 + $0xa0] sm:$0xf0] }
 0x1c7   : > { %v7087_v11 = vor.u32 %v8299_v63, %v7086_v1 }
 0x1c8   : > { %v9247_v13 = vadd.f32 %v2010_v9, %v1913_v6  ;;  %v8300_v9 = vld [vmem:[#allocation2 + $0xa8] sm:$0xff] }
 0x1c9   : > { %v2796_v20 = vrot.slane %v7087_v11, 1  ;;  %v3033_v41 = vshrl.u32 %v7087_v11, 16  ;;  %v3036_v42 = vshll.u32 %v7087_v11, 16  ;;  %v3041_v58 = vshrl.u32 %v8300_v9, 16 }
 0x1ca   : > { %v1766_v60 = vpop.f32.mrf.mxu1  ;;  %v3044_v49 = vshll.u32 %v8300_v9, 16 }
 0x1cb   : > { %v1638_v22 = vpop.f32.mrf.mxu0  ;;  %v3038_v1 = vrot.slane %v3036_v42, 2  ;;  %v3043_v63 = vrot.slane %v3041_v58, 1 }
 0x1cc   : > { %v1662_v16 = vadd.f32 %v1638_v22, %v9124_v31  ;;  %v2797_v22 = vrot.slane %v8300_v9, 1 }
 0x1cd   : > { %v1885_v4 = vpop.f32.mrf.mxu2  ;;  %7000 = vmatmul.msk.bf16.gmra.mxu1 %vm1130_vm1, %v2249_v24 }
 0x1ce   : > { %v1790_v19 = vadd.f32 %v1766_v60, %v1662_v16  ;;  %v1914_v48 = vadd.f32 %v1885_v4, %v9208_v21  ;;  %v2012_v25 = vpop.f32.mrf.mxu3  ;;  %6958 = vmatmul.msk.bf16.gmra.mxu0 %vm1130_vm1, %v2110_v18  ;;  %v2382_v21 = vshrl.u32 %v6945_v43, 16 }
 0x1d0   : > { %v9255_v28 = vadd.f32 %v2012_v25, %v1914_v48  ;;  %v2384_v35 = vrot.slane %v2382_v21, 1 }
 0x1d2   : > { %v1768_v31 = vpop.f32.mrf.mxu1  ;;  %7017 = vmatmul.msk.bf16.gmra.mxu2 %vm1130_vm1, %v2380_v30 }
 0x1d3   : > { %v1640_v29 = vpop.f32.mrf.mxu0  ;;  %7035 = vmatmul.msk.bf16.gmra.mxu3 %vm1130_vm1, %v2519_v23 }
 0x1d4   : > { %v1663_v33 = vadd.f32 %v1640_v29, %v9140_v53  ;;  %v2388_v53 = vor.u32 %v2387_v46, %v2384_v35 }
 0x1d5   : > { %v1888_v36 = vpop.f32.mrf.mxu2 }
 0x1d6   : > { %v1791_v38 = vadd.f32 %v1768_v31, %v1663_v33  ;;  %v1915_v52 = vadd.f32 %v1888_v36, %v1788_v45  ;;  %v2015_v39 = vpop.f32.mrf.mxu3  ;;  %v2389_v62 = vsel %vm2336_vm5, %v2379_v15, %v2388_v53  ;;  %v9288_v33 = vld [vmem:[#allocation2 + $0x7c] sm:$0xff]  ;;  %v9290_v36 = vld [vmem:[#allocation2 + $0xb0] sm:$0xff] }
 0x1d8   : > { %v9262_v44 = vadd.f32 %v2015_v39, %v1915_v52 }
 0x1da   : > { %v1771_v47 = vpop.f32.mrf.mxu1 }
 0x1db   : > { %v1643_v0 = vpop.f32.mrf.mxu0 }
 0x1dc   : > { %v1664_v59 = vadd.f32 %v1643_v0, %v9155_v5  ;;  %v2528_v5 = vsel %vm2336_vm5, %v2518_v26, %v2527_v61 }
 0x1dd   : > { %v1890_v55 = vpop.f32.mrf.mxu2  ;;  %7001 = vmatmul.msk.bf16.gmra.mxu1 %vm1130_vm1, %v2248_v10  ;;  %v8292_v10 = vld [vmem:[#allocation2 + $0x74] sm:$0xff] }
 0x1de   : > { %v1792_v56 = vadd.f32 %v1771_v47, %v1664_v59  ;;  %v1916_v57 = vadd.f32 %v1890_v55, %v1789_v54  ;;  %v2017_v45 = vpop.f32.mrf.mxu3  ;;  %6959 = vmatmul.msk.bf16.gmra.mxu0 %vm1130_vm1, %v2109_v8  ;;  %v7045_v8 = vor.u32 %v8291_v3, %v7044_v2  ;;  %v2658_v24 = vrot.slane %v8292_v10, 1 }
 0x1df   : > { %v2902_v52 = vshrl.u32 %v8292_v10, 16  ;;  %v2905_v39 = vshll.u32 %v8292_v10, 16  ;;  %v2799_v59 = vrot.slane %v9290_v36, 1 }
 0x1e0   : > { %v9267_v40 = vadd.f32 %v2017_v45, %v1916_v57  ;;  %v2657_v16 = vrot.slane %v7045_v8, 1  ;;  %v2894_v21 = vshrl.u32 %v7045_v8, 16  ;;  %v2897_v37 = vshll.u32 %v7045_v8, 16 }
 0x1e1   : > { %v2904_v57 = vrot.slane %v2902_v52, 1  ;;  %v2907_v45 = vrot.slane %v2905_v39, 2  ;;  %v2800_v2 = vsel %vm2099_vm4, %v2797_v22, %v2799_v59 }
 0x1e2   : > { %v1773_v43 = vpop.f32.mrf.mxu1  ;;  %7018 = vmatmul.msk.bf16.gmra.mxu2 %vm1130_vm1, %v2389_v62  ;;  %v2659_v25 = vsel %vm2099_vm4, %v2657_v16, %v2658_v24  ;;  %v2896_v55 = vrot.slane %v2894_v21, 1  ;;  %v3035_v62 = vrot.slane %v3033_v41, 1 }
 0x1e3   : > { %v1645_v6 = vpop.f32.mrf.mxu0  ;;  %7036 = vmatmul.msk.bf16.gmra.mxu3 %vm1130_vm1, %v2528_v5  ;;  %v2908_v9 = vor.u32 %v2907_v45, %v2904_v57  ;;  %v8303_v45 = vld [vmem:[#allocation2 + $0xc0] sm:$0xff] }
 0x1e4   : > { %v1665_v54 = vadd.f32 %v1645_v6, %v9166_v32  ;;  %v2798_v32 = vsel %vm2099_vm4, %v2796_v20, %v2797_v22  ;;  %v3039_v8 = vor.u32 %v3038_v1, %v3035_v62 }
 0x1e5   : > { %v1893_v34 = vpop.f32.mrf.mxu2 }
 0x1e6   : > { %v1793_v7 = vadd.f32 %v1773_v43, %v1665_v54  ;;  %v1917_v14 = vadd.f32 %v1893_v34, %v1790_v19  ;;  %v2020_v60 = vpop.f32.mrf.mxu3  ;;  %v3046_v43 = vrot.slane %v3044_v49, 2 }
 0x1e8   : > { %v9274_v17 = vadd.f32 %v2020_v60, %v1917_v14  ;;  %v3047_v14 = vor.u32 %v3046_v43, %v3043_v63 }
 0x1ea   : > { %v1776_v4 = vpop.f32.mrf.mxu1  ;;  %v3048_v22 = vsel %vm2336_vm5, %v3039_v8, %v3047_v14 }
 0x1eb   : > { %v1648_v18 = vpop.f32.mrf.mxu0 }
 0x1ec   : > { %v1666_v15 = vadd.f32 %v1648_v18, %v9183_v51  ;;  %v8294_v18 = vld [vmem:[#allocation2 + $0x84] sm:$0xff] }
 0x1ed   : > { %v1895_v48 = vpop.f32.mrf.mxu2  ;;  %7116 = vmatmul.msk.bf16.vlgmr.msra.gmra.mxu1 %vm1130_vm1, %v2798_v32  ;;  %v2914_v32 = vshll.u32 %v9288_v33, 16  ;;  %v2662_v21 = vrot.slane %v8294_v18, 1  ;;  %v2920_v62 = vshrl.u32 %v8294_v18, 16  ;;  %v2923_v1 = vshll.u32 %v8294_v18, 16 }
 0x1ee   : > { %v9280_v26 = vadd.f32 %v1776_v4, %v1666_v15  ;;  %v1918_v19 = vadd.f32 %v1895_v48, %v1791_v38  ;;  %v2022_v30 = vpop.f32.mrf.mxu3  ;;  %7074 = vmatmul.msk.bf16.vlgmr.msra.gmra.mxu0 %vm1130_vm1, %v2659_v25  ;;  %v2911_v15 = vshrl.u32 %v9288_v33, 16 }
 0x1f0   : > { %v9283_v31 = vadd.f32 %v2022_v30, %v1918_v19  ;;  %v3050_v30 = vshrl.u32 %v9290_v36, 16 }
 0x1f2   : > { %v1778_v23 = vpop.f32.mrf.mxu1  ;;  %7019 = vmatmul.msk.bf16.gmra.mxu2 %vm1130_vm1, %v2388_v53  ;;  %v2899_v53 = vrot.slane %v2897_v37, 2  ;;  %v2916_v37 = vrot.slane %v2914_v32, 2  ;;  %v3052_v52 = vrot.slane %v3050_v30, 1 }
 0x1f3   : > { %v1650_v29 = vpop.f32.mrf.mxu0  ;;  %7037 = vmatmul.msk.bf16.gmra.mxu3 %vm1130_vm1, %v2527_v61 }
 0x1f4   : > { %v1667_v51 = vadd.f32 %v1650_v29, %v9195_v12  ;;  %v2660_v12 = vrot.slane %v9288_v33, 1  ;;  %v2900_v54 = vor.u32 %v2899_v53, %v2896_v55 }
 0x1f5   : > { %v1898_v38 = vpop.f32.mrf.mxu2 }
 0x1f6   : > { %v9292_v35 = vadd.f32 %v1778_v23, %v1667_v51  ;;  %v1919_v46 = vadd.f32 %v1898_v38, %v1792_v56  ;;  %v2025_v47 = vpop.f32.mrf.mxu3  ;;  %v2661_v6 = vsel %vm2099_vm4, %v2658_v24, %v2660_v12  ;;  %v3053_v23 = vshll.u32 %v9290_v36, 16 }
 0x1f8   : > { %v9294_v0 = vadd.f32 %v2025_v47, %v1919_v46  ;;  %v3055_v39 = vrot.slane %v3053_v23, 2  ;;  %v2663_v46 = vsel %vm2099_vm4, %v2660_v12, %v2662_v21  ;;  %v7064_v23 = vld [vmem:[#allocation2 + $0x94] sm:$0xf] }
 0x1fa   : > { %v1781_v61 = vpop.f32.mrf.mxu1  ;;  %v3056_v55 = vor.u32 %v3055_v39, %v3052_v52 }
 0x1fb   : > { %v1653_v5 = vpop.f32.mrf.mxu0 }
 0x1fc   : > { %v1668_v56 = vadd.f32 %v1653_v5, %v9222_v27  ;;  %v2909_v27 = vsel %vm2336_vm5, %v2900_v54, %v2908_v9  ;;  %v3057_v12 = vsel %vm2336_vm5, %v3047_v14, %v3056_v55  ;;  %v2922_v54 = vrot.slane %v2920_v62, 1 }
 0x1fd   : > { %v1900_v3 = vpop.f32.mrf.mxu2  ;;  %7117 = vmatmul.msk.bf16.gmra.mxu1 %vm1130_vm1, %v2800_v2 }
 0x1fe   : > { %v1796_v11 = vadd.f32 %v1781_v61, %v1668_v56  ;;  %v1920_v34 = vadd.f32 %v1900_v3, %v1793_v7  ;;  %v2027_v10 = vpop.f32.mrf.mxu3  ;;  %7075 = vmatmul.msk.bf16.gmra.mxu0 %vm1130_vm1, %v2661_v6  ;;  %v8302_v7 = vld [vmem:[#allocation2 + $0xb8] sm:$0xff]  ;;  %v8295_v61 = vld [vmem:[#allocation2 + $0x8c] sm:$0xff]  ;;  %v2803_v3 = vrot.slane %v8303_v45, 1 }
 0x1ff   : > { %v2801_v51 = vrot.slane %v8302_v7, 1  ;;  %v3059_v5 = vshrl.u32 %v8302_v7, 16  ;;  %v3062_v56 = vshll.u32 %v8302_v7, 16  ;;  %v2664_v6 = vrot.slane %v8295_v61, 1 }
 0x200   : > { %v9303_v60 = vadd.f32 %v2027_v10, %v1920_v34  ;;  %v2932_v52 = vshll.u32 %v8295_v61, 16 }
 0x201   : > { %v2802_v42 = vsel %vm2099_vm4, %v2799_v59, %v2801_v51  ;;  %v3061_v10 = vrot.slane %v3059_v5, 1  ;;  %v3064_v8 = vrot.slane %v3062_v56, 2 }
 0x202   : > { %v1783_v20 = vpop.f32.mrf.mxu1  ;;  %7134 = vmatmul.msk.bf16.vlgmr.msra.gmra.mxu2 %vm1130_vm1, %v2909_v27 }
 0x203   : > { %v1655_v16 = vpop.f32.mrf.mxu0  ;;  %7152 = vmatmul.msk.bf16.vlgmr.msra.gmra.mxu3 %vm1130_vm1, %v3048_v22  ;;  %v3065_v18 = vor.u32 %v3064_v8, %v3061_v10 }
 0x204   : > { %v1669_v24 = vadd.f32 %v1655_v16, %v9235_v50  ;;  %v2913_v50 = vrot.slane %v2911_v15, 1 }
 0x205   : > { %v1903_v4 = vpop.f32.mrf.mxu2  ;;  %v3066_v30 = vsel %vm2336_vm5, %v3056_v55, %v3065_v18 }
 0x206   : > { %v1797_v48 = vadd.f32 %v1783_v20, %v1669_v24  ;;  %v1921_v25 = vadd.f32 %v1903_v4, %v9280_v26  ;;  %v2030_v19 = vpop.f32.mrf.mxu3  ;;  %v2917_v36 = vor.u32 %v2916_v37, %v2913_v50  ;;  %v2804_v20 = vsel %vm2099_vm4, %v2801_v51, %v2803_v3  ;;  %v8296_v51 = vld [vmem:[#allocation2 + $0x94] sm:$0x30] }
 0x207   : > { %v7065_v37 = vor.u32 %v8296_v51, %v7064_v23 }
 0x208   : > { %v9315_v29 = vadd.f32 %v2030_v19, %v1921_v25  ;;  %v2918_v57 = vsel %vm2336_vm5, %v2908_v9, %v2917_v36  ;;  %v2925_v9 = vrot.slane %v2923_v1, 2  ;;  %v7106_v25 = vld [vmem:[#allocation2 + $0xc8] sm:$0xf] }
 0x20a   : > { %v2289_v38 = vpop.f32.mrf.mxu1  ;;  %v2926_v16 = vor.u32 %v2925_v9, %v2922_v54  ;;  %v2938_v9 = vshrl.u32 %v7065_v37, 16 }
 0x20b   : > { %v2150_v41 = vpop.f32.mrf.mxu0 }
 0x20c   : > { %v2180_v33 = vadd.f32 %v2150_v41, %v9247_v13  ;;  %v2927_v32 = vsel %vm2336_vm5, %v2917_v36, %v2926_v16  ;;  %v2666_v36 = vrot.slane %v7065_v37, 1 }
 0x20d   : > { %v1905_v26 = vpop.f32.mrf.mxu2  ;;  %7118 = vmatmul.msk.bf16.gmra.mxu1 %vm1130_vm1, %v2802_v42  ;;  %v3071_v42 = vshll.u32 %v8303_v45, 16 }
 0x20e   : > { %v2319_v47 = vadd.f32 %v2289_v38, %v2180_v33  ;;  %v1922_v58 = vadd.f32 %v1905_v26, %v9292_v35  ;;  %v2032_v49 = vpop.f32.mrf.mxu3  ;;  %7076 = vmatmul.msk.bf16.gmra.mxu0 %vm1130_vm1, %v2663_v46  ;;  %v2929_v38 = vshrl.u32 %v8295_v61, 16  ;;  %v3068_v33 = vshrl.u32 %v8303_v45, 16 }
 0x210   : > { %v9323_v53 = vadd.f32 %v2032_v49, %v1922_v58  ;;  %v2931_v58 = vrot.slane %v2929_v38, 1  ;;  %v2934_v49 = vrot.slane %v2932_v52, 2 }
 0x212   : > { %v9326_v13 = vpop.f32.mrf.mxu1  ;;  %7135 = vmatmul.msk.bf16.gmra.mxu2 %vm1130_vm1, %v2918_v57  ;;  %v3070_v57 = vrot.slane %v3068_v33, 1  ;;  %v2935_v45 = vor.u32 %v2934_v49, %v2931_v58 }
 0x213   : > { %v9330_v59 = vpop.f32.mrf.mxu0  ;;  %7153 = vmatmul.msk.bf16.gmra.mxu3 %vm1130_vm1, %v3057_v12  ;;  %v3073_v12 = vrot.slane %v3071_v42, 2 }
 0x214   : > { %v2936_v56 = vsel %vm2336_vm5, %v2926_v16, %v2935_v45 }
 0x215   : > { %v1908_v35 = vpop.f32.mrf.mxu2  ;;  %v3074_v5 = vor.u32 %v3073_v12, %v3070_v57 }
 0x216   : > { %v1923_v63 = vadd.f32 %v1908_v35, %v1796_v11  ;;  %v2035_v43 = vpop.f32.mrf.mxu3  ;;  %v2665_v11 = vsel %vm2099_vm4, %v2662_v21, %v2664_v6 }
 0x218   : > { %v9333_v2 = vadd.f32 %v2035_v43, %v1923_v63 }
 0x21a   : > { %v2294_v34 = vpop.f32.mrf.mxu1 }
 0x21b   : > { %v2155_v14 = vpop.f32.mrf.mxu0 }
 0x21c   : > { %v2182_v27 = vadd.f32 %v2155_v14, %v9262_v44  ;;  %v8304_v44 = vld [vmem:[#allocation2 + $0xc8] sm:$0x30] }
 0x21d   : > { %v1910_v22 = vpop.f32.mrf.mxu2  ;;  %7119 = vmatmul.msk.bf16.gmra.mxu1 %vm1130_vm1, %v2804_v20 }
 0x21e   : > { %v2321_v24 = vadd.f32 %v2294_v34, %v2182_v27  ;;  %v1924_v7 = vadd.f32 %v1910_v22, %v1797_v48  ;;  %v2037_v4 = vpop.f32.mrf.mxu3  ;;  %7077 = vmatmul.msk.bf16.gmra.mxu0 %vm1130_vm1, %v2665_v11  ;;  %v7107_v48 = vor.u32 %v8304_v44, %v7106_v25  ;;  %v2941_v34 = vshll.u32 %v7065_v37, 16  ;;  %v8321_v22 = vld [vmem:[%s10527_s5 + $0x38] sm:$0xff] }
 0x21f   : > { %v2940_v11 = vrot.slane %v2938_v9, 1  ;;  %3356 = vmatpush.bf16.msrb.mxu0 %v8321_v22 }
 0x220   : > { %v9340_v15 = vadd.f32 %v2037_v4, %v1924_v7  ;;  %v2805_v46 = vrot.slane %v7107_v48, 1  ;;  %v3077_v14 = vshrl.u32 %v7107_v48, 16  ;;  %v3080_v27 = vshll.u32 %v7107_v48, 16 }
 0x221   : > { %v2943_v16 = vrot.slane %v2941_v34, 2 }
 0x222   : > { %v9343_v19 = vpop.f32.mrf.mxu1  ;;  %7136 = vmatmul.msk.bf16.gmra.mxu2 %vm1130_vm1, %v2927_v32  ;;  %v2806_v1 = vsel %vm2099_vm4, %v2803_v3, %v2805_v46  ;;  %v3079_v4 = vrot.slane %v3077_v14, 1 }
 0x223   : > { %v9347_v21 = vpop.f32.mrf.mxu0  ;;  %7154 = vmatmul.msk.bf16.gmra.mxu3 %vm1130_vm1, %v3066_v30 }
 0x225   : > { %v2429_v50 = vpop.f32.mrf.mxu2 }
 0x226   : > { %v2459_v39 = vadd.f32 %v2429_v50, %v2319_v47  ;;  %v2568_v41 = vpop.f32.mrf.mxu3  ;;  %v2667_v47 = vsel %vm2099_vm4, %v2664_v6, %v2666_v36 }
 0x228   : > { %v9350_v26 = vadd.f32 %v2568_v41, %v2459_v39 }
 0x22a   : > { %v2299_v55 = vpop.f32.mrf.mxu1 }
 0x22b   : > { %v2160_v35 = vpop.f32.mrf.mxu0 }
 0x22c   : > { %v2184_v62 = vadd.f32 %v2160_v35, %v9274_v17  ;;  %v3075_v17 = vsel %vm2336_vm5, %v3065_v18, %v3074_v5  ;;  %v3082_v18 = vrot.slane %v3080_v27, 2 }
 0x22d   : > { %v9354_v63 = vpop.f32.mrf.mxu2  ;;  %7120 = vmatmul.msk.bf16.gmra.mxu1 %vm1130_vm1, %v2806_v1 }
 0x22e   : > { %v2323_v61 = vadd.f32 %v2299_v55, %v2184_v62  ;;  %v9358_v43 = vpop.f32.mrf.mxu3  ;;  %7078 = vmatmul.msk.bf16.gmra.mxu0 %vm1130_vm1, %v2667_v47  ;;  %v3083_v51 = vor.u32 %v3082_v18, %v3079_v4  ;;  %v8320_v55 = vld [vmem:[%s10527_s5 + $0x30] sm:$0xff] }
 0x22f   : > { %3357 = vmatpush.bf16.msrb.mxu0 %v8320_v55 }
 0x230   : > { %v3084_v37 = vsel %vm2336_vm5, %v3074_v5, %v3083_v51 }
 0x232   : > { %v9362_v54 = vpop.f32.mrf.mxu1  ;;  %7137 = vmatmul.msk.bf16.gmra.mxu2 %vm1130_vm1, %v2936_v56 }
 0x233   : > { %v9366_v3 = vpop.f32.mrf.mxu0  ;;  %7155 = vmatmul.msk.bf16.gmra.mxu3 %vm1130_vm1, %v3075_v17 }
 0x235   : > { %v2434_v6 = vpop.f32.mrf.mxu2 }
 0x236   : > { %v2461_v10 = vadd.f32 %v2434_v6, %v2321_v24  ;;  %v2573_v8 = vpop.f32.mrf.mxu3  ;;  %v2944_v24 = vor.u32 %v2943_v16, %v2940_v11 }
 0x238   : > { %v9369_v20 = vadd.f32 %v2573_v8, %v2461_v10  ;;  %v2945_v48 = vsel %vm2336_vm5, %v2935_v45, %v2944_v24 }
 0x23a   : > { %v2304_v7 = vpop.f32.mrf.mxu1 }
 0x23b   : > { %v2165_v32 = vpop.f32.mrf.mxu0 }
 0x23c   : > { %v2186_v25 = vadd.f32 %v2165_v32, %v9294_v0 }
 0x23d   : > { %v9375_v44 = vpop.f32.mrf.mxu2  ;;  %7121 = vmatmul.msk.bf16.gmra.mxu1 %vm1130_vm1, %v2805_v46 }
 0x23e   : > { %v2325_v30 = vadd.f32 %v2304_v7, %v2186_v25  ;;  %v9378_v23 = vpop.f32.mrf.mxu3  ;;  %7079 = vmatmul.msk.bf16.gmra.mxu0 %vm1130_vm1, %v2666_v36 }
 0x242   : > { %v9382_v50 = vpop.f32.mrf.mxu1  ;;  %7138 = vmatmul.msk.bf16.gmra.mxu2 %vm1130_vm1, %v2945_v48  ;;  %v2181_v48 = vadd.f32 %v9330_v59, %v9255_v28  ;;  %v8315_v28 = vld [vmem:[%s10527_s5 + $0x8] sm:$0xff] }
 0x243   : > { %v9386_v0 = vpop.f32.mrf.mxu0  ;;  %7156 = vmatmul.msk.bf16.gmra.mxu3 %vm1130_vm1, %v3084_v37 }
 0x245   : > { %v2439_v38 = vpop.f32.mrf.mxu2 }
 0x246   : > { %v2463_v52 = vadd.f32 %v2439_v38, %v2323_v61  ;;  %v2578_v39 = vpop.f32.mrf.mxu3 }
 0x248   : > { %v9389_v41 = vadd.f32 %v2578_v39, %v2463_v52  ;;  %v2320_v52 = vadd.f32 %v9326_v13, %v2181_v48 }
 0x24a   : > { %v2309_v33 = vpop.f32.mrf.mxu1 }
 0x24b   : > { %v2170_v42 = vpop.f32.mrf.mxu0 }
 0x24c   : > { %v2188_v46 = vadd.f32 %v2170_v42, %v9315_v29 }
 0x24d   : > { %v9392_v36 = vpop.f32.mrf.mxu2 }
 0x24e   : > { %v2327_v58 = vadd.f32 %v2309_v33, %v2188_v46  ;;  %v9394_v49 = vpop.f32.mrf.mxu3  ;;  %v8316_v33 = vld [vmem:[%s10527_s5 + $0x10] sm:$0xff]  ;;  %v2460_v46 = vadd.f32 %v9354_v63, %v2320_v52 }
 0x24f   : > { %v8324_v52 = vld [vmem:[%s10527_s5 + $0x50] sm:$0xff] }
 0x252   : > { %v9399_v57 = vpop.f32.mrf.mxu1  ;;  %7139 = vmatmul.msk.bf16.gmra.mxu2 %vm1130_vm1, %v2944_v24 }
 0x253   : > { %v9402_v12 = vpop.f32.mrf.mxu0  ;;  %7157 = vmatmul.msk.bf16.gmra.mxu3 %vm1130_vm1, %v3083_v51  ;;  %vm5260_vm1 = vcmask 518144  }
 0x254   : > { %vm5262_vm8 = vmand %vm5260_vm1, %vm5261_vm3 }
 0x255   : > { %v2444_v35 = vpop.f32.mrf.mxu2 }
 0x256   : > { %v2465_v29 = vadd.f32 %v2444_v35, %v2325_v30  ;;  %v2583_v62 = vpop.f32.mrf.mxu3  ;;  %v8317_v30 = vld [vmem:[%s10527_s5 + $0x18] sm:$0xff]  ;;  %v2599_v35 = vadd.f32 %v9358_v43, %v2460_v46  ;;  %v8318_v43 = vld [vmem:[%s10527_s5 + $0x20] sm:$0xff] }
 0x257   : > { %3423 = vmatpush.bf16.msrb.mxu1 %v8317_v30 }
 0x258   : > { %v9405_v1 = vadd.f32 %v2583_v62, %v2465_v29 }
 0x25a   : > { %v2314_v47 = vpop.f32.mrf.mxu1 }
 0x25b   : > { %v2175_v45 = vpop.f32.mrf.mxu0  ;;  %3424 = vmatpush.bf16.msrb.mxu1 %v8316_v33 }
 0x25c   : > { %v2190_v61 = vadd.f32 %v2175_v45, %v9333_v2  ;;  %v8319_v2 = vld [vmem:[%s10527_s5 + $0x28] sm:$0xff]  ;;  %v8325_v45 = vld [vmem:[%s10527_s5 + $0x58] sm:$0xff] }
 0x25d   : > { %v9408_v5 = vpop.f32.mrf.mxu2  ;;  %3358 = vmatpush.bf16.msrb.mxu0 %v8319_v2  ;;  %3521 = vmatpush.bf16.msrb.mxu2 %v8325_v45 }
 0x25e   : > { %v2329_v56 = vadd.f32 %v2314_v47, %v2190_v61  ;;  %v9410_v17 = vpop.f32.mrf.mxu3  ;;  %v8314_v47 = vld [vmem:[%s10527_s5] sm:$0xff]  ;;  %v8332_v61 = vld [vmem:[%s10527_s5 + $0x78] sm:$0xff] }
 0x25f   : > { %3425 = vmatpush.bf16.msrb.mxu1 %v8315_v28  ;;  %3652 = vmatpush.bf16.msrb.mxu3 %v8332_v61 }
 0x261   : > { %3359 = vmatpush.bf16.msrb.mxu0 %v8318_v43  ;;  %3522 = vmatpush.bf16.msrb.mxu2 %v8324_v52 }
 0x262   : > { %v9414_v9 = vpop.f32.mrf.mxu1 }
 0x263   : > { %v9412_v6 = vpop.f32.mrf.mxu0  ;;  %3426 = vmatpush.bf16.msrb.mxu1 %v8314_v47 }
 0x265   : > { %v2449_v34 = vpop.f32.mrf.mxu2 }
 0x266   : > { %v2467_v10 = vadd.f32 %v2449_v34, %v2327_v58  ;;  %v2588_v8 = vpop.f32.mrf.mxu3 }
 0x268   : > { %v9416_v14 = vadd.f32 %v2588_v8, %v2467_v10  ;;  %v2183_v10 = vadd.f32 %v9347_v21, %v9267_v40 }
 0x26a   : > { %v2846_v22 = vpop.f32.mrf.mxu1 }
 0x26b   : > { %v2707_v27 = vpop.f32.mrf.mxu0 }
 0x26c   : > { %v2737_v39 = vadd.f32 %v2707_v27, %v9350_v26  ;;  %v9449_v26 = vld [vmem:[%s10526_s4] ss:$0 sm:$0xff] }
 0x26d   : > { %v9418_v11 = vpop.f32.mrf.mxu2 }
 0x26e   : > { %v9420_v16 = vpop.f32.mrf.mxu3  ;;  %v2876_v59 = vadd.f32 %v2846_v22, %v2737_v39 }
 0x272   : > { %v2848_v25 = vpop.f32.mrf.mxu1 }
 0x273   : > { %v2709_v7 = vpop.f32.mrf.mxu0 }
 0x274   : > { %v2738_v62 = vadd.f32 %v2709_v7, %v2599_v35 }
 0x275   : > { %v2454_v4 = vpop.f32.mrf.mxu2 }
 0x276   : > { %v2469_v18 = vadd.f32 %v2454_v4, %v2329_v56  ;;  %v2593_v32 = vpop.f32.mrf.mxu3  ;;  %v2877_v8 = vadd.f32 %v2848_v25, %v2738_v62 }
 0x278   : > { %v9425_v24 = vadd.f32 %v2593_v32, %v2469_v18  ;;  %v2322_v32 = vadd.f32 %v9343_v19, %v2183_v10 }
 0x27a   : > { %v2851_v42 = vpop.f32.mrf.mxu1  ;;  %v2462_v40 = vadd.f32 %v9375_v44, %v2322_v32  ;;  %v8323_v44 = vld [vmem:[%s10527_s5 + $0x48] sm:$0xff] }
 0x27b   : > { %v2712_v51 = vpop.f32.mrf.mxu0  ;;  %3523 = vmatpush.bf16.msrb.mxu2 %v8323_v44 }
 0x27c   : > { %v2739_v30 = vadd.f32 %v2712_v51, %v9369_v20  ;;  %v2601_v19 = vadd.f32 %v9378_v23, %v2462_v40  ;;  %v8322_v23 = vld [vmem:[%s10527_s5 + $0x40] sm:$0xff] }
 0x27d   : > { %v9432_v37 = vpop.f32.mrf.mxu2 }
 0x27e   : > { %v9434_v38 = vpop.f32.mrf.mxu3  ;;  %v2878_v25 = vadd.f32 %v2851_v42, %v2739_v30  ;;  %v8331_v42 = vld [vmem:[%s10527_s5 + $0x70] sm:$0xff] }
 0x27f   : > { %3653 = vmatpush.bf16.msrb.mxu3 %v8331_v42  ;;  %3524 = vmatpush.bf16.msrb.mxu2 %v8322_v23 }
 0x282   : > { %v2853_v34 = vpop.f32.mrf.mxu1 }
 0x283   : > { %v2714_v58 = vpop.f32.mrf.mxu0 }
 0x285   : > { %v2985_v55 = vpop.f32.mrf.mxu2 }
 0x286   : > { %v3015_v13 = vadd.f32 %v2985_v55, %v2876_v59  ;;  %v3124_v29 = vpop.f32.mrf.mxu3  ;;  %v2740_v59 = vadd.f32 %v2714_v58, %v2601_v19  ;;  %v2185_v58 = vadd.f32 %v9366_v3, %v9283_v31  ;;  %v8330_v31 = vld [vmem:[%s10527_s5 + $0x68] sm:$0xff]  ;;  %v8336_v3 = vld [vmem:[%s10527_s5 + $0x98] sm:$0xff] }
 0x287   : > { %3654 = vmatpush.bf16.msrb.mxu3 %v8330_v31  ;;  %3786 = vmatpush.bf16.msra.mxu0 %v8336_v3 }
 0x288   : > { %v3154_v63 = vadd.f32 %v3124_v29, %v3015_v13  ;;  %v2879_v29 = vadd.f32 %v2853_v34, %v2740_v59  ;;  %v2324_v10 = vadd.f32 %v9362_v54, %v2185_v58 }
 0x28a   : > { %v3170_v56 = vadd.f32 %v9449_v26, %v3154_v63  ;;  %v2856_v33 = vpop.f32.mrf.mxu1  ;;  %v2464_v34 = vadd.f32 %v9392_v36, %v2324_v10 }
 0x28b   : > { %v2717_v7 = vpop.f32.mrf.mxu0 }
 0x28c   : > { %v3182_v27 = vmax.f32 %v3170_v56, 0.0 }
 0x28d   : > { %v2987_v22 = vpop.f32.mrf.mxu2 }
 0x28e   : > { %v3194_v2 = vpack.c.bf16 %v3182_v27, %v3182_v27  ;;  %v3016_v4 = vadd.f32 %v2987_v22, %v2877_v8  ;;  %v3126_v18 = vpop.f32.mrf.mxu3  ;;  %v2741_v8 = vadd.f32 %v2717_v7, %v9389_v41  ;;  %v8329_v41 = vld [vmem:[%s10527_s5 + $0x60] sm:$0xff] }
 0x28f   : > { %3655 = vmatpush.bf16.msrb.mxu3 %v8329_v41 }
 0x290   : > { %3207 = vst.msk [vmem:[#allocation3] sm:$0xf] %vm3206_vm6, %v3194_v2  ;;  %v3155_v48 = vadd.f32 %v3126_v18, %v3016_v4  ;;  %v2880_v2 = vadd.f32 %v2856_v33, %v2741_v8  ;;  %v2603_v18 = vadd.f32 %v9394_v49, %v2464_v34  ;;  %v2187_v33 = vadd.f32 %v9386_v0, %v9303_v60 }
 0x292   : > { %v3171_v21 = vadd.f32 %v9449_v26, %v3155_v48  ;;  %v2858_v61 = vpop.f32.mrf.mxu1  ;;  %v2326_v23 = vadd.f32 %v9382_v50, %v2187_v33 }
 0x293   : > { %v2719_v55 = vpop.f32.mrf.mxu0 }
 0x294   : > { %v3183_v39 = vmax.f32 %v3171_v21, 0.0  ;;  %v2742_v52 = vadd.f32 %v2719_v55, %v2603_v18 }
 0x295   : > { %v2990_v46 = vpop.f32.mrf.mxu2 }
 0x296   : > { %v3195_v28 = vpack.c.bf16 %v3183_v39, %v3183_v39  ;;  %v3017_v20 = vadd.f32 %v2990_v46, %v2878_v25  ;;  %v3129_v51 = vpop.f32.mrf.mxu3  ;;  %v2881_v46 = vadd.f32 %v2858_v61, %v2742_v52 }
 0x297   : > { %v8495_v49 = vld [vmem:[#allocation3] sm:$0xe] }
 0x298   : > { %3208 = vst.msk [vmem:[#allocation3 + $0x4] sm:$0xf] %vm3206_vm6, %v3195_v28  ;;  %v3156_v35 = vadd.f32 %v3129_v51, %v3017_v20 }
 0x29a   : > { %v3172_v13 = vadd.f32 %v9449_v26, %v3156_v35  ;;  %v2861_v40 = vpop.f32.mrf.mxu1 }
 0x29b   : > { %v2722_v22 = vpop.f32.mrf.mxu0 }
 0x29c   : > { %v3184_v62 = vmax.f32 %v3172_v13, 0.0  ;;  %v2743_v58 = vadd.f32 %v2722_v22, %v9405_v1  ;;  %v2466_v1 = vadd.f32 %v9408_v5, %v2326_v23 }
 0x29d   : > { %v2992_v63 = vpop.f32.mrf.mxu2 }
 0x29e   : > { %v3196_v47 = vpack.c.bf16 %v3184_v62, %v3184_v62  ;;  %v3018_v45 = vadd.f32 %v2992_v63, %v2879_v29  ;;  %v3131_v43 = vpop.f32.mrf.mxu3  ;;  %v8335_v62 = vld [vmem:[%s10527_s5 + $0x90] sm:$0xff]  ;;  %v2882_v31 = vadd.f32 %v2861_v40, %v2743_v58  ;;  %v2605_v5 = vadd.f32 %v9410_v17, %v2466_v1 }
 0x29f   : > { %v8483_v56 = vld [vmem:[#allocation3] sm:$0xff]   ;;  %3787 = vmatpush.bf16.msra.mxu0 %v8335_v62  ;;  %v2189_v17 = vadd.f32 %v9402_v12, %v9323_v53 }
 0x2a0   : > { %3209 = vst.msk [vmem:[#allocation3 + $0x8] sm:$0xf] %vm3206_vm6, %v3196_v47  ;;  %v3157_v27 = vadd.f32 %v3131_v43, %v3018_v45  ;;  %7215 = vmatmul.msk.bf16.vlgmr.msrb.gmra.mxu1 %vm3336_vm7, %v8483_v56  ;;  %v8494_v25 = vld [vmem:[#allocation3] sm:$0xf0]  ;;  %v3276_v39 = vshll.u32 %v8483_v56, 16  ;;  %v3274_v29 = vshrl.u32 %v8483_v56, 16 }
 0x2a1   : > { %v8496_v51 = vor.u32 %v8495_v49, %v8494_v25  ;;  %v3559_v0 = vld [vmem:[#allocation3 + $0x4] sm:$0xe]  ;;  %v2328_v49 = vadd.f32 %v9399_v57, %v2189_v17 }
 0x2a2   : > { %v3173_v54 = vadd.f32 %v9449_v26, %v3157_v27  ;;  %v3278_v42 = vrot.slane %v3276_v39, 1  ;;  %v2863_v56 = vpop.f32.mrf.mxu1  ;;  %v3586_v27 = vunpack.c.l.b16 %v3559_v0 }
 0x2a3   : > { %v2724_v19 = vpop.f32.mrf.mxu0  ;;  %v3469_v63 = vrot.slane %v8496_v51, 1 }
 0x2a4   : > { %v3185_v7 = vmax.f32 %v3173_v54, 0.0  ;;  %v3279_v61 = vor.u32 %v3278_v42, %v3274_v29  ;;  %v2468_v42 = vadd.f32 %v9418_v11, %v2328_v49 }
 0x2a5   : > { %v2995_v4 = vpop.f32.mrf.mxu2 }
 0x2a6   : > { %v3197_v32 = vpack.c.bf16 %v3185_v7, %v3185_v7  ;;  %v3019_v30 = vadd.f32 %v2995_v4, %v2880_v2  ;;  %v3134_v48 = vpop.f32.mrf.mxu3 }
 0x2a7   : > { %v9508_v44 = vld [vmem:[#allocation3 + $0x8] sm:$0xf] }
 0x2a8   : > { %3210 = vst.msk [vmem:[#allocation3 + $0xc] sm:$0xf] %vm3206_vm6, %v3197_v32  ;;  %v3158_v36 = vadd.f32 %v3134_v48, %v3019_v30  ;;  %v3587_v50 = vunpack.c.l.b16 %v9508_v44  ;;  %v2744_v32 = vadd.f32 %v2724_v19, %v2605_v5 }
 0x2aa   : > { %v3174_v21 = vadd.f32 %v9449_v26, %v3158_v36  ;;  %v3595_v54 = vpack.c.b16 %v3587_v50, %v3586_v27  ;;  %v2866_v39 = vpop.f32.mrf.mxu1 }
 0x2ab   : > { %v2727_v41 = vpop.f32.mrf.mxu0 }
 0x2ac   : > { %v3186_v28 = vmax.f32 %v3174_v21, 0.0  ;;  %v3600_v48 = vrot.slane %v3595_v54, 1  ;;  %v2883_v21 = vadd.f32 %v2863_v56, %v2744_v32  ;;  %v3700_v51 = vshrl.u32 %v3595_v54, 16 }
 0x2ad   : > { %v2997_v20 = vpop.f32.mrf.mxu2 }
 0x2ae   : > { %v3198_v59 = vpack.c.bf16 %v3186_v28, %v3186_v28  ;;  %v3020_v35 = vadd.f32 %v2997_v20, %v2881_v46  ;;  %v3136_v55 = vpop.f32.mrf.mxu3  ;;  %v3702_v11 = vrot.slane %v3700_v51, 1 }
 0x2af   : > { %v9510_v13 = vld [vmem:[#allocation3 + $0x8] sm:$0xff] }
 0x2b0   : > { %3211 = vst.msk [vmem:[#allocation3 + $0x10] sm:$0xf] %vm3206_vm6, %v3198_v59  ;;  %v3159_v60 = vadd.f32 %v3136_v55, %v3020_v35  ;;  %7216 = vmatmul.msk.bf16.gmra.mxu1 %vm3336_vm7, %v9510_v13  ;;  %v3470_v47 = vrot.slane %v9510_v13, 1  ;;  %v3281_v45 = vshll.u32 %v9510_v13, 16  ;;  %v3703_v59 = vshll.u32 %v3595_v54, 16 }
 0x2b1   : > { %v2745_v35 = vadd.f32 %v2727_v41, %v9416_v14  ;;  %v3285_v55 = vshrl.u32 %v9510_v13, 16 }
 0x2b2   : > { %v3175_v43 = vadd.f32 %v9449_v26, %v3159_v60  ;;  %v3471_v10 = vsel %vm2099_vm4, %v3469_v63, %v3470_v47  ;;  %v3283_v8 = vrot.slane %v3281_v45, 1  ;;  %v3705_v62 = vrot.slane %v3703_v59, 2 }
 0x2b3   : > { %7244 = vmatmul.msk.bf16.vlgmr.msrb.gmra.mxu2 %vm3336_vm7, %v3471_v10  ;;  %v2729_v53 = vpop.f32.mrf.mxu0  ;;  %v2884_v63 = vadd.f32 %v2866_v39, %v2745_v35  ;;  %v2607_v10 = vadd.f32 %v9420_v16, %v2468_v42  ;;  %v8334_v16 = vld [vmem:[%s10527_s5 + $0x88] sm:$0xff]  ;;  %v8333_v35 = vld [vmem:[%s10527_s5 + $0x80] sm:$0xff] }
 0x2b4   : > { %v3187_v3 = vmax.f32 %v3175_v43, 0.0  ;;  %v3284_v22 = vsel %vm1292_vm2, %v3279_v61, %v3283_v8  ;;  %v3287_v29 = vor.u32 %v3285_v55, %v3283_v8  ;;  %3788 = vmatpush.bf16.msra.mxu0 %v8334_v16 }
 0x2b5   : > { %v3000_v34 = vpop.f32.mrf.mxu2  ;;  %7194 = vmatmul.msk.bf16.vlgmr.msrb.gmra.mxu0 %vm3336_vm7, %v3284_v22  ;;  %v2746_v54 = vadd.f32 %v2729_v53, %v2607_v10 }
 0x2b6   : > { %v3199_v2 = vpack.c.bf16 %v3187_v3, %v3187_v3  ;;  %v3021_v7 = vadd.f32 %v3000_v34, %v2882_v31  ;;  %v3139_v4 = vpop.f32.mrf.mxu3  ;;  %v3706_v34 = vor.u32 %v3705_v62, %v3702_v11 }
 0x2b7   : > { %v9532_v18 = vld [vmem:[#allocation3 + $0xc] sm:$0xff] }
 0x2b8   : > { %3212 = vst.msk [vmem:[#allocation3 + $0x14] sm:$0xf] %vm3206_vm6, %v3199_v2  ;;  %v3160_v30 = vadd.f32 %v3139_v4, %v3021_v7  ;;  %v3601_v52 = vrot.slane %v9532_v18, 1  ;;  %v3708_v14 = vshrl.u32 %v9532_v18, 16  ;;  %v3711_v60 = vshll.u32 %v9532_v18, 16  ;;  %v8340_v2 = vld [vmem:[%s10527_s5 + $0xb8] sm:$0xff]  ;;  %3789 = vmatpush.bf16.msra.mxu0 %v8333_v35 }
 0x2b9   : > { %3894 = vmatpush.bf16.msra.mxu1 %v8340_v2 }
 0x2ba   : > { %v3176_v36 = vadd.f32 %v9449_v26, %v3160_v30  ;;  %v3602_v40 = vsel %vm2099_vm4, %v3600_v48, %v3601_v52  ;;  %v3710_v1 = vrot.slane %v3708_v14, 1  ;;  %v3713_v56 = vrot.slane %v3711_v60, 2 }
 0x2bb   : > { %7285 = vmatmul.msk.bf16.vlgmr.msrb.gmra.mxu3 %vm3336_vm7, %v3602_v40  ;;  %v2732_v4 = vpop.f32.mrf.mxu0  ;;  %v2191_v30 = vadd.f32 %v9412_v6, %v9340_v15 }
 0x2bc   : > { %v3188_v25 = vmax.f32 %v3176_v36, 0.0  ;;  %v9564_v22 = vor.u32 %v3713_v56, %v3710_v1  ;;  %v8339_v36 = vld [vmem:[%s10527_s5 + $0xb0] sm:$0xff] }
 0x2bd   : > { %v3002_v33 = vpop.f32.mrf.mxu2  ;;  %v2330_v15 = vadd.f32 %v9414_v9, %v2191_v30  ;;  %3895 = vmatpush.bf16.msra.mxu1 %v8339_v36  ;;  %v8347_v1 = vld [vmem:[%s10527_s5 + $0xd0] sm:$0xff] }
 0x2be   : > { %v3200_v46 = vpack.c.bf16 %v3188_v25, %v3188_v25  ;;  %v3022_v19 = vadd.f32 %v3002_v33, %v2883_v21  ;;  %v3141_v28 = vpop.f32.mrf.mxu3  ;;  %v9576_v7 = vsel %vm2336_vm5, %v3706_v34, %v9564_v22 }
 0x2bf   : > { %v9542_v20 = vld [vmem:[#allocation3 + $0x10] sm:$0xff] }
 0x2c0   : > { %3213 = vst.msk [vmem:[#allocation3 + $0x18] sm:$0xf] %vm3206_vm6, %v3200_v46  ;;  %v3161_v12 = vadd.f32 %v3141_v28, %v3022_v19  ;;  %7217 = vmatmul.msk.bf16.gmra.mxu1 %vm3336_vm7, %v9542_v20  ;;  %v3472_v23 = vrot.slane %v9542_v20, 1  ;;  %v3289_v57 = vshll.u32 %v9542_v20, 16  ;;  %v2747_v46 = vadd.f32 %v2732_v4, %v9425_v24 }
 0x2c1   : > { %v2470_v28 = vadd.f32 %v9432_v37, %v2330_v15  ;;  %v3293_v51 = vshrl.u32 %v9542_v20, 16  ;;  %v8348_v20 = vld [vmem:[%s10527_s5 + $0xd8] sm:$0xff] }
 0x2c2   : > { %v3177_v58 = vadd.f32 %v9449_v26, %v3161_v12  ;;  %v3473_v13 = vsel %vm2099_vm4, %v3470_v47, %v3472_v23  ;;  %v3291_v0 = vrot.slane %v3289_v57, 1  ;;  %v2868_v47 = vpop.f32.mrf.mxu1  ;;  %v8337_v57 = vld [vmem:[%s10527_s5 + $0xa0] sm:$0xff]  ;;  %4025 = vmatpush.bf16.msra.mxu2 %v8348_v20 }
 0x2c3   : > { %7245 = vmatmul.msk.bf16.gmra.mxu2 %vm3336_vm7, %v3473_v13  ;;  %v2885_v17 = vadd.f32 %v2868_v47, %v2746_v54  ;;  %v2609_v13 = vadd.f32 %v9434_v38, %v2470_v28  ;;  %v8351_v28 = vld [vmem:[%s10527_s5 + $0xf0] sm:$0xff] }
 0x2c4   : > { %v3189_v45 = vmax.f32 %v3177_v58, 0.0  ;;  %v3292_v61 = vsel %vm1292_vm2, %v3287_v29, %v3291_v0  ;;  %v3295_v55 = vor.u32 %v3293_v51, %v3291_v0  ;;  %v2734_v29 = vpop.f32.mrf.mxu0 }
 0x2c5   : > { %v3005_v43 = vpop.f32.mrf.mxu2  ;;  %7195 = vmatmul.msk.bf16.gmra.mxu0 %vm3336_vm7, %v3292_v61  ;;  %v2748_v61 = vadd.f32 %v2734_v29, %v2609_v13 }
 0x2c6   : > { %v3201_v8 = vpack.c.bf16 %v3189_v45, %v3189_v45  ;;  %v3023_v27 = vadd.f32 %v3005_v43, %v2884_v63  ;;  %v3144_v31 = vpop.f32.mrf.mxu3  ;;  %4026 = vmatpush.bf16.msra.mxu2 %v8347_v1 }
 0x2c7   : > { %v9562_v3 = vld [vmem:[#allocation3 + $0x14] sm:$0xff] }
 0x2c8   : > { %3214 = vst.msk [vmem:[#allocation3 + $0x1c] sm:$0xf] %vm3206_vm6, %v3201_v8  ;;  %v3162_v5 = vadd.f32 %v3144_v31, %v3023_v27  ;;  %v3603_v41 = vrot.slane %v9562_v3, 1  ;;  %v3717_v53 = vshrl.u32 %v9562_v3, 16  ;;  %v3720_v37 = vshll.u32 %v9562_v3, 16 }
 0x2ca   : > { %v3178_v32 = vadd.f32 %v9449_v26, %v3162_v5  ;;  %v3604_v48 = vsel %vm2099_vm4, %v3601_v52, %v3603_v41  ;;  %v8338_v52 = vld [vmem:[%s10527_s5 + $0xa8] sm:$0xff]  ;;  %v2871_v49 = vpop.f32.mrf.mxu1  ;;  %v3719_v60 = vrot.slane %v3717_v53, 1 }
 0x2cb   : > { %7286 = vmatmul.msk.bf16.gmra.mxu3 %vm3336_vm7, %v3604_v48  ;;  %3896 = vmatpush.bf16.msra.mxu1 %v8338_v52  ;;  %v2886_v58 = vadd.f32 %v2871_v49, %v2747_v46  ;;  %v8352_v48 = vld [vmem:[%s10527_s5 + $0xf8] sm:$0xff] }
 0x2cc   : > { %v3190_v40 = vmax.f32 %v3178_v32, 0.0  ;;  %4160 = vmatpush.bf16.msra.mxu3 %v8352_v48 }
 0x2cd   : > { %v3007_v21 = vpop.f32.mrf.mxu2 }
 0x2ce   : > { %v3202_v25 = vpack.c.bf16 %v3190_v40, %v3190_v40  ;;  %v3024_v39 = vadd.f32 %v3007_v21, %v2885_v17  ;;  %v3146_v33 = vpop.f32.mrf.mxu3 }
 0x2cf   : > { %v9589_v6 = vld [vmem:[#allocation3 + $0x18] sm:$0xff]  ;;  %3897 = vmatpush.bf16.msra.mxu1 %v8337_v57 }
 0x2d0   : > { %3215 = vst.msk [vmem:[#allocation3 + $0x20] sm:$0xf] %vm3206_vm6, %v3202_v25  ;;  %v3163_v19 = vadd.f32 %v3146_v33, %v3024_v39  ;;  %7218 = vmatmul.msk.bf16.gmra.mxu1 %vm3336_vm7, %v9589_v6  ;;  %v3474_v9 = vrot.slane %v9589_v6, 1  ;;  %v3297_v59 = vshll.u32 %v9589_v6, 16  ;;  %v3301_v52 = vshrl.u32 %v9589_v6, 16  ;;  %4161 = vmatpush.bf16.msra.mxu3 %v8351_v28 }
 0x2d2   : > { %v3179_v24 = vadd.f32 %v9449_v26, %v3163_v19  ;;  %v3475_v12 = vsel %vm2099_vm4, %v3472_v23, %v3474_v9  ;;  %v9613_v42 = vrot.slane %v3297_v59, 1  ;;  %v3722_v23 = vrot.slane %v3720_v37, 2  ;;  %v2873_v16 = vpop.f32.mrf.mxu1  ;;  %v8345_v19 = vld [vmem:[%s10527_s5 + $0xc0] sm:$0xff] }
 0x2d3   : > { %7246 = vmatmul.msk.bf16.gmra.mxu2 %vm3336_vm7, %v3475_v12  ;;  %v2887_v32 = vadd.f32 %v2873_v16, %v2748_v61 }
 0x2d4   : > { %v3191_v14 = vmax.f32 %v3179_v24, 0.0  ;;  %v3300_v11 = vsel %vm1292_vm2, %v3295_v55, %v9613_v42  ;;  %v9629_v43 = vor.u32 %v3722_v23, %v3719_v60  ;;  %v3303_v35 = vor.u32 %v3301_v52, %v9613_v42  ;;  %v3221_v55 = vld [vmem:[#allocation3 + $0x2c] sm:$0x1]  ;;  %v8359_v52 = vld [vmem:[%s10527_s5 + $0x108] sm:$0xff] }
 0x2d5   : > { %v3010_v0 = vpop.f32.mrf.mxu2  ;;  %7196 = vmatmul.msk.bf16.gmra.mxu0 %vm3336_vm7, %v3300_v11 }
 0x2d6   : > { %v3203_v62 = vpack.c.bf16 %v3191_v14, %v3191_v14  ;;  %v3025_v63 = vadd.f32 %v3010_v0, %v2886_v58  ;;  %v3149_v45 = vpop.f32.mrf.mxu3  ;;  %v9637_v47 = vsel %vm2336_vm5, %v9564_v22, %v9629_v43  ;;  %v8346_v22 = vld [vmem:[%s10527_s5 + $0xc8] sm:$0xff]  ;;  %v8361_v58 = vld [vmem:[%s10527_s5 + $0x118] sm:$0xff]  ;;  %v8349_v14 = vld [vmem:[%s10527_s5 + $0xe0] sm:$0xff] }
 0x2d7   : > { %v9631_v56 = vld [vmem:[#allocation3 + $0x1c] sm:$0xff]  ;;  %4027 = vmatpush.bf16.msra.mxu2 %v8346_v22  ;;  %4295 = vmatpush.bf16.msrb.mxu0 %v8361_v58  ;;  %v8358_v58 = vld [vmem:[%s10527_s5 + $0x100] sm:$0xff] }
 0x2d8   : > { %v3232_v38 = vld [vmem:[#allocation3 + $0x20] sm:$0x3]  ;;  %3216 = vst.msk [vmem:[#allocation3 + $0x24] sm:$0xf] %vm3206_vm6, %v3203_v62  ;;  %v3164_v8 = vadd.f32 %v3149_v45, %v3025_v63  ;;  %v3605_v34 = vrot.slane %v9631_v56, 1  ;;  %v3726_v51 = vshrl.u32 %v9631_v56, 16 }
 0x2d9   : > { %v3453_v10 = vld [vmem:[#allocation3 + $0x20] sm:$0x7]  ;;  %v3267_v27 = vunpack.c.l.b16 %v3232_v38  ;;  %v3729_v53 = vshll.u32 %v9631_v56, 16  ;;  %v3843_v62 = vrot.slane %v9532_v18, 2 }
 0x2da   : > { %v3466_v31 = vunpack.c.l.b16 %v3453_v10  ;;  %v3180_v54 = vadd.f32 %v9449_v26, %v3164_v8  ;;  %v3606_v2 = vsel %vm2099_vm4, %v3603_v41, %v3605_v34  ;;  %v3728_v12 = vrot.slane %v3726_v51, 1  ;;  %v8360_v8 = vld [vmem:[%s10527_s5 + $0x110] sm:$0xff] }
 0x2db   : > { %v9641_v5 = vpack.c.b16 %v3267_v27, %v3267_v27  ;;  %7287 = vmatmul.msk.bf16.gmra.mxu3 %vm3336_vm7, %v3606_v2  ;;  %4028 = vmatpush.bf16.msra.mxu2 %v8345_v19  ;;  %v3731_v57 = vrot.slane %v3729_v53, 2  ;;  %v8341_v27 = vld [vmem:[#allocation3 + $0x8] sm:$0xf0] }
 0x2dc   : > { %v9646_v4 = vpack.c.b16 %v3466_v31, %v3466_v31  ;;  %v3192_v30 = vmax.f32 %v3180_v54, 0.0  ;;  %4296 = vmatpush.bf16.msrb.mxu0 %v8360_v8  ;;  %v8342_v31 = vld [vmem:[#allocation3 + $0x10] sm:$0xff]  ;;  %v7358_v54 = vld [vmem:[#allocation3 + $0x8] sm:$0xc] }
 0x2dd   : > { %v3012_v36 = vpop.f32.mrf.mxu2  ;;  %v3305_v17 = vshll.u32 %v9641_v5, 16  ;;  %v3732_v20 = vor.u32 %v3731_v57, %v3728_v12  ;;  %v3309_v44 = vshrl.u32 %v9641_v5, 16  ;;  %v3974_v16 = vrot.slane %v8342_v31, 2 }
 0x2de   : > { %v3204_v40 = vpack.c.bf16 %v3192_v30, %v3192_v30  ;;  %v3026_v21 = vadd.f32 %v3012_v36, %v2887_v32  ;;  %v3151_v41 = vpop.f32.mrf.mxu3  ;;  %v3476_v25 = vrot.slane %v9646_v4, 1  ;;  %v4082_v2 = vshrl.u32 %v8342_v31, 16 }
 0x2df   : > { %v3567_v39 = vld [vmem:[#allocation3 + $0x24] sm:$0x7]  ;;  %v3307_v46 = vrot.slane %v3305_v17, 1  ;;  %v9688_v13 = vsel %vm2336_vm5, %v9629_v43, %v3732_v20  ;;  %v4085_v4 = vshll.u32 %v8342_v31, 16 }
 0x2e0   : > { %3217 = vst.msk [vmem:[#allocation3 + $0x28] sm:$0xf] %vm3206_vm6, %v3204_v40  ;;  %v3165_v33 = vadd.f32 %v3151_v41, %v3026_v21  ;;  %v3594_v15 = vunpack.c.l.b16 %v3567_v39  ;;  %7219 = vmatmul.msk.bf16.gmra.mxu1 %vm3336_vm7, %v9641_v5  ;;  %v3477_v59 = vsel %vm2099_vm4, %v3474_v9, %v3476_v25  ;;  %v3824_v9 = vld [vmem:[#allocation3 + $0x4] sm:$0xc]  ;;  %v7359_v5 = vor.u32 %v8341_v27, %v7358_v54 }
 0x2e1   : > { %v3308_v6 = vsel %vm1292_vm2, %v3303_v35, %v3307_v46  ;;  %v3837_v23 = vunpack.c.l.b16 %v3824_v9  ;;  %v3311_v18 = vor.u32 %v3309_v44, %v3307_v46  ;;  %v4084_v17 = vrot.slane %v4082_v2, 2  ;;  %4297 = vmatpush.bf16.msrb.mxu0 %v8359_v52 }
 0x2e2   : > { %v3181_v49 = vadd.f32 %v9449_v26, %v3165_v33  ;;  %v3599_v24 = vpack.c.b16 %v3594_v15, %v3594_v15  ;;  %v8350_v26 = vld [vmem:[%s10527_s5 + $0xe8] sm:$0xff]  ;;  %v3973_v30 = vrot.slane %v7359_v5, 2  ;;  %v4074_v22 = vshrl.u32 %v7359_v5, 16 }
 0x2e3   : > { %7247 = vmatmul.msk.bf16.gmra.mxu2 %vm3336_vm7, %v3477_v59  ;;  %4162 = vmatpush.bf16.msra.mxu3 %v8350_v26  ;;  %v3839_v0 = vpack.c.b16 %v3587_v50, %v3837_v23  ;;  %v4077_v48 = vshll.u32 %v7359_v5, 16  ;;  %v4087_v40 = vrot.slane %v4085_v4, 3  ;;  %v8343_v33 = vld [vmem:[#allocation3 + $0x18] sm:$0xff]  ;;  %v3847_v15 = vrot.slane %v9631_v56, 2  ;;  %v8344_v26 = vld [vmem:[#allocation3 + $0x20] sm:$0xff] }
 0x2e4   : > { %v3193_v37 = vmax.f32 %v3181_v49, 0.0  ;;  %v3607_v29 = vrot.slane %v3599_v24, 1  ;;  %v3735_v63 = vshrl.u32 %v3599_v24, 16  ;;  %v3738_v45 = vshll.u32 %v3599_v24, 16 }
 0x2e5   : > { %7197 = vmatmul.msk.bf16.gmra.mxu0 %vm3336_vm7, %v3308_v6  ;;  %v3842_v1 = vrot.slane %v3839_v0, 2  ;;  %v3975_v36 = vsel %vm3841_vm11, %v3973_v30, %v3974_v16  ;;  %v4076_v21 = vrot.slane %v4074_v22, 2  ;;  %v4088_v41 = vor.u32 %v4087_v40, %v4084_v17  ;;  %v8353_v40 = vld [vmem:[#allocation3 + $0x8] sm:$0xf0] }
 0x2e6   : > { %v3205_v42 = vpack.c.bf16 %v3193_v37, %v3193_v37  ;;  %v3608_v11 = vsel %vm2099_vm4, %v3605_v34, %v3607_v29  ;;  %v3737_v61 = vrot.slane %v3735_v63, 1  ;;  %v3740_v38 = vrot.slane %v3738_v45, 2  ;;  %4298 = vmatpush.bf16.msrb.mxu0 %v8358_v58 }
 0x2e7   : > { %4163 = vmatpush.bf16.msra.mxu3 %v8349_v14  ;;  %v3844_v10 = vsel %vm3841_vm11, %v3842_v1, %v3843_v62  ;;  %v3845_v34 = vrot.slane %v9562_v3, 2  ;;  %v4079_v3 = vrot.slane %v4077_v48, 3  ;;  %v3976_v46 = vrot.slane %v8343_v33, 2 }
 0x2e8   : > { %v3222_v60 = vsel %vm3220_vm10, %v3205_v42, %v3221_v55  ;;  %v9697_v43 = vor.u32 %v3740_v38, %v3737_v61  ;;  %v4091_v19 = vshrl.u32 %v8343_v33, 16  ;;  %v4094_v28 = vshll.u32 %v8343_v33, 16 }
 0x2e9   : > { %3223 = vst [vmem:[#allocation3 + $0x2c] sm:$0x1] %v3222_v60  ;;  %v3846_v32 = vsel %vm3841_vm11, %v3843_v62, %v3845_v34  ;;  %v3848_v49 = vsel %vm3841_vm11, %v3845_v34, %v3847_v15  ;;  %v3977_v51 = vsel %vm3841_vm11, %v3974_v16, %v3976_v46  ;;  %v3978_v6 = vrot.slane %v8344_v26, 2 }
 0x2ea   : > { %v9702_v50 = vsel %vm2336_vm5, %v3732_v20, %v9697_v43  ;;  %v4093_v59 = vrot.slane %v4091_v19, 2  ;;  %v4096_v35 = vrot.slane %v4094_v28, 3  ;;  %v4100_v9 = vshrl.u32 %v8344_v26, 16 }
 0x2eb   : > { %7288 = vmatmul.msk.bf16.gmra.mxu3 %vm3336_vm7, %v3608_v11  ;;  %v4103_v57 = vshll.u32 %v8344_v26, 16 }
 0x2ec   : > { %v4097_v24 = vor.u32 %v4096_v35, %v4093_v59 }
 0x2ed   : > { %v4105_v14 = vrot.slane %v4103_v57, 3 }
 0x2ee   : > { %v4098_v37 = vsel %vm4072_vm12, %v4088_v41, %v4097_v24 }
 0x2f0   : > { %7343 = vmatmul.msk.bf16.vlgmr.msra.gmra.mxu1 %vm3336_vm7, %v3844_v10 }
 0x2f3   : > { %7248 = vmatmul.msk.bf16.gmra.mxu2 %vm3336_vm7, %v3476_v25  ;;  %v4080_v25 = vor.u32 %v4079_v3, %v4076_v21  ;;  %v8354_v21 = vld [vmem:[#allocation3 + $0x10] sm:$0xff] }
 0x2f4   : > { %v4244_v52 = vrot.slane %v8354_v21, 3 }
 0x2f5   : > { %7198 = vmatmul.msk.bf16.gmra.mxu0 %vm3336_vm7, %v3311_v18  ;;  %v4089_v39 = vsel %vm4072_vm12, %v4080_v25, %v4088_v41  ;;  %v7432_v41 = vld [vmem:[#allocation3 + $0x8] sm:$0x8] }
 0x2f6   : > { %v7433_v33 = vor.u32 %v8353_v40, %v7432_v41 }
 0x2fb   : > { %7289 = vmatmul.msk.bf16.gmra.mxu3 %vm3336_vm7, %v3607_v29  ;;  %v4102_v29 = vrot.slane %v4100_v9, 2 }
 0x2fd   : > { %v4106_v60 = vor.u32 %v4105_v14, %v4102_v29  ;;  %v8356_v14 = vld [vmem:[#allocation3 + $0x20] sm:$0xff] }
 0x2ff   : > { %v4107_v0 = vsel %vm4072_vm12, %v4097_v24, %v4106_v60 }
 0x300   : > { %7344 = vmatmul.msk.bf16.gmra.mxu1 %vm3336_vm7, %v3846_v32 }
 0x303   : > { %7388 = vmatmul.msk.bf16.vlgmr.msra.gmra.mxu2 %vm3336_vm7, %v3975_v36 }
 0x305   : > { %7314 = vmatmul.msk.bf16.vlgmr.msra.gmra.mxu0 %vm3336_vm7, %v9576_v7  ;;  %v3825_v7 = vld [vmem:[#allocation3 + $0x24] sm:$0xff]  }
 0x306   : > { %v3838_v56 = vunpack.c.l.b16 %v3825_v7  ;;  %v3967_v23 = vunpack.c.h.b16 %v3825_v7 }
 0x308   : > { %v3840_v53 = vpack.c.b16 %v3838_v56, %v3838_v56  ;;  %v3972_v11 = vpack.c.b16 %v3967_v23, %v3967_v23  ;;  %v8355_v56 = vld [vmem:[#allocation3 + $0x18] sm:$0xff] }
 0x30a   : > { %v3849_v12 = vrot.slane %v3840_v53, 2  ;;  %v3980_v63 = vrot.slane %v3972_v11, 2  ;;  %v4109_v45 = vshrl.u32 %v3972_v11, 16  ;;  %v4112_v1 = vshll.u32 %v3972_v11, 16 }
 0x30b   : > { %7417 = vmatmul.msk.bf16.vlgmr.msra.gmra.mxu3 %vm3336_vm7, %v4089_v39 }
 0x30c   : > { %v3850_v42 = vsel %vm3841_vm11, %v3847_v15, %v3849_v12  ;;  %v3981_v38 = vsel %vm3841_vm11, %v3978_v6, %v3980_v63  ;;  %v4111_v10 = vrot.slane %v4109_v45, 2  ;;  %v4114_v44 = vrot.slane %v4112_v1, 3 }
 0x30e   : > { %v4115_v27 = vor.u32 %v4114_v44, %v4111_v10 }
 0x310   : > { %7345 = vmatmul.msk.bf16.gmra.mxu1 %vm3336_vm7, %v3848_v49  ;;  %v4116_v54 = vsel %vm4072_vm12, %v4106_v60, %v4115_v27 }
 0x313   : > { %7389 = vmatmul.msk.bf16.gmra.mxu2 %vm3336_vm7, %v3977_v51 }
 0x315   : > { %7315 = vmatmul.msk.bf16.gmra.mxu0 %vm3336_vm7, %v9637_v47  ;;  %v3979_v47 = vsel %vm3841_vm11, %v3976_v46, %v3978_v6  ;;  %v4243_v46 = vrot.slane %v7433_v33, 3 }
 0x317   : > { %v4245_v28 = vsel %vm4242_vm13, %v4243_v46, %v4244_v52 }
 0x31b   : > { %7418 = vmatmul.msk.bf16.gmra.mxu3 %vm3336_vm7, %v4098_v37 }
 0x31d   : > { %v3428_v55 = vpop.f32.mrf.mxu1 }
 0x320   : > { %7346 = vmatmul.msk.bf16.gmra.mxu1 %vm3336_vm7, %v3850_v42 }
 0x323   : > { %7390 = vmatmul.msk.bf16.gmra.mxu2 %vm3336_vm7, %v3979_v47 }
 0x325   : > { %v9738_v20 = vpop.f32.mrf.mxu1  ;;  %7316 = vmatmul.msk.bf16.gmra.mxu0 %vm3336_vm7, %v9688_v13 }
 0x32b   : > { %7419 = vmatmul.msk.bf16.gmra.mxu3 %vm3336_vm7, %v4107_v0 }
 0x32d   : > { %v3433_v62 = vpop.f32.mrf.mxu1 }
 0x330   : > { %7347 = vmatmul.msk.bf16.gmra.mxu1 %vm3336_vm7, %v3849_v12  ;;  %v4246_v12 = vrot.slane %v8355_v56, 3  ;;  %v8370_v56 = vld [vmem:[%s10529_s7 + $0x38] sm:$0xff] }
 0x331   : > { %4476 = vmatpush.bf16.msrb.mxu1 %v8370_v56 }
 0x332   : > { %v3361_v61 = vpop.f32.mrf.mxu0  ;;  %v4247_v9 = vsel %vm4242_vm13, %v4244_v52, %v4246_v12 }
 0x333   : > { %v3429_v18 = vadd.f32 %v3428_v55, %v3361_v61  ;;  %7391 = vmatmul.msk.bf16.gmra.mxu2 %vm3336_vm7, %v3981_v38 }
 0x335   : > { %v9747_v13 = vpop.f32.mrf.mxu1  ;;  %7317 = vmatmul.msk.bf16.gmra.mxu0 %vm3336_vm7, %v9702_v50 }
 0x336   : > { %v3526_v8 = vpop.f32.mrf.mxu2 }
 0x337   : > { %v3550_v31 = vadd.f32 %v3526_v8, %v3429_v18  ;;  %v8357_v18 = vld [vmem:[#allocation3 + $0x28] sm:$0x10] }
 0x33a   : > { %v9751_v34 = vpop.f32.mrf.mxu0 }
 0x33b   : > { %7420 = vmatmul.msk.bf16.gmra.mxu3 %vm3336_vm7, %v4116_v54 }
 0x33d   : > { %v3438_v5 = vpop.f32.mrf.mxu1 }
 0x33e   : > { %v9755_v16 = vpop.f32.mrf.mxu2  ;;  %v3657_v2 = vpop.f32.mrf.mxu3 }
 0x33f   : > { %v9757_v4 = vadd.f32 %v3657_v2, %v3550_v31 }
 0x342   : > { %v3366_v32 = vpop.f32.mrf.mxu0 }
 0x343   : > { %v3434_v30 = vadd.f32 %v3433_v62, %v3366_v32  ;;  %7392 = vmatmul.msk.bf16.gmra.mxu2 %vm3336_vm7, %v3980_v63  ;;  %v4248_v62 = vrot.slane %v8356_v14, 3 }
 0x345   : > { %v9760_v50 = vpop.f32.mrf.mxu1  ;;  %7318 = vmatmul.msk.bf16.gmra.mxu0 %vm3336_vm7, %v9697_v43  ;;  %v4249_v1 = vsel %vm4242_vm13, %v4246_v12, %v4248_v62 }
 0x346   : > { %v3531_v22 = vpop.f32.mrf.mxu2  ;;  %v9764_v48 = vpop.f32.mrf.mxu3 }
 0x347   : > { %v3552_v36 = vadd.f32 %v3531_v22, %v3434_v30 }
 0x34a   : > { %v9766_v17 = vpop.f32.mrf.mxu0 }
 0x34b   : > { %7421 = vmatmul.msk.bf16.gmra.mxu3 %vm3336_vm7, %v4115_v27  ;;  %v7448_v27 = vld [vmem:[#allocation3 + $0x28] sm:$0xf] }
 0x34c   : > { %v7449_v31 = vor.u32 %v8357_v18, %v7448_v27 }
 0x34d   : > { %v3443_v3 = vpop.f32.mrf.mxu1 }
 0x34e   : > { %v9769_v25 = vpop.f32.mrf.mxu2  ;;  %v3662_v39 = vpop.f32.mrf.mxu3  ;;  %v4250_v30 = vrot.slane %v7449_v31, 3 }
 0x34f   : > { %v9771_v15 = vadd.f32 %v3662_v39, %v3552_v36 }
 0x350   : > { %v4251_v40 = vsel %vm4242_vm13, %v4248_v62, %v4250_v30 }
 0x352   : > { %v3371_v43 = vpop.f32.mrf.mxu0 }
 0x353   : > { %v3439_v19 = vadd.f32 %v3438_v5, %v3371_v43 }
 0x355   : > { %v9774_v49 = vpop.f32.mrf.mxu1  ;;  %7466 = vmatmul.msk.bf16.vlgmr.msrb.gmra.mxu0 %vm3336_vm7, %v4245_v28 }
 0x356   : > { %v3536_v7 = vpop.f32.mrf.mxu2  ;;  %v9777_v51 = vpop.f32.mrf.mxu3 }
 0x357   : > { %v3554_v59 = vadd.f32 %v3536_v7, %v3439_v19 }
 0x35a   : > { %v9779_v35 = vpop.f32.mrf.mxu0 }
 0x35d   : > { %v3448_v24 = vpop.f32.mrf.mxu1 }
 0x35e   : > { %v9781_v53 = vpop.f32.mrf.mxu2  ;;  %v3667_v37 = vpop.f32.mrf.mxu3 }
 0x35f   : > { %v9783_v26 = vadd.f32 %v3667_v37, %v3554_v59 }
 0x362   : > { %v3376_v55 = vpop.f32.mrf.mxu0 }
 0x363   : > { %v3444_v6 = vadd.f32 %v3443_v3, %v3376_v55 }
 0x365   : > { %v3450_v57 = vpop.f32.mrf.mxu1  ;;  %7467 = vmatmul.msk.bf16.gmra.mxu0 %vm3336_vm7, %v4247_v9 }
 0x366   : > { %v3541_v42 = vpop.f32.mrf.mxu2  ;;  %v9787_v58 = vpop.f32.mrf.mxu3 }
 0x367   : > { %v3556_v47 = vadd.f32 %v3541_v42, %v3444_v6 }
 0x36a   : > { %v9789_v29 = vpop.f32.mrf.mxu0 }
 0x36d   : > { %v3899_v60 = vpop.f32.mrf.mxu1 }
 0x36e   : > { %v9791_v23 = vpop.f32.mrf.mxu2  ;;  %v3672_v0 = vpop.f32.mrf.mxu3 }
 0x36f   : > { %v9793_v11 = vadd.f32 %v3672_v0, %v3556_v47  ;;  %v8365_v0 = vld [vmem:[%s10529_s7 + $0x10] sm:$0xff] }
 0x372   : > { %v3381_v63 = vpop.f32.mrf.mxu0 }
 0x373   : > { %v3449_v45 = vadd.f32 %v3448_v24, %v3381_v63 }
 0x375   : > { %v9796_v61 = vpop.f32.mrf.mxu1  ;;  %7468 = vmatmul.msk.bf16.gmra.mxu0 %vm3336_vm7, %v4249_v1 }
 0x376   : > { %v3546_v38 = vpop.f32.mrf.mxu2  ;;  %v9799_v10 = vpop.f32.mrf.mxu3 }
 0x377   : > { %v3558_v44 = vadd.f32 %v3546_v38, %v3449_v45 }
 0x37a   : > { %v3383_v8 = vpop.f32.mrf.mxu0 }
 0x37d   : > { %v3904_v54 = vpop.f32.mrf.mxu1 }
 0x37e   : > { %v3548_v5 = vpop.f32.mrf.mxu2  ;;  %v3677_v2 = vpop.f32.mrf.mxu3 }
 0x37f   : > { %v9801_v32 = vadd.f32 %v3677_v2, %v3558_v44  ;;  %v8369_v44 = vld [vmem:[%s10529_s7 + $0x30] sm:$0xff] }
 0x380   : > { %4477 = vmatpush.bf16.msrb.mxu1 %v8369_v44 }
 0x382   : > { %v3791_v22 = vpop.f32.mrf.mxu0 }
 0x383   : > { %v3815_v36 = vadd.f32 %v3791_v22, %v9757_v4  ;;  %v8366_v4 = vld [vmem:[%s10529_s7 + $0x18] sm:$0xff] }
 0x384   : > { %4530 = vmatpush.bf16.msrb.mxu2 %v8366_v4  ;;  %v8374_v4 = vld [vmem:[%s10529_s7 + $0x58] sm:$0xff] }
 0x385   : > { %v9805_v21 = vpop.f32.mrf.mxu1  ;;  %7469 = vmatmul.msk.bf16.gmra.mxu0 %vm3336_vm7, %v4251_v40  ;;  %v3923_v3 = vadd.f32 %v3899_v60, %v3815_v36  ;;  %4609 = vmatpush.bf16.msrb.mxu3 %v8374_v4 }
 0x386   : > { %v3679_v41 = vpop.f32.mrf.mxu3  ;;  %v4030_v39 = vpop.f32.mrf.mxu2 }
 0x387   : > { %v4054_v33 = vadd.f32 %v4030_v39, %v3923_v3  ;;  %v8364_v41 = vld [vmem:[%s10529_s7 + $0x8] sm:$0xff] }
 0x388   : > { %4531 = vmatpush.bf16.msrb.mxu2 %v8365_v0 }
 0x38a   : > { %v9808_v52 = vpop.f32.mrf.mxu0 }
 0x38c   : > { %4532 = vmatpush.bf16.msrb.mxu2 %v8364_v41 }
 0x38d   : > { %v3909_v43 = vpop.f32.mrf.mxu1 }
 0x38e   : > { %v9810_v46 = vpop.f32.mrf.mxu2  ;;  %v4165_v19 = vpop.f32.mrf.mxu3 }
 0x38f   : > { %v9812_v28 = vadd.f32 %v4165_v19, %v4054_v33 }
 0x392   : > { %v3796_v7 = vpop.f32.mrf.mxu0 }
 0x393   : > { %v3817_v59 = vadd.f32 %v3796_v7, %v9771_v15  ;;  %v8368_v7 = vld [vmem:[%s10529_s7 + $0x28] sm:$0xff] }
 0x394   : > { %4478 = vmatpush.bf16.msrb.mxu1 %v8368_v7  ;;  %v3441_v7 = vadd.f32 %v9760_v50, %v9779_v35  ;;  %v8397_v50 = vld [vmem:[%s10529_s7 + $0xd0] sm:$0xff] }
 0x395   : > { %v9821_v24 = vpop.f32.mrf.mxu1  ;;  %7470 = vmatmul.msk.bf16.gmra.mxu0 %vm3336_vm7, %v4250_v30  ;;  %v3925_v37 = vadd.f32 %v3904_v54, %v3817_v59 }
 0x396   : > { %v4035_v12 = vpop.f32.mrf.mxu2  ;;  %v9824_v55 = vpop.f32.mrf.mxu3 }
 0x397   : > { %v4056_v6 = vadd.f32 %v4035_v12, %v3925_v37 }
 0x39a   : > { %v9826_v9 = vpop.f32.mrf.mxu0 }
 0x39d   : > { %v3914_v57 = vpop.f32.mrf.mxu1 }
 0x39e   : > { %v9828_v42 = vpop.f32.mrf.mxu2  ;;  %v4170_v15 = vpop.f32.mrf.mxu3 }
 0x39f   : > { %v9830_v47 = vadd.f32 %v4170_v15, %v4056_v6  ;;  %v3431_v6 = vadd.f32 %v9738_v20, %v9751_v34  ;;  %v8363_v15 = vld [vmem:[%s10529_s7] sm:$0xff] }
 0x3a0   : > { %4533 = vmatpush.bf16.msrb.mxu2 %v8363_v15  ;;  %v9883_v20 = vld [vmem:[%s10528_s6] ss:$0 sm:$0xff] }
 0x3a2   : > { %v3801_v14 = vpop.f32.mrf.mxu0 }
 0x3a3   : > { %v3819_v60 = vadd.f32 %v3801_v14, %v9783_v26 }
 0x3a5   : > { %v9836_v62 = vpop.f32.mrf.mxu1  ;;  %v3927_v63 = vadd.f32 %v3909_v43, %v3819_v60 }
 0x3a6   : > { %v4040_v45 = vpop.f32.mrf.mxu2  ;;  %v9838_v1 = vpop.f32.mrf.mxu3 }
 0x3a7   : > { %v4058_v38 = vadd.f32 %v4040_v45, %v3927_v63 }
 0x3aa   : > { %v9843_v18 = vpop.f32.mrf.mxu0 }
 0x3ad   : > { %v3919_v26 = vpop.f32.mrf.mxu1 }
 0x3ae   : > { %v9845_v8 = vpop.f32.mrf.mxu2  ;;  %v4175_v27 = vpop.f32.mrf.mxu3 }
 0x3af   : > { %v9847_v31 = vadd.f32 %v4175_v27, %v4058_v38 }
 0x3b2   : > { %v3806_v54 = vpop.f32.mrf.mxu0 }
 0x3b3   : > { %v3821_v5 = vadd.f32 %v3806_v54, %v9793_v11 }
 0x3b5   : > { %v3921_v2 = vpop.f32.mrf.mxu1  ;;  %v3929_v30 = vadd.f32 %v3914_v57, %v3821_v5 }
 0x3b6   : > { %v4045_v22 = vpop.f32.mrf.mxu2  ;;  %v9850_v36 = vpop.f32.mrf.mxu3 }
 0x3b7   : > { %v4060_v40 = vadd.f32 %v4045_v22, %v3929_v30 }
 0x3ba   : > { %v9852_v3 = vpop.f32.mrf.mxu0 }
 0x3be   : > { %v9857_v39 = vpop.f32.mrf.mxu2  ;;  %v4180_v33 = vpop.f32.mrf.mxu3 }
 0x3bf   : > { %v9859_v43 = vadd.f32 %v4180_v33, %v4060_v40  ;;  %v8372_v40 = vld [vmem:[%s10529_s7 + $0x48] sm:$0xff] }
 0x3c2   : > { %v3811_v19 = vpop.f32.mrf.mxu0 }
 0x3c3   : > { %v3823_v11 = vadd.f32 %v3811_v19, %v9801_v32  ;;  %v3551_v32 = vadd.f32 %v9755_v16, %v3431_v6 }
 0x3c5   : > { %v3931_v59 = vadd.f32 %v3919_v26, %v3823_v11  ;;  %v3682_v14 = vadd.f32 %v9764_v48, %v3551_v32  ;;  %v8373_v48 = vld [vmem:[%s10529_s7 + $0x50] sm:$0xff]  ;;  %v8371_v11 = vld [vmem:[%s10529_s7 + $0x40] sm:$0xff] }
 0x3c6   : > { %v4050_v56 = vpop.f32.mrf.mxu2  ;;  %v9868_v37 = vpop.f32.mrf.mxu3  ;;  %4610 = vmatpush.bf16.msrb.mxu3 %v8373_v48 }
 0x3c7   : > { %v4062_v12 = vadd.f32 %v4050_v56, %v3931_v59  ;;  %v3816_v63 = vadd.f32 %v9808_v52, %v3682_v14  ;;  %v8367_v52 = vld [vmem:[%s10529_s7 + $0x20] sm:$0xff] }
 0x3c8   : > { %4479 = vmatpush.bf16.msrb.mxu1 %v8367_v52 }
 0x3c9   : > { %v3924_v16 = vadd.f32 %v9796_v61, %v3816_v63  ;;  %v3436_v61 = vadd.f32 %v9747_v13, %v9766_v17 }
 0x3ca   : > { %v3813_v57 = vpop.f32.mrf.mxu0  ;;  %4611 = vmatpush.bf16.msrb.mxu3 %v8372_v40 }
 0x3cb   : > { %v4055_v27 = vadd.f32 %v9810_v46, %v3924_v16  ;;  %v3553_v30 = vadd.f32 %v9769_v25, %v3436_v61  ;;  %v3555_v57 = vadd.f32 %v9781_v53, %v3441_v7  ;;  %v8396_v53 = vld [vmem:[%s10529_s7 + $0xc8] sm:$0xff]  ;;  %v8395_v16 = vld [vmem:[%s10529_s7 + $0xc0] sm:$0xff] }
 0x3cd   : > { %v3684_v41 = vadd.f32 %v9777_v51, %v3553_v30  ;;  %v8385_v51 = vld [vmem:[%s10529_s7 + $0x98] sm:$0xff]  ;;  %v3686_v35 = vadd.f32 %v9787_v58, %v3555_v57 }
 0x3ce   : > { %v4052_v60 = vpop.f32.mrf.mxu2  ;;  %v4185_v0 = vpop.f32.mrf.mxu3  ;;  %4612 = vmatpush.bf16.msrb.mxu3 %v8371_v11  ;;  %4805 = vmatpush.bf16.msra.mxu2 %v8385_v51 }
 0x3cf   : > { %v9878_v45 = vadd.f32 %v4185_v0, %v4062_v12  ;;  %v3818_v13 = vadd.f32 %v9826_v9, %v3684_v41  ;;  %v8398_v9 = vld [vmem:[%s10529_s7 + $0xd8] sm:$0xff]  ;;  %v3820_v15 = vadd.f32 %v9843_v18, %v3686_v35  ;;  %v8380_v18 = vld [vmem:[%s10529_s7 + $0x70] sm:$0xff] }
 0x3d0   : > { %5013 = vmatpush.bf16.msra.mxu0 %v8398_v9 }
 0x3d1   : > { %v3926_v19 = vadd.f32 %v9805_v21, %v3818_v13  ;;  %v3928_v63 = vadd.f32 %v9821_v24, %v3820_v15 }
 0x3d2   : > { %v4300_v34 = vpop.f32.mrf.mxu0 }
 0x3d3   : > { %v4324_v38 = vadd.f32 %v4300_v34, %v9812_v28  ;;  %v4190_v28 = vadd.f32 %v9824_v55, %v4055_v27  ;;  %v4057_v21 = vadd.f32 %v9828_v42, %v3926_v19  ;;  %v8381_v42 = vld [vmem:[%s10529_s7 + $0x78] sm:$0xff]  ;;  %v8384_v34 = vld [vmem:[%s10529_s7 + $0x90] sm:$0xff]  ;;  %v3446_v27 = vadd.f32 %v9774_v49, %v9789_v29  ;;  %v8383_v29 = vld [vmem:[%s10529_s7 + $0x88] sm:$0xff] }
 0x3d4   : > { %4707 = vmatpush.bf16.msra.mxu1 %v8381_v42  ;;  %5014 = vmatpush.bf16.msra.mxu0 %v8397_v50 }
 0x3d5   : > { %v4337_v44 = vadd.f32 %v9883_v20, %v4324_v38  ;;  %v4192_v59 = vadd.f32 %v9838_v1, %v4057_v21  ;;  %4806 = vmatpush.bf16.msra.mxu2 %v8384_v34  ;;  %v3557_v30 = vadd.f32 %v9791_v23, %v3446_v27  ;;  %v8379_v23 = vld [vmem:[%s10529_s7 + $0x68] sm:$0xff]  ;;  %v8389_v27 = vld [vmem:[%s10529_s7 + $0xa0] sm:$0xff] }
 0x3d6   : > { %v4187_v26 = vpop.f32.mrf.mxu3 }
 0x3d7   : > { %v4346_v54 = vmax.f32 %v4337_v44, 0.0 }
 0x3d8   : > { %5015 = vmatpush.bf16.msra.mxu0 %v8396_v53  ;;  %4708 = vmatpush.bf16.msra.mxu1 %v8380_v18 }
 0x3d9   : > { %v4355_v5 = vpack.c.bf16 %v4346_v54, %v4346_v54  ;;  %4807 = vmatpush.bf16.msra.mxu2 %v8383_v29 }
 0x3da   : > { %v4302_v2 = vpop.f32.mrf.mxu0 }
 0x3db   : > { %4364 = vst.msk [vmem:[#allocation4] sm:$0xf] %vm3206_vm6, %v4355_v5  ;;  %v4325_v22 = vadd.f32 %v4302_v2, %v4190_v28 }
 0x3dc   : > { %5016 = vmatpush.bf16.msra.mxu0 %v8395_v16  ;;  %4709 = vmatpush.bf16.msra.mxu1 %v8379_v23 }
 0x3dd   : > { %v4338_v46 = vadd.f32 %v9883_v20, %v4325_v22 }
 0x3df   : > { %v4347_v17 = vmax.f32 %v4338_v46, 0.0 }
 0x3e1   : > { %v4356_v55 = vpack.c.bf16 %v4347_v17, %v4347_v17 }
 0x3e2   : > { %v4305_v33 = vpop.f32.mrf.mxu0  ;;  %v8498_v44 = vld [vmem:[#allocation4] sm:$0xe] }
 0x3e3   : > { %4365 = vst.msk [vmem:[#allocation4 + $0x4] sm:$0xf] %vm3206_vm6, %v4356_v55  ;;  %v4326_v25 = vadd.f32 %v4305_v33, %v9830_v47  ;;  %v8382_v33 = vld [vmem:[%s10529_s7 + $0x80] sm:$0xff] }
 0x3e4   : > { %4808 = vmatpush.bf16.msra.mxu2 %v8382_v33 }
 0x3e5   : > { %v4339_v4 = vadd.f32 %v9883_v20, %v4326_v25 }
 0x3e7   : > { %v4348_v47 = vmax.f32 %v4339_v4, 0.0  ;;  %v8392_v4 = vld [vmem:[%s10529_s7 + $0xb8] sm:$0xff] }
 0x3e8   : > { %4909 = vmatpush.bf16.msra.mxu3 %v8392_v4 }
 0x3e9   : > { %v4357_v56 = vpack.c.bf16 %v4348_v47, %v4348_v47 }
 0x3ea   : > { %v4307_v12 = vpop.f32.mrf.mxu0  ;;  %v8487_v6 = vld [vmem:[#allocation4] sm:$0xff]  }
 0x3eb   : > { %4366 = vst.msk [vmem:[#allocation4 + $0x8] sm:$0xf] %vm3206_vm6, %v4357_v56  ;;  %v4327_v32 = vadd.f32 %v4307_v12, %v4192_v59  ;;  %7518 = vmatmul.msk.bf16.vlgmr.msrb.gmra.mxu2 %vm3336_vm7, %v8487_v6  ;;  %v8497_v48 = vld [vmem:[#allocation4] sm:$0xf0]  ;;  %v4419_v24 = vshll.u32 %v8487_v6, 16  ;;  %v4417_v40 = vshrl.u32 %v8487_v6, 16 }
 0x3ec   : > { %v8499_v26 = vor.u32 %v8498_v44, %v8497_v48  ;;  %v8391_v59 = vld [vmem:[%s10529_s7 + $0xb0] sm:$0xff]  ;;  %v8378_v56 = vld [vmem:[%s10529_s7 + $0x60] sm:$0xff] }
 0x3ed   : > { %v4340_v1 = vadd.f32 %v9883_v20, %v4327_v32  ;;  %v4421_v28 = vrot.slane %v4419_v24, 1  ;;  %4710 = vmatpush.bf16.msra.mxu1 %v8378_v56  ;;  %4910 = vmatpush.bf16.msra.mxu3 %v8391_v59 }
 0x3ef   : > { %v4349_v14 = vmax.f32 %v4340_v1, 0.0  ;;  %v4422_v13 = vor.u32 %v4421_v28, %v4417_v40 }
 0x3f1   : > { %v4358_v60 = vpack.c.bf16 %v4349_v14, %v4349_v14 }
 0x3f2   : > { %v4310_v0 = vpop.f32.mrf.mxu0  ;;  %v4935_v47 = vld [vmem:[#allocation4 + $0x8] sm:$0xc] }
 0x3f3   : > { %4367 = vst.msk [vmem:[#allocation4 + $0xc] sm:$0xf] %vm3206_vm6, %v4358_v60  ;;  %v4328_v58 = vadd.f32 %v4310_v0, %v9847_v31  ;;  %v4059_v31 = vadd.f32 %v9845_v8, %v3928_v63  ;;  %v4567_v8 = vrot.slane %v8499_v26, 1  ;;  %v4958_v6 = vunpack.c.l.b16 %v4935_v47  ;;  %v5146_v60 = vld [vmem:[#allocation4 + $0x8] sm:$0x8] }
 0x3f4   : > { %v5159_v24 = vunpack.c.l.b16 %v5146_v60  ;;  %v8401_v60 = vld [vmem:[%s10529_s7 + $0xf0] sm:$0xff] }
 0x3f5   : > { %v4341_v38 = vadd.f32 %v9883_v20, %v4328_v58  ;;  %v4194_v54 = vadd.f32 %v9850_v36, %v4059_v31  ;;  %v3688_v36 = vadd.f32 %v9799_v10, %v3557_v30  ;;  %v8375_v58 = vld [vmem:[#allocation4 + $0x4] sm:$0xf0] }
 0x3f7   : > { %v4350_v52 = vmax.f32 %v4341_v38, 0.0  ;;  %v3822_v19 = vadd.f32 %v9852_v3, %v3688_v36  ;;  %v7558_v38 = vld [vmem:[#allocation4 + $0x4] sm:$0xe] }
 0x3f8   : > { %v10022_v26 = vor.u32 %v8375_v58, %v7558_v38 }
 0x3f9   : > { %v4359_v61 = vpack.c.bf16 %v4350_v52, %v4350_v52  ;;  %v3930_v21 = vadd.f32 %v9836_v62, %v3822_v19 }
 0x3fa   : > { %v4312_v5 = vpop.f32.mrf.mxu0  ;;  %v9955_v2 = vld [vmem:[#allocation4 + $0x8] sm:$0xff] }
 0x3fb   : > { %4368 = vst.msk [vmem:[#allocation4 + $0x10] sm:$0xf] %vm3206_vm6, %v4359_v61  ;;  %v4329_v22 = vadd.f32 %v4312_v5, %v4194_v54  ;;  %7519 = vmatmul.msk.bf16.gmra.mxu2 %vm3336_vm7, %v9955_v2  ;;  %v4568_v41 = vrot.slane %v9955_v2, 1  ;;  %v4424_v49 = vshll.u32 %v9955_v2, 16  ;;  %v4936_v51 = vld [vmem:[#allocation4 + $0xc] sm:$0xf]  ;;  %v4061_v62 = vadd.f32 %v9857_v39, %v3930_v21 }
 0x3fc   : > { %v4959_v7 = vunpack.c.l.b16 %v4936_v51  ;;  %v4428_v18 = vshrl.u32 %v9955_v2, 16  ;;  %v8406_v54 = vld [vmem:[%s10529_s7 + $0x118] sm:$0xff] }
 0x3fd   : > { %v4342_v46 = vadd.f32 %v9883_v20, %v4329_v22  ;;  %v4569_v17 = vsel %vm2099_vm4, %v4567_v8, %v4568_v41  ;;  %v9974_v55 = vrot.slane %v4424_v49, 1  ;;  %v4196_v42 = vadd.f32 %v9868_v37, %v4061_v62  ;;  %5207 = vmatpush.bf16.msrb.mxu2 %v8406_v54 }
 0x3fe   : > { %7545 = vmatmul.msk.bf16.vlgmr.msrb.gmra.mxu3 %vm3336_vm7, %v4569_v17  ;;  %v4965_v32 = vpack.c.b16 %v4959_v7, %v4958_v6  ;;  %v5161_v61 = vpack.c.b16 %v4959_v7, %v5159_v24  ;;  %v8405_v17 = vld [vmem:[%s10529_s7 + $0x110] sm:$0xff] }
 0x3ff   : > { %v4351_v25 = vmax.f32 %v4342_v46, 0.0  ;;  %v4427_v10 = vsel %vm1292_vm2, %v4422_v13, %v9974_v55  ;;  %v4430_v40 = vor.u32 %v4428_v18, %v9974_v55  ;;  %v4746_v46 = vshll.u32 %v10022_v26, 16  ;;  %v8402_v13 = vld [vmem:[%s10529_s7 + $0xf8] sm:$0xff]  ;;  %v8404_v18 = vld [vmem:[%s10529_s7 + $0x108] sm:$0xff] }
 0x400   : > { %7499 = vmatmul.msk.bf16.vlgmr.msrb.gmra.mxu1 %vm3336_vm7, %v4427_v10  ;;  %v4969_v0 = vrot.slane %v4965_v32, 2  ;;  %v5049_v28 = vshrl.u32 %v4965_v32, 16  ;;  %v5052_v5 = vshll.u32 %v4965_v32, 16  ;;  %v5163_v55 = vrot.slane %v5161_v61, 3 }
 0x401   : > { %v4360_v11 = vpack.c.bf16 %v4351_v25, %v4351_v25  ;;  %5120 = vmatpush.bf16.msrb.mxu1 %v8402_v13  ;;  %5208 = vmatpush.bf16.msrb.mxu2 %v8405_v17  ;;  %v4748_v59 = vrot.slane %v4746_v46, 2 }
 0x402   : > { %v4315_v9 = vpop.f32.mrf.mxu0  ;;  %v8596_v53 = vld [vmem:[#allocation4 + $0x10] sm:$0xf]   ;;  %v5051_v33 = vrot.slane %v5049_v28, 2 }
 0x403   : > { %4369 = vst.msk [vmem:[#allocation4 + $0x14] sm:$0xf] %vm3206_vm6, %v4360_v11  ;;  %v4330_v3 = vadd.f32 %v4315_v9, %v9859_v43  ;;  %v8390_v43 = vld [vmem:[%s10529_s7 + $0xa8] sm:$0xff] }
 0x404   : > { %4911 = vmatpush.bf16.msra.mxu3 %v8390_v43  ;;  %v10015_v48 = vld [vmem:[#allocation4 + $0xc] sm:$0xff] }
 0x405   : > { %v4343_v12 = vadd.f32 %v9883_v20, %v4330_v3  ;;  %v4751_v29 = vshrl.u32 %v10015_v48, 16  ;;  %v4754_v23 = vshll.u32 %v10015_v48, 16  ;;  %5121 = vmatpush.bf16.msrb.mxu1 %v8401_v60  ;;  %5209 = vmatpush.bf16.msrb.mxu2 %v8404_v18  ;;  %v4666_v13 = vrot.slane %v10015_v48, 1 }
 0x407   : > { %v4352_v57 = vmax.f32 %v4343_v12, 0.0  ;;  %v4753_v51 = vrot.slane %v4751_v29, 1  ;;  %v4756_v9 = vrot.slane %v4754_v23, 2 }
 0x408   : > { %4912 = vmatpush.bf16.msra.mxu3 %v8389_v27  ;;  %v8403_v27 = vld [vmem:[%s10529_s7 + $0x100] sm:$0xff] }
 0x409   : > { %v4361_v50 = vpack.c.bf16 %v4352_v57, %v4352_v57  ;;  %v4757_v57 = vor.u32 %v4756_v9, %v4753_v51  ;;  %5210 = vmatpush.bf16.msrb.mxu2 %v8403_v27 }
 0x40a   : > { %v4317_v35 = vpop.f32.mrf.mxu0  ;;  %v10002_v1 = vld [vmem:[#allocation4 + $0x10] sm:$0xff]  }
 0x40b   : > { %v8598_v15 = vld [vmem:[#allocation4 + $0x10] sm:$0x70]  ;;  %4370 = vst.msk [vmem:[#allocation4 + $0x18] sm:$0xf] %vm3206_vm6, %v4361_v50  ;;  %v4331_v39 = vadd.f32 %v4317_v35, %v4196_v42  ;;  %v4570_v52 = vrot.slane %v10002_v1, 1 }
 0x40c   : > { %v10004_v14 = vld [vmem:[#allocation4 + $0x10] sm:$0xff]  ;;  %v10009_v37 = vor.u32 %v8598_v15, %v8596_v53 }
 0x40d   : > { %v4970_v63 = vrot.slane %v10004_v14, 2  ;;  %v4344_v34 = vadd.f32 %v9883_v20, %v4331_v39  ;;  %v4571_v22 = vsel %vm2099_vm4, %v4568_v41, %v4570_v52  ;;  %v4743_v41 = vshrl.u32 %v10022_v26, 16 }
 0x40e   : > { %7520 = vmatmul.msk.bf16.gmra.mxu2 %vm3336_vm7, %v10009_v37  ;;  %v4432_v44 = vshll.u32 %v10009_v37, 16  ;;  %7546 = vmatmul.msk.bf16.gmra.mxu3 %vm3336_vm7, %v4571_v22  ;;  %v5164_v25 = vrot.slane %v10004_v14, 3  ;;  %v5057_v10 = vshrl.u32 %v10004_v14, 16  ;;  %v5060_v11 = vshll.u32 %v10004_v14, 16 }
 0x40f   : > { %v4971_v16 = vsel %vm3841_vm11, %v4969_v0, %v4970_v63  ;;  %v4353_v31 = vmax.f32 %v4344_v34, 0.0  ;;  %v4745_v7 = vrot.slane %v4743_v41, 1  ;;  %v4436_v0 = vshrl.u32 %v10009_v37, 16  ;;  %v8400_v37 = vld [vmem:[%s10529_s7 + $0xe8] sm:$0xff] }
 0x410   : > { %7685 = vmatmul.msk.bf16.vlgmr.msra.gmra.mxu0 %vm3336_vm7, %v4971_v16  ;;  %v4434_v8 = vrot.slane %v4432_v44, 1  ;;  %v10056_v21 = vsel %vm4242_vm13, %v5163_v55, %v5164_v25  ;;  %v5059_v3 = vrot.slane %v5057_v10, 2  ;;  %v5062_v47 = vrot.slane %v5060_v11, 3  ;;  %5122 = vmatpush.bf16.msrb.mxu1 %v8400_v37  ;;  %v8399_v11 = vld [vmem:[%s10529_s7 + $0xe0] sm:$0xff] }
 0x411   : > { %v4362_v30 = vpack.c.bf16 %v4353_v31, %v4353_v31  ;;  %v4749_v50 = vor.u32 %v4748_v59, %v4745_v7  ;;  %v4665_v55 = vrot.slane %v10022_v26, 1 }
 0x412   : > { %v4320_v49 = vpop.f32.mrf.mxu0  ;;  %v4435_v2 = vsel %vm1292_vm2, %v4430_v40, %v4434_v8  ;;  %v5063_v6 = vor.u32 %v5062_v47, %v5059_v3  ;;  %v10070_v39 = vld [vmem:[#allocation4 + $0x14] sm:$0xff]  ;;  %v4438_v14 = vor.u32 %v4436_v0, %v4434_v8 }
 0x413   : > { %4371 = vst.msk [vmem:[#allocation4 + $0x1c] sm:$0xf] %vm3206_vm6, %v4362_v30  ;;  %v4332_v36 = vadd.f32 %v4320_v49, %v9878_v45  ;;  %7500 = vmatmul.msk.bf16.gmra.mxu1 %vm3336_vm7, %v4435_v2  ;;  %v5054_v45 = vrot.slane %v5052_v5, 3  ;;  %v4758_v53 = vsel %vm2336_vm5, %v4749_v50, %v4757_v57  ;;  %v4763_v58 = vshll.u32 %v10070_v39, 16  ;;  %v8386_v5 = vld [vmem:[#allocation4 + $0x4] sm:$0xf0] }
 0x414   : > { %v8387_v30 = vld [vmem:[#allocation4 + $0xc] sm:$0xff]  ;;  %v7624_v49 = vld [vmem:[#allocation4 + $0x4] sm:$0xc]  ;;  %5123 = vmatpush.bf16.msrb.mxu1 %v8399_v11  ;;  %v8388_v9 = vld [vmem:[#allocation4 + $0x14] sm:$0xff] }
 0x415   : > { %v4345_v19 = vadd.f32 %v9883_v20, %v4332_v36  ;;  %v4375_v20 = vld [vmem:[#allocation4 + $0x20] sm:$0x3]  ;;  %v5055_v12 = vor.u32 %v5054_v45, %v5051_v33  ;;  %v7625_v29 = vor.u32 %v8386_v5, %v7624_v49  ;;  %v4866_v36 = vrot.slane %v8387_v30, 2  ;;  %v8415_v5 = vld [vmem:[%s10531_s9 + $0x38] sm:$0xff] }
 0x416   : > { %v4868_v26 = vrot.slane %v8388_v9, 2  ;;  %5343 = vmatpush.bf16.msrb.mxu3 %v8415_v5  ;;  %v8409_v9 = vld [vmem:[%s10531_s9 + $0x8] sm:$0xff] }
 0x417   : > { %v4354_v4 = vmax.f32 %v4345_v19, 0.0  ;;  %v10063_v42 = vsel %vm4072_vm12, %v5055_v12, %v5063_v6  ;;  %v4865_v46 = vrot.slane %v7625_v29, 2  ;;  %v4667_v19 = vsel %vm2099_vm4, %v4665_v55, %v4666_v13 }
 0x418   : > { %v4869_v3 = vsel %vm3841_vm11, %v4866_v36, %v4868_v26 }
 0x419   : > { %v4363_v56 = vpack.c.bf16 %v4354_v4, %v4354_v4  ;;  %v4867_v17 = vsel %vm3841_vm11, %v4865_v46, %v4866_v36  ;;  %v4668_v4 = vrot.slane %v10070_v39, 1  ;;  %v8411_v46 = vld [vmem:[%s10531_s9 + $0x18] sm:$0xff] }
 0x41a   : > { %v4322_v62 = vpop.f32.mrf.mxu0  ;;  %v10060_v32 = vld [vmem:[#allocation4 + $0x18] sm:$0xff]  ;;  %5389 = vmatpush.bf16.msrb.mxu0 %v8411_v46 }
 0x41b   : > { %v4376_v43 = vsel %vm4374_vm0, %v4363_v56, %v4375_v20  ;;  %v4972_v35 = vrot.slane %v10060_v32, 2  ;;  %v5166_v1 = vrot.slane %v10060_v32, 3  ;;  %v5066_v38 = vshrl.u32 %v10060_v32, 16  ;;  %v4837_v47 = vld [vmem:[#allocation4 + $0x1c] sm:$0x1] }
 0x41c   : > { %4377 = vst [vmem:[#allocation4 + $0x20] sm:$0x3] %v4376_v43  ;;  %v5069_v24 = vshll.u32 %v10060_v32, 16  ;;  %v4669_v20 = vsel %vm2099_vm4, %v4666_v13, %v4668_v4  ;;  %v4860_v7 = vunpack.c.l.b16 %v4837_v47 }
 0x41d   : > { %v4973_v15 = vsel %vm3841_vm11, %v4970_v63, %v4972_v35  ;;  %v4760_v63 = vshrl.u32 %v10070_v39, 16  ;;  %v5167_v54 = vsel %vm4242_vm13, %v5164_v25, %v5166_v1  ;;  %v5068_v61 = vrot.slane %v5066_v38, 2 }
 0x41e   : > { %7611 = vmatmul.msk.bf16.vlgmr.msra.gmra.mxu2 %vm3336_vm7, %v4758_v53  ;;  %7547 = vmatmul.msk.bf16.gmra.mxu3 %vm3336_vm7, %v4570_v52  ;;  %v4765_v52 = vrot.slane %v4763_v58, 2  ;;  %v5071_v28 = vrot.slane %v5069_v24, 3  ;;  %v4864_v59 = vpack.c.b16 %v4860_v7, %v4860_v7 }
 0x41f   : > { %v4762_v31 = vrot.slane %v4760_v63, 1 }
 0x420   : > { %7686 = vmatmul.msk.bf16.gmra.mxu0 %vm3336_vm7, %v4973_v15  ;;  %v5072_v22 = vor.u32 %v5071_v28, %v5068_v61  ;;  %v4870_v56 = vrot.slane %v4864_v59, 2 }
 0x421   : > { %v4766_v40 = vor.u32 %v4765_v52, %v4762_v31 }
 0x422   : > { %v5073_v23 = vsel %vm4072_vm12, %v5063_v6, %v5072_v22  ;;  %v4871_v12 = vsel %vm3841_vm11, %v4868_v26, %v4870_v56  ;;  %v10177_v56 = vld [vmem:[%s10530_s8] ss:$0 sm:$0xff] }
 0x423   : > { %v4941_v34 = vld [vmem:[#allocation4 + $0x20] sm:$0x1]  ;;  %7501 = vmatmul.msk.bf16.gmra.mxu1 %vm3336_vm7, %v4438_v14  ;;  %v4767_v2 = vsel %vm2336_vm5, %v4757_v57, %v4766_v40 }
 0x424   : > { %v4964_v16 = vunpack.c.l.b16 %v4941_v34  ;;  %v5147_v6 = vld [vmem:[#allocation4 + $0x20] sm:$0x3] }
 0x425   : > { %v5160_v62 = vunpack.c.l.b16 %v5147_v6 }
 0x426   : > { %v4968_v44 = vpack.c.b16 %v4964_v16, %v4964_v16 }
 0x427   : > { %v5162_v57 = vpack.c.b16 %v5160_v62, %v5160_v62 }
 0x428   : > { %v4974_v8 = vrot.slane %v4968_v44, 2  ;;  %v5075_v33 = vshrl.u32 %v4968_v44, 16  ;;  %v5078_v45 = vshll.u32 %v4968_v44, 16 }
 0x429   : > { %v5168_v43 = vrot.slane %v5162_v57, 3 }
 0x42a   : > { %v4975_v41 = vsel %vm3841_vm11, %v4972_v35, %v4974_v8  ;;  %v5077_v25 = vrot.slane %v5075_v33, 2  ;;  %v5080_v10 = vrot.slane %v5078_v45, 3 }
 0x42c   : > { %v5081_v51 = vor.u32 %v5080_v10, %v5077_v25 }
 0x42e   : > { %7612 = vmatmul.msk.bf16.gmra.mxu2 %vm3336_vm7, %v4767_v2  ;;  %7650 = vmatmul.msk.bf16.vlgmr.msra.gmra.mxu3 %vm3336_vm7, %v4867_v17  ;;  %v5082_v48 = vsel %vm4072_vm12, %v5072_v22, %v5081_v51  ;;  %v8410_v51 = vld [vmem:[%s10531_s9 + $0x10] sm:$0xff] }
 0x42f   : > { %5390 = vmatpush.bf16.msrb.mxu0 %v8410_v51  ;;  %v8432_v51 = vld [vmem:[%s10531_s9 + $0xb0] sm:$0xff] }
 0x430   : > { %7687 = vmatmul.msk.bf16.gmra.mxu0 %vm3336_vm7, %v4975_v41  ;;  %v8414_v41 = vld [vmem:[%s10531_s9 + $0x30] sm:$0xff] }
 0x431   : > { %5344 = vmatpush.bf16.msrb.mxu3 %v8414_v41 }
 0x433   : > { %7584 = vmatmul.msk.bf16.vlgmr.msra.gmra.mxu1 %vm3336_vm7, %v4667_v19  ;;  %5391 = vmatpush.bf16.msrb.mxu0 %v8409_v9  ;;  %v8427_v9 = vld [vmem:[%s10531_s9 + $0x88] sm:$0xff] }
 0x43e   : > { %7613 = vmatmul.msk.bf16.gmra.mxu2 %vm3336_vm7, %v4766_v40  ;;  %7651 = vmatmul.msk.bf16.gmra.mxu3 %vm3336_vm7, %v4869_v3 }
 0x443   : > { %7585 = vmatmul.msk.bf16.gmra.mxu1 %vm3336_vm7, %v4669_v20 }
 0x44e   : > { %7739 = vmatmul.msk.bf16.vlgmr.msrb.gmra.mxu2 %vm3336_vm7, %v10056_v21  ;;  %7652 = vmatmul.msk.bf16.gmra.mxu3 %vm3336_vm7, %v4871_v12  ;;  %v5169_v21 = vsel %vm4242_vm13, %v5166_v1, %v5168_v43  ;;  %v8408_v43 = vld [vmem:[%s10531_s9] sm:$0xff] }
 0x44f   : > { %5392 = vmatpush.bf16.msrb.mxu0 %v8408_v43 }
 0x453   : > { %7586 = vmatmul.msk.bf16.gmra.mxu1 %vm3336_vm7, %v4668_v4 }
 0x45e   : > { %7740 = vmatmul.msk.bf16.gmra.mxu2 %vm3336_vm7, %v5167_v54 }
 0x463   : > { %7712 = vmatmul.msk.bf16.vlgmr.msrb.gmra.mxu1 %vm3336_vm7, %v10063_v42 }
 0x46e   : > { %v4535_v50 = vpop.f32.mrf.mxu2  ;;  %7741 = vmatmul.msk.bf16.gmra.mxu2 %vm3336_vm7, %v5169_v21 }
 0x473   : > { %7713 = vmatmul.msk.bf16.gmra.mxu1 %vm3336_vm7, %v5073_v23 }
 0x476   : > { %v4537_v35 = vpop.f32.mrf.mxu2 }
 0x47d   : > { %v4481_v53 = vpop.f32.mrf.mxu1 }
 0x47e   : > { %v4536_v15 = vadd.f32 %v4535_v50, %v4481_v53  ;;  %v4540_v39 = vpop.f32.mrf.mxu2 }
 0x481   : > { %v4614_v58 = vpop.f32.mrf.mxu3 }
 0x482   : > { %v4629_v36 = vadd.f32 %v4614_v58, %v4536_v15 }
 0x483   : > { %7714 = vmatmul.msk.bf16.gmra.mxu1 %vm3336_vm7, %v5082_v48  ;;  %v8413_v48 = vld [vmem:[%s10531_s9 + $0x28] sm:$0xff] }
 0x484   : > { %5345 = vmatpush.bf16.msrb.mxu3 %v8413_v48  ;;  %v8423_v48 = vld [vmem:[%s10531_s9 + $0x68] sm:$0xff] }
 0x485   : > { %v4483_v60 = vpop.f32.mrf.mxu1 }
 0x486   : > { %v10134_v0 = vpop.f32.mrf.mxu2  ;;  %v4538_v17 = vadd.f32 %v4537_v35, %v4483_v60 }
 0x489   : > { %v4616_v16 = vpop.f32.mrf.mxu3 }
 0x48a   : > { %v4630_v25 = vadd.f32 %v4616_v16, %v4538_v17 }
 0x48d   : > { %v5018_v13 = vpop.f32.mrf.mxu0 }
 0x490   : > { %v4486_v42 = vpop.f32.mrf.mxu1 }
 0x491   : > { %v4541_v14 = vadd.f32 %v4540_v39, %v4486_v42  ;;  %v4545_v63 = vpop.f32.mrf.mxu2  ;;  %v4619_v38 = vpop.f32.mrf.mxu3 }
 0x493   : > { %v4631_v20 = vadd.f32 %v4619_v38, %v4541_v14  ;;  %v8412_v38 = vld [vmem:[%s10531_s9 + $0x20] sm:$0xff] }
 0x494   : > { %5346 = vmatpush.bf16.msrb.mxu3 %v8412_v38 }
 0x495   : > { %v5020_v26 = vpop.f32.mrf.mxu0 }
 0x498   : > { %v4488_v32 = vpop.f32.mrf.mxu1 }
 0x499   : > { %v10136_v34 = vpop.f32.mrf.mxu2  ;;  %v4621_v52 = vpop.f32.mrf.mxu3  ;;  %v4543_v21 = vadd.f32 %v10134_v0, %v4488_v32  ;;  %v8429_v0 = vld [vmem:[%s10531_s9 + $0x98] sm:$0xff] }
 0x49a   : > { %v8425_v32 = vld [vmem:[%s10531_s9 + $0x78] sm:$0xff]  ;;  %5617 = vmatpush.bf16.msra.mxu2 %v8429_v0 }
 0x49b   : > { %v4632_v42 = vadd.f32 %v4621_v52, %v4543_v21  ;;  %5540 = vmatpush.bf16.msra.mxu1 %v8425_v32 }
 0x49d   : > { %v5023_v39 = vpop.f32.mrf.mxu0 }
 0x4a0   : > { %v4491_v18 = vpop.f32.mrf.mxu1 }
 0x4a1   : > { %v10138_v37 = vadd.f32 %v4545_v63, %v4491_v18  ;;  %v4810_v1 = vpop.f32.mrf.mxu2  ;;  %v10142_v61 = vpop.f32.mrf.mxu3 }
 0x4a8   : > { %v10140_v24 = vpop.f32.mrf.mxu1 }
 0x4a9   : > { %v4812_v31 = vpop.f32.mrf.mxu2  ;;  %v10149_v22 = vpop.f32.mrf.mxu3 }
 0x4b0   : > { %v4712_v44 = vpop.f32.mrf.mxu1 }
 0x4b1   : > { %v4815_v27 = vpop.f32.mrf.mxu2  ;;  %v4914_v49 = vpop.f32.mrf.mxu3  ;;  %v4727_v2 = vadd.f32 %v4712_v44, %v4629_v36 }
 0x4b2   : > { %v5025_v36 = vpop.f32.mrf.mxu0 }
 0x4b3   : > { %v4825_v55 = vadd.f32 %v4810_v1, %v4727_v2 }
 0x4b5   : > { %v4929_v10 = vadd.f32 %v4914_v49, %v4825_v55 }
 0x4b7   : > { %v5033_v3 = vadd.f32 %v5018_v13, %v4929_v10  ;;  %v8421_v13 = vld [vmem:[%s10531_s9 + $0x58] sm:$0xff] }
 0x4b8   : > { %v4714_v54 = vpop.f32.mrf.mxu1  ;;  %5463 = vmatpush.bf16.msra.mxu3 %v8421_v13 }
 0x4b9   : > { %v10144_v28 = vpop.f32.mrf.mxu2  ;;  %v4916_v33 = vpop.f32.mrf.mxu3  ;;  %v4728_v11 = vadd.f32 %v4714_v54, %v4630_v25 }
 0x4bb   : > { %v4826_v4 = vadd.f32 %v4812_v31, %v4728_v11 }
 0x4bd   : > { %v4930_v6 = vadd.f32 %v4916_v33, %v4826_v4  ;;  %v8420_v33 = vld [vmem:[%s10531_s9 + $0x50] sm:$0xff] }
 0x4be   : > { %5464 = vmatpush.bf16.msra.mxu3 %v8420_v33 }
 0x4bf   : > { %v5034_v15 = vadd.f32 %v5020_v26, %v4930_v6 }
 0x4c0   : > { %v4717_v30 = vpop.f32.mrf.mxu1 }
 0x4c1   : > { %v10151_v40 = vpop.f32.mrf.mxu2  ;;  %v4919_v7 = vpop.f32.mrf.mxu3  ;;  %v4729_v62 = vadd.f32 %v4717_v30, %v4631_v20  ;;  %v4633_v30 = vadd.f32 %v10142_v61, %v10138_v37  ;;  %v8433_v37 = vld [vmem:[%s10531_s9 + $0xb8] sm:$0xff] }
 0x4c2   : > { %5688 = vmatpush.bf16.msra.mxu0 %v8433_v37  ;;  %v5263_v37 = vld [vmem:[#allocation5 + $0x14] sm:$0x7] }
 0x4c3   : > { %v4827_v35 = vadd.f32 %v4815_v27, %v4729_v62 }
 0x4c5   : > { %v4931_v58 = vadd.f32 %v4919_v7, %v4827_v35  ;;  %v8431_v7 = vld [vmem:[%s10531_s9 + $0xa8] sm:$0xff] }
 0x4c6   : > { %5689 = vmatpush.bf16.msra.mxu0 %v8432_v51 }
 0x4c7   : > { %v5035_v54 = vadd.f32 %v5023_v39, %v4931_v58 }
 0x4c8   : > { %v4719_v8 = vpop.f32.mrf.mxu1 }
 0x4c9   : > { %v10153_v29 = vpop.f32.mrf.mxu2  ;;  %v4730_v16 = vadd.f32 %v4719_v8, %v4632_v42  ;;  %v4921_v18 = vpop.f32.mrf.mxu3 }
 0x4ca   : > { %5690 = vmatpush.bf16.msra.mxu0 %v8431_v7  ;;  %v8436_v7 = vld [vmem:[%s10531_s9 + $0xd0] sm:$0xff] }
 0x4cb   : > { %v4828_v44 = vadd.f32 %v10144_v28, %v4730_v16  ;;  %v8428_v28 = vld [vmem:[%s10531_s9 + $0x90] sm:$0xff] }
 0x4cc   : > { %5618 = vmatpush.bf16.msra.mxu2 %v8428_v28 }
 0x4cd   : > { %v4932_v2 = vadd.f32 %v4921_v18, %v4828_v44 }
 0x4cf   : > { %v5036_v11 = vadd.f32 %v5025_v36, %v4932_v2 }
 0x4d0   : > { %v10155_v23 = vpop.f32.mrf.mxu1  ;;  %5619 = vmatpush.bf16.msra.mxu2 %v8427_v9 }
 0x4d1   : > { %v5212_v45 = vpop.f32.mrf.mxu2  ;;  %v4731_v41 = vadd.f32 %v10155_v23, %v4633_v30  ;;  %v4924_v61 = vpop.f32.mrf.mxu3  ;;  %v8424_v23 = vld [vmem:[%s10531_s9 + $0x70] sm:$0xff] }
 0x4d2   : > { %5541 = vmatpush.bf16.msra.mxu1 %v8424_v23 }
 0x4d3   : > { %v4829_v25 = vadd.f32 %v10151_v40, %v4731_v41 }
 0x4d6   : > { %5542 = vmatpush.bf16.msra.mxu1 %v8423_v48 }
 0x4d8   : > { %v10163_v19 = vpop.f32.mrf.mxu1 }
 0x4d9   : > { %v5214_v12 = vpop.f32.mrf.mxu2  ;;  %v4926_v62 = vpop.f32.mrf.mxu3 }
 0x4e0   : > { %v5125_v47 = vpop.f32.mrf.mxu1 }
 0x4e1   : > { %v5140_v59 = vadd.f32 %v5125_v47, %v5033_v3  ;;  %v5217_v31 = vpop.f32.mrf.mxu2  ;;  %v4933_v3 = vadd.f32 %v4924_v61, %v4829_v25 }
 0x4e3   : > { %v5227_v57 = vadd.f32 %v5212_v45, %v5140_v59  ;;  %v4548_v45 = vadd.f32 %v10136_v34, %v10140_v24  ;;  %v8426_v59 = vld [vmem:[%s10531_s9 + $0x80] sm:$0xff] }
 0x4e4   : > { %5620 = vmatpush.bf16.msra.mxu2 %v8426_v59 }
 0x4e5   : > { %v5237_v50 = vadd.f32 %v10177_v56, %v5227_v57  ;;  %v4634_v34 = vadd.f32 %v10149_v22, %v4548_v45  ;;  %v8422_v22 = vld [vmem:[%s10531_s9 + $0x60] sm:$0xff] }
 0x4e6   : > { %5543 = vmatpush.bf16.msra.mxu1 %v8422_v22 }
 0x4e7   : > { %v5243_v53 = vmax.f32 %v5237_v50, 0.0  ;;  %v4732_v47 = vadd.f32 %v10163_v19, %v4634_v34  ;;  %v8430_v50 = vld [vmem:[%s10531_s9 + $0xa0] sm:$0xff]  ;;  %v8440_v34 = vld [vmem:[%s10531_s9 + $0xf0] sm:$0xff] }
 0x4e8   : > { %v5127_v60 = vpop.f32.mrf.mxu1  ;;  %5691 = vmatpush.bf16.msra.mxu0 %v8430_v50 }
 0x4e9   : > { %v5249_v14 = vpack.c.bf16 %v5243_v53, %v5243_v53  ;;  %v5141_v63 = vadd.f32 %v5127_v60, %v5034_v15  ;;  %v5219_v55 = vpop.f32.mrf.mxu2  ;;  %v4830_v6 = vadd.f32 %v10153_v29, %v4732_v47  ;;  %v8419_v29 = vld [vmem:[%s10531_s9 + $0x48] sm:$0xff] }
 0x4ea   : > { %5465 = vmatpush.bf16.msra.mxu3 %v8419_v29  ;;  %v8443_v29 = vld [vmem:[%s10531_s9 + $0x108] sm:$0xff] }
 0x4eb   : > { %5255 = vst.msk [vmem:[#allocation5] sm:$0xf] %vm3206_vm6, %v5249_v14  ;;  %v5228_v1 = vadd.f32 %v5214_v12, %v5141_v63  ;;  %v5028_v12 = vpop.f32.mrf.mxu0  ;;  %v4934_v39 = vadd.f32 %v4926_v62, %v4830_v6  ;;  %v8418_v63 = vld [vmem:[%s10531_s9 + $0x40] sm:$0xff]  ;;  %v8439_v6 = vld [vmem:[%s10531_s9 + $0xe8] sm:$0xff]  ;;  %v8444_v62 = vld [vmem:[%s10531_s9 + $0x110] sm:$0xff] }
 0x4ec   : > { %v5037_v43 = vadd.f32 %v5028_v12, %v4933_v3 }
 0x4ed   : > { %v5238_v52 = vadd.f32 %v10177_v56, %v5228_v1 }
 0x4ee   : > { %5466 = vmatpush.bf16.msra.mxu3 %v8418_v63 }
 0x4ef   : > { %v5244_v27 = vmax.f32 %v5238_v52, 0.0 }
 0x4f0   : > { %v5130_v5 = vpop.f32.mrf.mxu1 }
 0x4f1   : > { %v5250_v8 = vpack.c.bf16 %v5244_v27, %v5244_v27  ;;  %v5142_v49 = vadd.f32 %v5130_v5, %v5035_v54  ;;  %v5222_v21 = vpop.f32.mrf.mxu2  ;;  %v8441_v27 = vld [vmem:[%s10531_s9 + $0xf8] sm:$0xff] }
 0x4f2   : > { %5842 = vmatpush.bf16.msrb.mxu1 %v8441_v27 }
 0x4f3   : > { %5256 = vst.msk [vmem:[#allocation5 + $0x4] sm:$0xf] %vm3206_vm6, %v5250_v8  ;;  %v5229_v46 = vadd.f32 %v5217_v31, %v5142_v49  ;;  %v5030_v14 = vpop.f32.mrf.mxu0 }
 0x4f4   : > { %v5038_v16 = vadd.f32 %v5030_v14, %v4934_v39  ;;  %v8438_v39 = vld [vmem:[%s10531_s9 + $0xe0] sm:$0xff] }
 0x4f5   : > { %v5239_v17 = vadd.f32 %v10177_v56, %v5229_v46 }
 0x4f6   : > { %5843 = vmatpush.bf16.msrb.mxu1 %v8440_v34 }
 0x4f7   : > { %v5245_v10 = vmax.f32 %v5239_v17, 0.0 }
 0x4f8   : > { %v5132_v26 = vpop.f32.mrf.mxu1 }
 0x4f9   : > { %v5251_v24 = vpack.c.bf16 %v5245_v10, %v5245_v10  ;;  %v5143_v40 = vadd.f32 %v5132_v26, %v5036_v11  ;;  %v5224_v31 = vpop.f32.mrf.mxu2  ;;  %v8437_v26 = vld [vmem:[%s10531_s9 + $0xd8] sm:$0xff] }
 0x4fa   : > { %v10229_v4 = vld [vmem:[#allocation5] sm:$0xff]  ;;  %5844 = vmatpush.bf16.msrb.mxu1 %v8439_v6 }
 0x4fb   : > { %5257 = vst.msk [vmem:[#allocation5 + $0x8] sm:$0xf] %vm3206_vm6, %v5251_v24  ;;  %v5230_v20 = vadd.f32 %v5219_v55, %v5143_v40  ;;  %7788 = vmatmul.msk.bf16.vlgmr.msrb.gmra.mxu0 %vm3336_vm7, %v10229_v4  ;;  %v5297_v0 = vshll.u32 %v10229_v4, 16  ;;  %v5480_v32 = vld [vmem:[#allocation5 + $0x4] sm:$0xe]  ;;  %v5295_v13 = vshrl.u32 %v10229_v4, 16 }
 0x4fc   : > { %v5497_v8 = vunpack.c.l.b16 %v5480_v32  ;;  %v5634_v51 = vld [vmem:[#allocation5 + $0x4] sm:$0xc]  ;;  %v8445_v24 = vld [vmem:[%s10531_s9 + $0x118] sm:$0xff] }
 0x4fd   : > { %v5240_v19 = vadd.f32 %v10177_v56, %v5230_v20  ;;  %v5299_v2 = vrot.slane %v5297_v0, 1  ;;  %v5647_v3 = vunpack.c.l.b16 %v5634_v51  ;;  %5913 = vmatpush.bf16.msrb.mxu2 %v8445_v24 }
 0x4fe   : > { %5845 = vmatpush.bf16.msrb.mxu1 %v8438_v39 }
 0x4ff   : > { %v5246_v57 = vmax.f32 %v5240_v19, 0.0  ;;  %v5300_v17 = vor.u32 %v5299_v2, %v5295_v13 }
 0x500   : > { %v5135_v35 = vpop.f32.mrf.mxu1 }
 0x501   : > { %v5252_v53 = vpack.c.bf16 %v5246_v57, %v5246_v57  ;;  %v5144_v15 = vadd.f32 %v5135_v35, %v5037_v43  ;;  %5914 = vmatpush.bf16.msrb.mxu2 %v8444_v62 }
 0x502   : > { %v5705_v32 = vld [vmem:[#allocation5 + $0x8] sm:$0xc] }
 0x503   : > { %5258 = vst.msk [vmem:[#allocation5 + $0xc] sm:$0xf] %vm3206_vm6, %v5252_v53  ;;  %v5231_v60 = vadd.f32 %v5222_v21, %v5144_v15 }
 0x505   : > { %v5241_v42 = vadd.f32 %v10177_v56, %v5231_v60  ;;  %5915 = vmatpush.bf16.msrb.mxu2 %v8443_v29 }
 0x507   : > { %v5247_v58 = vmax.f32 %v5241_v42, 0.0 }
 0x508   : > { %v5137_v18 = vpop.f32.mrf.mxu1 }
 0x509   : > { %v5253_v1 = vpack.c.bf16 %v5247_v58, %v5247_v58  ;;  %v5145_v38 = vadd.f32 %v5137_v18, %v5038_v16  ;;  %v8442_v58 = vld [vmem:[%s10531_s9 + $0x100] sm:$0xff] }
 0x50a   : > { %v10258_v52 = vld [vmem:[#allocation5 + $0x8] sm:$0xff]   ;;  %5916 = vmatpush.bf16.msrb.mxu2 %v8442_v58 }
 0x50b   : > { %v8500_v44 = vld [vmem:[#allocation5 + $0x8] sm:$0xff]   ;;  %5259 = vst.msk [vmem:[#allocation5 + $0x10] sm:$0xf] %vm3206_vm6, %v5253_v1  ;;  %v5232_v54 = vadd.f32 %v5224_v31, %v5145_v38  ;;  %v5291_v5 = vunpack.c.l.b16 %v10258_v52  ;;  %v8434_v31 = vld [vmem:[%s10531_s9 + $0xc0] sm:$0xff] }
 0x50c   : > { %v8492_v30 = vunpack.c.l.b16 %v8500_v44  ;;  %v8493_v55 = vunpack.c.h.b16 %v8500_v44  ;;  %v8435_v38 = vld [vmem:[%s10531_s9 + $0xc8] sm:$0xff]  ;;  %v5723_v44 = vunpack.c.h.b16 %v10258_v52 }
 0x50d   : > { %v5242_v49 = vadd.f32 %v10177_v56, %v5232_v54  ;;  %v10266_v36 = vpack.c.b16 %v5291_v5, %v5291_v5  ;;  %v8417_v54 = vld [vmem:[#allocation5 + $0x8] sm:$0x10]  ;;  %v5722_v5 = vunpack.c.l.b16 %v5705_v32 }
 0x50e   : > { %v5501_v41 = vpack.c.b16 %v8492_v30, %v5497_v8  ;;  %v5649_v57 = vpack.c.b16 %v8492_v30, %v5647_v3  ;;  %v8416_v8 = vld [vmem:[#allocation5] sm:$0xf0] }
 0x50f   : > { %v5248_v46 = vmax.f32 %v5242_v49, 0.0  ;;  %v5302_v28 = vshll.u32 %v10266_v36, 16  ;;  %7789 = vmatmul.msk.bf16.gmra.mxu0 %vm3336_vm7, %v10266_v36  ;;  %v5306_v63 = vshrl.u32 %v10266_v36, 16  ;;  %v7804_v49 = vld [vmem:[#allocation5 + $0x8] sm:$0xf]  ;;  %v5726_v2 = vpack.c.b16 %v5723_v44, %v5722_v5 }
 0x510   : > { %v5567_v45 = vshrl.u32 %v5501_v41, 16  ;;  %v5570_v48 = vshll.u32 %v5501_v41, 16  ;;  %v5503_v4 = vrot.slane %v5501_v41, 1  ;;  %v5651_v60 = vrot.slane %v5649_v57, 2  ;;  %v7800_v41 = vld [vmem:[#allocation5] sm:$0xe] }
 0x511   : > { %v5254_v61 = vpack.c.bf16 %v5248_v46, %v5248_v46  ;;  %v5304_v23 = vrot.slane %v5302_v28, 1  ;;  %v7805_v36 = vor.u32 %v8417_v54, %v7804_v49  ;;  %v7801_v46 = vor.u32 %v8416_v8, %v7800_v41  ;;  %v8465_v49 = vld [vmem:[%s10533_s11 + $0x98] sm:$0xff] }
 0x512   : > { %v5483_v56 = vld [vmem:[#allocation5 + $0x10] sm:$0x1]  ;;  %v5569_v20 = vrot.slane %v5567_v45, 1  ;;  %v5572_v59 = vrot.slane %v5570_v48, 2  ;;  %v5792_v52 = vshrl.u32 %v5726_v2, 16  ;;  %v8461_v41 = vld [vmem:[%s10533_s11 + $0x78] sm:$0xff] }
 0x513   : > { %v5635_v33 = vld [vmem:[#allocation5 + $0x10] sm:$0x3]  ;;  %v5264_v25 = vsel %vm5262_vm8, %v5254_v61, %v5263_v37  ;;  %v5305_v10 = vsel %vm1292_vm2, %v5300_v17, %v5304_v23  ;;  %v5500_v11 = vunpack.c.l.b16 %v5483_v56  ;;  %v5308_v16 = vor.u32 %v5306_v63, %v5304_v23  ;;  %v5859_v45 = vld [vmem:[#allocation5 + $0x8] sm:$0x8] }
 0x514   : > { %5265 = vst [vmem:[#allocation5 + $0x14] sm:$0x7] %v5264_v25  ;;  %7770 = vmatmul.msk.bf16.vlgmr.msrb.gmra.mxu3 %vm3336_vm7, %v5305_v10  ;;  %v5648_v9 = vunpack.c.l.b16 %v5635_v33  ;;  %v5573_v53 = vor.u32 %v5572_v59, %v5569_v20  ;;  %v5707_v1 = vld [vmem:[#allocation5 + $0x10] sm:$0xf]  ;;  %v5427_v61 = vrot.slane %v7805_v36, 1  ;;  %v5795_v17 = vshll.u32 %v5726_v2, 16 }
 0x515   : > { %v5502_v40 = vpack.c.b16 %v5500_v11, %v8493_v55  ;;  %5765 = vmatpush.bf16.msrb.mxu3 %v8437_v26  ;;  %v5724_v27 = vunpack.c.l.b16 %v5707_v1  ;;  %v5426_v23 = vrot.slane %v7801_v46, 1  ;;  %v5794_v10 = vrot.slane %v5792_v52, 2  ;;  %v8448_v36 = vld [vmem:[%s10533_s11 + $0x10] sm:$0xff] }
 0x516   : > { %v10283_v47 = vpack.c.b16 %v5648_v9, %v8493_v55  ;;  %v5797_v11 = vrot.slane %v5795_v17, 3  ;;  %v5872_v48 = vunpack.c.l.b16 %v5859_v45  ;;  %v5728_v20 = vrot.slane %v5726_v2, 2  ;;  %v8451_v2 = vld [vmem:[%s10533_s11 + $0x28] sm:$0xff] }
 0x517   : > { %v5504_v22 = vrot.slane %v5502_v40, 1  ;;  %v5575_v12 = vshrl.u32 %v5502_v40, 16  ;;  %v5578_v19 = vshll.u32 %v5502_v40, 16  ;;  %v5428_v25 = vsel %vm2099_vm4, %v5426_v23, %v5427_v61 }
 0x518   : > { %v5652_v35 = vrot.slane %v10283_v47, 2  ;;  %v5798_v26 = vor.u32 %v5797_v11, %v5794_v10  ;;  %v5874_v34 = vpack.c.b16 %v5723_v44, %v5872_v48  ;;  %v8449_v44 = vld [vmem:[%s10533_s11 + $0x18] sm:$0xff]  ;;  %v8460_v10 = vld [vmem:[%s10533_s11 + $0x70] sm:$0xff]  ;;  %v8463_v48 = vld [vmem:[%s10533_s11 + $0x88] sm:$0xff]  ;;  %vm5946_vm2 = vsmask.f32 3328 }
 0x519   : > { %v5505_v43 = vsel %vm2099_vm4, %v5503_v4, %v5504_v22  ;;  %v5577_v50 = vrot.slane %v5575_v12, 1  ;;  %v5580_v21 = vrot.slane %v5578_v19, 2  ;;  %5766 = vmatpush.bf16.msrb.mxu3 %v8436_v7  ;;  %v8469_v11 = vld [vmem:[%s10533_s11 + $0xb8] sm:$0xff]  ;;  %vm5947_vm4 = vmand %vm3206_vm6, %vm5946_vm2 }
 0x51a   : > { %7848 = vmatmul.msk.bf16.vlgmr.msra.gmra.mxu1 %vm3336_vm7, %v5505_v43  ;;  %v5653_v14 = vsel %vm3841_vm11, %v5651_v60, %v5652_v35  ;;  %v5876_v4 = vrot.slane %v5874_v34, 3 }
 0x51b   : > { %v5581_v15 = vor.u32 %v5580_v21, %v5577_v50  ;;  %v5708_v18 = vld [vmem:[#allocation5 + $0x14] sm:$0x3]  ;;  %6155 = vmatpush.bf16.msra.mxu1 %v8461_v41 }
 0x51c   : > { %v5725_v0 = vunpack.c.l.b16 %v5708_v18  ;;  %v5860_v37 = vld [vmem:[#allocation5 + $0x14] sm:$0x7] }
 0x51d   : > { %v5582_v42 = vsel %vm2336_vm5, %v5573_v53, %v5581_v15  ;;  %5767 = vmatpush.bf16.msrb.mxu3 %v8435_v38  ;;  %v5873_v33 = vunpack.c.l.b16 %v5860_v37 }
 0x51e   : > { %7874 = vmatmul.msk.bf16.vlgmr.msra.gmra.mxu2 %vm3336_vm7, %v5582_v42  ;;  %v5727_v30 = vpack.c.b16 %v5725_v0, %v5724_v27 }
 0x51f   : > { %7900 = vmatmul.msk.bf16.vlgmr.msra.gmra.mxu0 %vm3336_vm7, %v5653_v14  ;;  %v5875_v9 = vpack.c.b16 %v5873_v33, %v5724_v27  ;;  %v8453_v14 = vld [vmem:[%s10533_s11 + $0x38] sm:$0xff]  ;;  %6209 = vmatpush.bf16.msra.mxu2 %v8465_v49  ;;  %v8450_v33 = vld [vmem:[%s10533_s11 + $0x20] sm:$0xff] }
 0x520   : > { %v5800_v13 = vshrl.u32 %v5727_v30, 16  ;;  %v5803_v28 = vshll.u32 %v5727_v30, 16  ;;  %v5729_v47 = vrot.slane %v5727_v30, 2  ;;  %6006 = vmatpush.bf16.msrb.mxu0 %v8453_v14  ;;  %6156 = vmatpush.bf16.msra.mxu1 %v8460_v10  ;;  %v8480_v14 = vld [vmem:[%s10533_s11 + $0x110] sm:$0xff] }
 0x521   : > { %5768 = vmatpush.bf16.msrb.mxu3 %v8434_v31  ;;  %v5877_v40 = vrot.slane %v5875_v9, 3  ;;  %v8452_v31 = vld [vmem:[%s10533_s11 + $0x30] sm:$0xff]  ;;  %v8457_v9 = vld [vmem:[%s10533_s11 + $0x58] sm:$0xff] }
 0x522   : > { %v5802_v55 = vrot.slane %v5800_v13, 2  ;;  %v5805_v56 = vrot.slane %v5803_v28, 3  ;;  %v5730_v7 = vsel %vm3841_vm11, %v5728_v20, %v5729_v47  ;;  %v8447_v13 = vld [vmem:[%s10533_s11 + $0x8] sm:$0xff] }
 0x523   : > { %v5878_v3 = vsel %vm4242_vm13, %v5876_v4, %v5877_v40  ;;  %v8468_v4 = vld [vmem:[%s10533_s11 + $0xb0] sm:$0xff] }
 0x524   : > { %7771 = vmatmul.msk.bf16.gmra.mxu3 %vm3336_vm7, %v5308_v16  ;;  %v5806_v51 = vor.u32 %v5805_v56, %v5802_v55  ;;  %6007 = vmatpush.bf16.msrb.mxu0 %v8452_v31  ;;  %v8464_v55 = vld [vmem:[%s10533_s11 + $0x90] sm:$0xff]  ;;  %v8446_v56 = vld [vmem:[%s10533_s11] sm:$0xff] }
 0x525   : > { %6210 = vmatpush.bf16.msra.mxu2 %v8464_v55 }
 0x526   : > { %v5807_v24 = vsel %vm4072_vm12, %v5798_v26, %v5806_v51 }
 0x528   : > { %6008 = vmatpush.bf16.msrb.mxu0 %v8451_v2 }
 0x529   : > { %6211 = vmatpush.bf16.msra.mxu2 %v8463_v48  ;;  %v8471_v48 = vld [vmem:[%s10533_s11 + $0xc8] sm:$0xff] }
 0x52a   : > { %7849 = vmatmul.msk.bf16.gmra.mxu1 %vm3336_vm7, %v5504_v22 }
 0x52c   : > { %6009 = vmatpush.bf16.msrb.mxu0 %v8450_v33 }
 0x52e   : > { %7875 = vmatmul.msk.bf16.gmra.mxu2 %vm3336_vm7, %v5581_v15 }
 0x52f   : > { %7901 = vmatmul.msk.bf16.gmra.mxu0 %vm3336_vm7, %v5652_v35 }
 0x530   : > { %6100 = vmatpush.bf16.msra.mxu0 %v8457_v9 }
 0x534   : > { %7822 = vmatmul.msk.bf16.vlgmr.msra.gmra.mxu3 %vm3336_vm7, %v5428_v25 }
 0x535   : > { %6046 = vmatpush.bf16.msra.mxu3 %v8449_v44 }
 0x539   : > { %6047 = vmatpush.bf16.msra.mxu3 %v8448_v36 }
 0x53a   : > { %7952 = vmatmul.msk.bf16.vlgmr.msrb.gmra.mxu1 %vm3336_vm7, %v5807_v24  ;;  %v8459_v24 = vld [vmem:[%s10533_s11 + $0x68] sm:$0xff] }
 0x53b   : > { %6157 = vmatpush.bf16.msra.mxu1 %v8459_v24 }
 0x53d   : > { %6048 = vmatpush.bf16.msra.mxu3 %v8447_v13 }
 0x53e   : > { %7978 = vmatmul.msk.bf16.vlgmr.msrb.gmra.mxu2 %vm3336_vm7, %v5878_v3  ;;  %v8456_v3 = vld [vmem:[%s10533_s11 + $0x50] sm:$0xff] }
 0x53f   : > { %6101 = vmatpush.bf16.msra.mxu0 %v8456_v3 }
 0x541   : > { %6049 = vmatpush.bf16.msra.mxu3 %v8446_v56  ;;  %v8472_v56 = vld [vmem:[%s10533_s11 + $0xd0] sm:$0xff] }
 0x544   : > { %7823 = vmatmul.msk.bf16.gmra.mxu3 %vm3336_vm7, %v5427_v61 }
 0x54a   : > { %7953 = vmatmul.msk.bf16.gmra.mxu1 %vm3336_vm7, %v5806_v51 }
 0x54e   : > { %7979 = vmatmul.msk.bf16.gmra.mxu2 %vm3336_vm7, %v5877_v40 }
 0x554   : > { %7926 = vmatmul.msk.bf16.vlgmr.msrb.gmra.mxu3 %vm3336_vm7, %v5730_v7  ;;  %v8545_v7 = vld [vmem:[%s10532_s10] ss:$0 sm:$0xff] }
 0x555   : > { %6264 = vmatpush.bf16.msrb.mxu3 %v8469_v11 }
 0x559   : > { %6265 = vmatpush.bf16.msrb.mxu3 %v8468_v4  ;;  %v8470_v4 = vld [vmem:[%s10533_s11 + $0xc0] sm:$0xff] }
 0x564   : > { %7927 = vmatmul.msk.bf16.gmra.mxu3 %vm3336_vm7, %v5729_v47 }
 0x578   : > { %v5394_v22 = vpop.f32.mrf.mxu0 }
 0x580   : > { %v5396_v59 = vpop.f32.mrf.mxu0 }
 0x58c   : > { %v10334_v12 = vpop.f32.mrf.mxu0 }
 0x594   : > { %v5401_v19 = vpop.f32.mrf.mxu0 }
 0x595   : > { %v8458_v19 = vld [vmem:[%s10533_s11 + $0x60] sm:$0xff] }
 0x596   : > { %6158 = vmatpush.bf16.msra.mxu1 %v8458_v19 }
 0x597   : > { %v5348_v6 = vpop.f32.mrf.mxu3  ;;  %v5545_v62 = vpop.f32.mrf.mxu1 }
 0x598   : > { %v5395_v5 = vadd.f32 %v5394_v22, %v5348_v6  ;;  %v8481_v6 = vld [vmem:[%s10533_s11 + $0x118] sm:$0xff] }
 0x59c   : > { %v5693_v57 = vpop.f32.mrf.mxu0 }
 0x59f   : > { %v5350_v43 = vpop.f32.mrf.mxu3  ;;  %v5547_v50 = vpop.f32.mrf.mxu1 }
 0x5a0   : > { %v5397_v61 = vadd.f32 %v5396_v59, %v5350_v43  ;;  %v8462_v59 = vld [vmem:[%s10533_s11 + $0x80] sm:$0xff] }
 0x5a1   : > { %v5622_v21 = vpop.f32.mrf.mxu2  ;;  %6212 = vmatpush.bf16.msra.mxu2 %v8462_v59 }
 0x5a4   : > { %v10336_v35 = vpop.f32.mrf.mxu0 }
 0x5a5   : > { %6428 = vmatpush.bf16.msrb.mxu2 %v8481_v6 }
 0x5a7   : > { %v5353_v53 = vpop.f32.mrf.mxu3  ;;  %v10338_v15 = vpop.f32.mrf.mxu1 }
 0x5a8   : > { %v5400_v26 = vadd.f32 %v10334_v12, %v5353_v53  ;;  %v8477_v53 = vld [vmem:[%s10533_s11 + $0xf8] sm:$0xff] }
 0x5a9   : > { %v10340_v39 = vpop.f32.mrf.mxu2  ;;  %6373 = vmatpush.bf16.msrb.mxu1 %v8477_v53  ;;  %6429 = vmatpush.bf16.msrb.mxu2 %v8480_v14 }
 0x5ac   : > { %v10342_v60 = vpop.f32.mrf.mxu0 }
 0x5af   : > { %v5355_v29 = vpop.f32.mrf.mxu3  ;;  %v5552_v42 = vpop.f32.mrf.mxu1 }
 0x5b1   : > { %v10347_v63 = vpop.f32.mrf.mxu2 }
 0x5b4   : > { %v5700_v58 = vpop.f32.mrf.mxu0 }
 0x5b7   : > { %v5468_v16 = vpop.f32.mrf.mxu3  ;;  %v5847_v18 = vpop.f32.mrf.mxu1 }
 0x5b8   : > { %v5477_v8 = vadd.f32 %v5468_v16, %v5395_v5 }
 0x5b9   : > { %v5629_v1 = vpop.f32.mrf.mxu2 }
 0x5ba   : > { %v5554_v46 = vadd.f32 %v5545_v62, %v5477_v8  ;;  %v8467_v62 = vld [vmem:[%s10533_s11 + $0xa8] sm:$0xff]  ;;  %v8476_v1 = vld [vmem:[%s10533_s11 + $0xf0] sm:$0xff] }
 0x5bb   : > { %6266 = vmatpush.bf16.msrb.mxu3 %v8467_v62  ;;  %6374 = vmatpush.bf16.msrb.mxu1 %v8476_v1 }
 0x5bc   : > { %v5631_v23 = vadd.f32 %v5622_v21, %v5554_v46 }
 0x5be   : > { %v5702_v25 = vadd.f32 %v5693_v57, %v5631_v23  ;;  %v8455_v57 = vld [vmem:[%s10533_s11 + $0x48] sm:$0xff] }
 0x5bf   : > { %v5470_v38 = vpop.f32.mrf.mxu3  ;;  %v10349_v0 = vpop.f32.mrf.mxu1  ;;  %6102 = vmatpush.bf16.msra.mxu0 %v8455_v57 }
 0x5c0   : > { %v5478_v17 = vadd.f32 %v5470_v38, %v5397_v61 }
 0x5c1   : > { %v5918_v32 = vpop.f32.mrf.mxu2 }
 0x5c2   : > { %v5555_v45 = vadd.f32 %v5547_v50, %v5478_v17  ;;  %v5948_v17 = vld [vmem:[#allocation6 + $0x8] sm:$0xf] }
 0x5c4   : > { %v5632_v22 = vadd.f32 %v10340_v39, %v5555_v45 }
 0x5c6   : > { %v5703_v21 = vadd.f32 %v10336_v35, %v5632_v22  ;;  %v8454_v35 = vld [vmem:[%s10533_s11 + $0x40] sm:$0xff] }
 0x5c7   : > { %v5473_v27 = vpop.f32.mrf.mxu3  ;;  %v10357_v54 = vpop.f32.mrf.mxu1  ;;  %6103 = vmatpush.bf16.msra.mxu0 %v8454_v35 }
 0x5c8   : > { %v5479_v47 = vadd.f32 %v5473_v27, %v5400_v26 }
 0x5c9   : > { %v10359_v30 = vpop.f32.mrf.mxu2 }
 0x5ca   : > { %v5556_v43 = vadd.f32 %v10338_v15, %v5479_v47  ;;  %v8466_v15 = vld [vmem:[%s10533_s11 + $0xa0] sm:$0xff] }
 0x5cb   : > { %6267 = vmatpush.bf16.msrb.mxu3 %v8466_v15 }
 0x5cf   : > { %v5475_v28 = vpop.f32.mrf.mxu3  ;;  %v5854_v37 = vpop.f32.mrf.mxu1 }
 0x5d1   : > { %v10376_v52 = vpop.f32.mrf.mxu2 }
 0x5d7   : > { %v5770_v51 = vpop.f32.mrf.mxu3 }
 0x5d8   : > { %v5779_v34 = vadd.f32 %v5770_v51, %v5702_v25 }
 0x5d9   : > { %v5925_v40 = vpop.f32.mrf.mxu2 }
 0x5da   : > { %v5856_v20 = vadd.f32 %v5847_v18, %v5779_v34  ;;  %v5633_v18 = vadd.f32 %v10347_v63, %v5556_v43  ;;  %v8475_v63 = vld [vmem:[%s10533_s11 + $0xe8] sm:$0xff] }
 0x5db   : > { %6375 = vmatpush.bf16.msrb.mxu1 %v8475_v63 }
 0x5dc   : > { %v5927_v12 = vadd.f32 %v5918_v32, %v5856_v20  ;;  %v8479_v32 = vld [vmem:[%s10533_s11 + $0x108] sm:$0xff] }
 0x5dd   : > { %6430 = vmatpush.bf16.msrb.mxu2 %v8479_v32 }
 0x5de   : > { %v5934_v50 = vadd.f32 %v8545_v7, %v5927_v12 }
 0x5df   : > { %v5772_v39 = vpop.f32.mrf.mxu3 }
 0x5e0   : > { %v5937_v29 = vmax.f32 %v5934_v50, 0.0  ;;  %v5780_v42 = vadd.f32 %v5772_v39, %v5703_v21 }
 0x5e2   : > { %v5940_v58 = vpack.c.bf16 %v5937_v29, %v5937_v29  ;;  %v5857_v16 = vadd.f32 %v10349_v0, %v5780_v42  ;;  %v5704_v0 = vadd.f32 %v10342_v60, %v5633_v18  ;;  %v8474_v60 = vld [vmem:[%s10533_s11 + $0xe0] sm:$0xff] }
 0x5e3   : > { %6376 = vmatpush.bf16.msrb.mxu1 %v8474_v60 }
 0x5e4   : > { %5943 = vst.msk [vmem:[#allocation6] sm:$0xf] %vm3206_vm6, %v5940_v58  ;;  %v5928_v38 = vadd.f32 %v10359_v30, %v5857_v16  ;;  %v8478_v30 = vld [vmem:[%s10533_s11 + $0x100] sm:$0xff] }
 0x5e5   : > { %6431 = vmatpush.bf16.msrb.mxu2 %v8478_v30 }
 0x5e6   : > { %v5935_v31 = vadd.f32 %v8545_v7, %v5928_v38 }
 0x5e7   : > { %v5775_v44 = vpop.f32.mrf.mxu3 }
 0x5e8   : > { %v5938_v27 = vmax.f32 %v5935_v31, 0.0  ;;  %v5781_v5 = vadd.f32 %v5775_v44, %v5704_v0 }
 0x5ea   : > { %v5941_v8 = vpack.c.bf16 %v5938_v27, %v5938_v27  ;;  %v5858_v49 = vadd.f32 %v10357_v54, %v5781_v5  ;;  %v8473_v54 = vld [vmem:[%s10533_s11 + $0xd8] sm:$0xff] }
 0x5eb   : > { %v5951_v36 = vld [vmem:[#allocation6] sm:$0x1]  ;;  %v6055_v10 = vld [vmem:[#allocation6] sm:$0x2] }
 0x5ec   : > { %5944 = vst.msk [vmem:[#allocation6 + $0x4] sm:$0xf] %vm3206_vm6, %v5941_v8  ;;  %v5929_v2 = vadd.f32 %v10376_v52, %v5858_v49  ;;  %v5970_v41 = vunpack.c.l.b16 %v5951_v36  ;;  %8021 = vmatmul.msk.bf16.vlgmr.msra.gmra.mxu3 %vm3336_vm7, %v5951_v36  ;;  %v6066_v34 = vunpack.c.l.b16 %v6055_v10  ;;  %v6438_v49 = vld [vmem:[%s10534_s12] sm:$0x1] }
 0x5ee   : > { %v5936_v46 = vadd.f32 %v8545_v7, %v5929_v2  ;;  %v5971_v13 = vpack.c.b16 %v5970_v41, %v5970_v41  ;;  %v6067_v3 = vpack.c.b16 %v6066_v34, %v6066_v34 }
 0x5ef   : > { %v5777_v28 = vpop.f32.mrf.mxu3 }
 0x5f0   : > { %v5939_v37 = vmax.f32 %v5936_v46, 0.0  ;;  %v5973_v61 = vshrl.u32 %v5971_v13, 16  ;;  %v6068_v22 = vrot.slane %v6067_v3, 1 }
 0x5f2   : > { %v5942_v23 = vpack.c.bf16 %v5939_v37, %v5939_v37  ;;  %8004 = vmatmul.msk.bf16.vlgmr.msrb.gmra.mxu0 %vm3336_vm7, %v5973_v61 }
 0x5f3   : > { %v6110_v52 = vld [vmem:[#allocation6 + $0x4] sm:$0x2]  ;;  %v6219_v55 = vld [vmem:[#allocation6 + $0x4] sm:$0x4]  ;;  %6319 = vmatpush.bf16.msrb.mxu0 %v8473_v54 }
 0x5f4   : > { %v5949_v33 = vsel %vm5947_vm4, %v5942_v23, %v5948_v17  ;;  %v6121_v45 = vunpack.c.l.b16 %v6110_v52  ;;  %v6230_v25 = vunpack.c.l.b16 %v6219_v55 }
 0x5f5   : > { %5950 = vst [vmem:[#allocation6 + $0x8] sm:$0xf] %v5949_v33 }
 0x5f6   : > { %v6122_v11 = vpack.c.b16 %v6121_v45, %v6121_v45  ;;  %v6231_v51 = vpack.c.b16 %v6230_v25, %v6230_v25 }
 0x5f7   : > { %6320 = vmatpush.bf16.msrb.mxu0 %v8472_v56 }
 0x5f8   : > { %v6123_v9 = vrot.slane %v6122_v11, 1  ;;  %v6175_v26 = vshrl.u32 %v6122_v11, 16  ;;  %v6232_v40 = vrot.slane %v6231_v51, 2 }
 0x5fa   : > { %8071 = vmatmul.msk.bf16.vlgmr.msra.gmra.mxu1 %vm3336_vm7, %v6123_v9  ;;  %v6177_v24 = vrot.slane %v6175_v26, 1 }
 0x5fb   : > { %6321 = vmatpush.bf16.msrb.mxu0 %v8471_v48 }
 0x5fc   : > { %8096 = vmatmul.msk.bf16.vlgmr.msra.gmra.mxu2 %vm3336_vm7, %v6177_v24  ;;  %8121 = vmatmul.msk.bf16.vlgmr.msrb.gmra.mxu3 %vm3336_vm7, %v6232_v40  ;;  %v6274_v47 = vld [vmem:[#allocation6 + $0x8] sm:$0x4]  ;;  %v6383_v7 = vld [vmem:[#allocation6 + $0x8] sm:$0x8] }
 0x5fd   : > { %v6285_v20 = vunpack.c.l.b16 %v6274_v47  ;;  %v6394_v12 = vunpack.c.l.b16 %v6383_v7 }
 0x5ff   : > { %6322 = vmatpush.bf16.msrb.mxu0 %v8470_v4  ;;  %v6286_v59 = vpack.c.b16 %v6285_v20, %v6285_v20  ;;  %v6395_v6 = vpack.c.b16 %v6394_v12, %v6394_v12 }
 0x601   : > { %v6339_v19 = vshrl.u32 %v6286_v59, 16  ;;  %v6396_v57 = vrot.slane %v6395_v6, 3  ;;  %v6287_v43 = vrot.slane %v6286_v59, 2 }
 0x602   : > { %8046 = vmatmul.msk.bf16.vlgmr.msra.gmra.mxu0 %vm3336_vm7, %v6068_v22 }
 0x603   : > { %v6341_v62 = vrot.slane %v6339_v19, 2 }
 0x60a   : > { %8171 = vmatmul.msk.bf16.vlgmr.msrb.gmra.mxu1 %vm3336_vm7, %v6341_v62 }
 0x60c   : > { %8196 = vmatmul.msk.bf16.vlgmr.msrb.gmra.mxu2 %vm3336_vm7, %v6396_v57 }
 0x612   : > { %8146 = vmatmul.msk.bf16.vlgmr.msrb.gmra.mxu0 %vm3336_vm7, %v6287_v43 }
 0x66f   : > { %v6011_v50 = vpop.f32.mrf.mxu0  ;;  %v6051_v21 = vpop.f32.mrf.mxu3 }
 0x670   : > { %v6052_v15 = vadd.f32 %v6051_v21, %v6011_v50 }
 0x677   : > { %v6013_v53 = vpop.f32.mrf.mxu0  ;;  %v6053_v39 = vpop.f32.mrf.mxu3 }
 0x678   : > { %v6160_v29 = vpop.f32.mrf.mxu1 }
 0x67f   : > { %v6105_v42 = vpop.f32.mrf.mxu0  ;;  %v6214_v14 = vpop.f32.mrf.mxu2 }
 0x680   : > { %v6162_v35 = vpop.f32.mrf.mxu1  ;;  %v6269_v58 = vpop.f32.mrf.mxu3  ;;  %v6109_v16 = vadd.f32 %v6105_v42, %v6052_v15 }
 0x682   : > { %v6164_v18 = vadd.f32 %v6160_v29, %v6109_v16 }
 0x684   : > { %v6218_v0 = vadd.f32 %v6214_v14, %v6164_v18 }
 0x686   : > { %v6273_v63 = vadd.f32 %v6269_v58, %v6218_v0 }
 0x687   : > { %v6107_v1 = vpop.f32.mrf.mxu0  ;;  %v6216_v38 = vpop.f32.mrf.mxu2 }
 0x688   : > { %v6271_v32 = vpop.f32.mrf.mxu3  ;;  %v6378_v31 = vpop.f32.mrf.mxu1 }
 0x68f   : > { %v6324_v44 = vpop.f32.mrf.mxu0  ;;  %v6433_v27 = vpop.f32.mrf.mxu2 }
 0x690   : > { %v6328_v5 = vadd.f32 %v6324_v44, %v6273_v63  ;;  %v6380_v30 = vpop.f32.mrf.mxu1 }
 0x692   : > { %v6382_v8 = vadd.f32 %v6378_v31, %v6328_v5 }
 0x694   : > { %v6437_v60 = vadd.f32 %v6433_v27, %v6382_v8 }
 0x696   : > { %v6439_v36 = vadd.f32 %v6438_v49, %v6437_v60 }
 0x697   : > { %v6326_v2 = vpop.f32.mrf.mxu0  ;;  %v6435_v41 = vpop.f32.mrf.mxu2 }
 0x698   : > { %v6440_v46 = vmax.f32 %v6439_v36, 0.0 }
 0x69a   : > { %6441 = vst [vmem:[%s432_s0] sm:$0x1] %v6440_v46 }
 0x69b   : > { %8573 = shalt.err (!%p8570_p3)
}
 0x69c   : > { %8502 = dma.vmem_to_hbm [thread:$0]  (%p8723_p5), %s6454_s23, 16, %s6456_s24, %s6443_s30  }
 0x69d PF: > { %p8508_p4 = scmp.ge.s32.totalorder %s8613_s28, 2  ;;  %s6467_s17 = sand.u32 1, %s8601_s25  }
 0x69e   : > { %s6468_s0 = scalar_lea.sflag [#allocation8], %s6467_s17 }
 0x69f   : > { %p8505_p7 = pnand %p8508_p4, %p8727_p6 }
 0x6a1   : > { %p8506_p8 = pneg %p8505_p7 }
 0x6a3   : > { %8591 = dma.done.wait (%p8506_p8), %s6468_s0, 16  }
 0x6a4   : > { %8593 = vsyncadd (%p8506_p8), %s6468_s0, 4294967280  ;;  %s10543_s1 = sld [smem:[#allocation10_spill]]  ;;  %p23_p9 = scmp.ge.s32.totalorder %s8710_s14, 4  }
 0x6a5   : > { %s10544_s25 = smov %s8605_s26  ;;  %s10545_s26 = smov %s8609_s27 }
 0x6a6   : > { %s10547_s28 = smov %s8710_s14  ;;  %25 = sbr.rel (!%p23_p9) target bundleno = 6 (0x6), region = 160 }
 0x6aa   : > { %s10546_s27 = smov %s10543_s1 }
 0x6ab   :  { %6473 = vsyncpa [#allocation8], 1 }
 0x6ac   :  { %6475 = vsyncpa [#allocation8 + $0x1], 1 }

</bundles_post_ra>
